<compile_context>
chip_gen: v7x
topology: tpu7x:2x2x1
jax: 0.10.0
libtpu: 0.0.40
codegen_flags: <defaults>
</compile_context>

<pallas_src>
import functools

import jax
import jax.numpy as jnp
from jax import lax
from jax.experimental import pallas as pl
from jax.experimental.pallas import tpu as pltpu


_PAD_BIAS = -2e9    # bias for lane-padded (non-existent) experts: always dominated
_MASK_BIAS = -1e9   # bias for masked experts: large but finite -> exp underflows to 0


def _router_kernel(x_ref, w1_ref, b1_ref, w2_ref, b2_ref,
                   probs_ref, topk_ref, *, top_k, idx_off, nbits, slab_w):
    """One token tile: Linear -> ReLU -> Linear -> softmax -> top-k (+ renorm)."""
    x = x_ref[...]                                            # [TM, H] bf16

    # Router MLP (Dropout p=0 == identity). f32 accumulation on the MXU.
    h = jnp.dot(x, w1_ref[...], preferred_element_type=jnp.float32) + b1_ref[...]
    h = jnp.maximum(h, 0.0)
    logits = jnp.dot(h.astype(w2_ref.dtype), w2_ref[...],
                     preferred_element_type=jnp.float32) + b2_ref[...]   # [TM, Ep]

    # Softmax over the (lane-padded) expert axis. Padded / masked lanes carry a large
    # finite negative bias so their probability underflows to exactly 0 (never NaN).
    m = jnp.max(logits, axis=-1, keepdims=True)
    e = jnp.exp(logits - m)
    denom = jnp.sum(e, axis=-1, keepdims=True)
    inv = pl.reciprocal(denom, approx=True)
    inv = inv * (2.0 - denom * inv)               # one Newton step -> ~f32-exact
    probs = e * inv
    probs_ref[...] = probs.astype(probs_ref.dtype)            # bf16 writeback

    # Top-k with a single cross-lane max per k: probs >= 0, so their f32 bit patterns
    # are monotone as int32.  Clobber the low `nbits` mantissa bits with
    # (idx_max - lane) so one integer max yields both the value and the smallest-index
    # tie-break; the value perturbation is <= 2^-16 relative.
    TMb, Ep = probs.shape
    ids = lax.broadcasted_iota(jnp.int32, (TMb, Ep), 1)
    idx_max = (1 << nbits) - 1
    pbits = pltpu.bitcast(probs, jnp.int32)
    keys = (pbits & ~idx_max) | (idx_max - ids)
    neg_key = jnp.iinfo(jnp.int32).min

    key_cols = []
    for _ in range(top_k):
        kmax = jnp.max(keys, axis=-1, keepdims=True)          # [TM, 1]  (XLU)
        key_cols.append(kmax)
        keys = jnp.where(keys == kmax, neg_key, keys)         # VPU select

    vals = [pltpu.bitcast(c & ~idx_max, jnp.float32) for c in key_cols]
    idxs = [(idx_max - (c & idx_max)).astype(jnp.float32) for c in key_cols]
    tsum = vals[0]
    for v in vals[1:]:
        tsum = tsum + v
    tsum = tsum + 1e-8                                        # exact renorm divide

    # Pack renormalized probs (lanes [0,K)) and indices (lanes [idx_off, idx_off+K))
    # into one slab, transpose at an aligned shape (TM, slab_w) -> (slab_w, TM) and
    # store only the first 2*idx_off rows: a single lane-dense unmasked store.
    lane = lax.broadcasted_iota(jnp.int32, (TMb, slab_w), 1)
    slab = jnp.zeros((TMb, slab_w), jnp.float32)
    for k in range(top_k):
        slab = jnp.where(lane == k, vals[k] / tsum, slab)
        slab = jnp.where(lane == idx_off + k, idxs[k], slab)
    topk_ref[...] = slab.T[: 2 * idx_off, :]


def _xavier_normal(key, shape):
    fan_in, fan_out = shape
    std = (2.0 / (fan_in + fan_out)) ** 0.5
    return std * jax.random.normal(key, shape, dtype=jnp.float32)


class BaseMoERouter:
    """JAX/Pallas re-implementation of the PyTorch BaseMoERouter forward pass."""

    def __init__(self, hidden_size, num_experts, top_k=2, capacity_factor=1.5,
                 dropout=0.0, key=None):
        self.hidden_size = hidden_size
        self.num_experts = num_experts
        self.top_k = min(top_k, num_experts)
        self.capacity_factor = capacity_factor
        # TODO(synk): training-mode nn.Dropout(p>0) is not implemented; default p=0 is identity.
        self.dropout = dropout
        self.e_pad = ((num_experts + 127) // 128) * 128   # lane-dense expert axis

        key = jax.random.PRNGKey(0) if key is None else key
        k1, k2 = jax.random.split(key)
        # bf16 weights feed the MXU; biases stay f32 (added after f32 accumulation).
        self.w1 = _xavier_normal(k1, (hidden_size, hidden_size)).astype(jnp.bfloat16)
        self.b1 = jnp.zeros((1, hidden_size), jnp.float32)
        w2 = _xavier_normal(k2, (hidden_size, num_experts))
        self.w2 = (jnp.zeros((hidden_size, self.e_pad), jnp.float32)
                   .at[:, :num_experts].set(w2).astype(jnp.bfloat16))
        self.b2 = jnp.zeros((1, num_experts), jnp.float32)

        # Buffers (eager Python-side state, mirroring register_buffer semantics).
        self.total_tokens = 0.0
        self.expert_usage_count = jnp.zeros((num_experts,), jnp.float32)
        self.routing_decisions = jnp.zeros((num_experts,), jnp.float32)

    # -------- VMEM budgeting (per chip generation) --------
    @staticmethod
    def _vmem_budget():
        try:
            cap = int(pltpu.get_tpu_info().vmem_capacity_bytes)
        except Exception:
            cap = 64 << 20            # conservative default (v7x per-TensorCore)
        return int(cap * 0.85)        # leave headroom for Mosaic internal scratch

    def _vmem_estimate(self, TM, H, Ep, idx_off, slab_w, weight_bufs):
        w = weight_bufs * (H * H * 2 + H * Ep * 2 + H * 4 + Ep * 4)     # weights/biases
        io = (2 * TM * H * 2                      # x tile, double-buffered bf16
              + 2 * TM * Ep * 2                   # probs out, double-buffered bf16
              + 2 * (2 * idx_off) * TM * 4)       # top-k out, double-buffered f32
        tmp = (TM * H * 4                         # relu activations
               + 4 * TM * Ep * 4                  # logits / exp / probs / keys
               + 3 * TM * slab_w * 4)             # top-k slab + transpose
        return int((w + io + tmp) * 1.15) + (2 << 20)

    # -------- Pallas hot path --------
    def _router_probs_topk(self, x2d, expert_mask=None):
        T, H = x2d.shape
        E, Ep, K = self.num_experts, self.e_pad, self.top_k
        idx_off = max(8, ((K + 7) // 8) * 8)
        slab_w = ((2 * idx_off + 127) // 128) * 128
        nbits = max((Ep - 1).bit_length(), 1)

        # Fold lane padding and the optional expert availability mask into the bias
        # (finite constants only: avoids -inf/NaN even when every expert is masked).
        b2_eff = jnp.full((1, Ep), _PAD_BIAS, jnp.float32).at[0, :E].set(self.b2[0])
        if expert_mask is not None:
            b2_eff = b2_eff.at[0, :E].add(
                (1.0 - expert_mask.astype(jnp.float32)) * _MASK_BIAS)

        budget = self._vmem_budget()
        T128 = ((max(T, 1) + 127) // 128) * 128
        x_bf = x2d.astype(jnp.bfloat16)

        kern = functools.partial(_router_kernel, top_k=K, idx_off=idx_off,
                                 nbits=nbits, slab_w=slab_w)

        result = None
        # Prefer single-buffered resident weights (pl.Buffered(1)); fall back to the
        # default pipelining if this jax build rejects it.
        for weight_bufs in (1, 2):
            try:
                TM = 128
                for cand in (2048, 1024, 512, 256, 128):
                    if self._vmem_estimate(cand, H, Ep, idx_off, slab_w,
                                           weight_bufs) <= budget:
                        TM = cand
                        break
                # TODO(synk): if even TM=128 overflows the per-core budget (very large H),
                #             w1 should be streamed with a K-reduction grid axis instead
                #             of staying fully VMEM-resident.
                TM = min(TM, T128)
                n_tiles = (T + TM - 1) // TM
                T_pad = n_tiles * TM
                x = x_bf if T_pad == T else jnp.pad(x_bf, ((0, T_pad - T), (0, 0)))

                est = self._vmem_estimate(TM, H, Ep, idx_off, slab_w, weight_bufs)
                vmem_limit = int(min(budget, max(32 << 20, int(est * 1.25))))

                if weight_bufs == 1:
                    mode = pl.Buffered(1)

                    def res_spec(shape, _m=mode):
                        return pl.BlockSpec(shape, lambda i: (0,) * len(shape),
                                            pipeline_mode=_m)
                else:
                    def res_spec(shape):
                        return pl.BlockSpec(shape, lambda i: (0,) * len(shape))

                result = pl.pallas_call(
                    kern,
                    grid=(n_tiles,),
                    in_specs=[
                        pl.BlockSpec((TM, H), lambda i: (i, 0)),   # x tiles (pipelined)
                        res_spec((H, H)),                          # w1 resident
                        res_spec((1, H)),                          # b1 resident
                        res_spec((H, Ep)),                         # w2 resident (padded)
                        res_spec((1, Ep)),                         # b2 + masks resident
                    ],
                    out_specs=(
                        pl.BlockSpec((TM, Ep), lambda i: (i, 0)),          # probs (bf16)
                        pl.BlockSpec((2 * idx_off, TM), lambda i: (0, i)),  # top-k slab
                    ),
                    out_shape=(
                        jax.ShapeDtypeStruct((T_pad, Ep), jnp.bfloat16),
                        jax.ShapeDtypeStruct((2 * idx_off, T_pad), jnp.float32),
                    ),
                    compiler_params=pltpu.CompilerParams(
                        dimension_semantics=("parallel",),
                        vmem_limit_bytes=vmem_limit),
                )(x, self.w1, self.b1, self.w2, b2_eff)
                break
            except Exception:
                if weight_bufs == 2:
                    raise

        probs_p, topk_t = result
        probs = probs_p[:T, :E].astype(jnp.float32)
        tkp = topk_t[:K, :T].T                                   # [T, K] f32
        tki = topk_t[idx_off:idx_off + K, :T].T.astype(jnp.int32)  # [T, K] int32 (exact)
        return probs, tkp, tki

    # -------- glue: capacity bucketing, loss, buffer updates --------
    def _compute_capacity(self, batch_size, seq_len):
        total_tokens = batch_size * seq_len
        return int(total_tokens * self.capacity_factor * self.top_k / self.num_experts)

    def __call__(self, hidden_states, expert_mask=None):
        B, S, H = hidden_states.shape
        T, K, E = B * S, self.top_k, self.num_experts
        x2d = hidden_states.reshape(T, H)

        probs2d, tkp, tki = self._router_probs_topk(x2d, expert_mask)

        # Per-expert counts of routed (token, k) slots — reused for loss & buffers.
        flat_e = tki.reshape(T * K)
        flat_p = tkp.reshape(T * K)
        oh = (flat_e[:, None] == jnp.arange(E, dtype=flat_e.dtype)[None, :]).astype(jnp.int32)
        counts = jnp.sum(oh, axis=0).astype(jnp.float32)

        # Dispatch / combine: sequential per-expert capacity slots in (b, s, k) order.
        # TODO(synk): the dense [B,S,E,capacity] tensors are mandated by the module's
        #             return signature; for realistic sizes a sparse (expert, slot,
        #             weight) representation or a dedicated scatter kernel would avoid
        #             this being the end-to-end HBM bottleneck.
        capacity = self._compute_capacity(B, S)
        if capacity > 0:
            pos_all = jnp.cumsum(oh, axis=0) - oh                   # exclusive cumcount
            pos = jnp.take_along_axis(pos_all, flat_e[:, None], axis=1)[:, 0]
            valid = pos < capacity
            tok = jnp.arange(T * K) // K
            pos_c = jnp.where(valid, pos, 0)
            dispatch = jnp.zeros((T, E, capacity), jnp.float32).at[
                tok, flat_e, pos_c].set(jnp.where(valid, 1.0, 0.0))
            combine = jnp.zeros((T, E, capacity), jnp.float32).at[
                tok, flat_e, pos_c].set(jnp.where(valid, flat_p, 0.0))
        else:
            dispatch = jnp.zeros((T, E, 0), jnp.float32)
            combine = jnp.zeros((T, E, 0), jnp.float32)
        cap = max(capacity, 0)
        dispatch = dispatch.reshape(B, S, E, cap)
        combine = combine.reshape(B, S, E, cap)

        # Load-balancing loss: E * sum(mean_prob_per_expert * expert_usage_rate).
        router_prob_per_expert = jnp.mean(probs2d, axis=0)
        expert_usage_rate = counts / float(T * K)
        aux_loss = jnp.sum(router_prob_per_expert * expert_usage_rate) * E

        # Buffer updates (functional equivalent of the torch.no_grad() block).
        self.total_tokens += float(T)
        self.expert_usage_count = self.expert_usage_count + counts
        self.routing_decisions = self.routing_decisions + counts

        router_probs = probs2d.reshape(B, S, E)
        return dispatch, combine, router_probs, aux_loss


if __name__ == "__main__":
    key = jax.random.PRNGKey(0)
    kp, kx = jax.random.split(key)
    B, S, H, E = 2, 8, 32, 8
    router = BaseMoERouter(hidden_size=H, num_experts=E, top_k=2,
                           capacity_factor=1.5, key=kp)
    x = jax.random.normal(kx, (B, S, H), dtype=jnp.float32)

    dispatch, combine, probs, aux = router(x)
    jax.block_until_ready((dispatch, combine, probs, aux))

    cap = int(B * S * 1.5 * 2 / E)
    assert dispatch.shape == (B, S, E, cap)
    assert combine.shape == (B, S, E, cap)
    assert probs.shape == (B, S, E)
    assert bool(jnp.isfinite(aux))
    # Probabilities over real experts sum to ~1 per token (bf16 writeback tolerance).
    assert bool(jnp.all(jnp.abs(jnp.sum(probs, axis=-1) - 1.0) < 2e-2))
    # Each token occupies at most top_k dispatch slots and combine weights renorm to <= 1.
    assert bool(jnp.all(jnp.sum(dispatch, axis=(2, 3)) <= 2.0))
    assert bool(jnp.all(jnp.sum(combine, axis=(2, 3)) <= 1.0 + 1e-3))

    # Masked-expert path: expert 0 disabled -> zero probability and never routed to.
    mask = jnp.ones((E,), jnp.float32).at[0].set(0.0)
    d2, c2, p2, a2 = router(x, expert_mask=mask)
    jax.block_until_ready((d2, c2, p2, a2))
    assert bool(jnp.all(p2[..., 0] == 0.0))
    assert bool(jnp.all(jnp.sum(d2[:, :, 0, :], axis=-1) == 0.0))

    print("KERNEL_OK")
</pallas_src>

<mosaic_0001>
module attributes {stable_mosaic.version = 11 : i64} {
  func.func @_router_kernel(%arg0: i32, %arg1: memref<128x32xbf16, #tpu.memory_space<vmem>>, %arg2: memref<32x32xbf16, #tpu.memory_space<vmem>>, %arg3: memref<1x32xf32, #tpu.memory_space<vmem>>, %arg4: memref<32x128xbf16, #tpu.memory_space<vmem>>, %arg5: memref<1x128xf32, #tpu.memory_space<vmem>>, %arg6: memref<128x128xbf16, #tpu.memory_space<vmem>>, %arg7: memref<16x128xf32, #tpu.memory_space<vmem>>) attributes {dimension_semantics = [#tpu.dimension_semantics<parallel>], iteration_bounds = array<i64: 1>, scalar_prefetch = 0 : i64, scratch_operands = 0 : i64, tpu.core_type = #tpu.core_type<tc>, window_params = [{transform_indices = @transform_0, window_bounds = array<i64: 128, 32>}, {pipeline_mode = #tpu.pipeline_mode<synchronous>, transform_indices = @transform_1, window_bounds = array<i64: 32, 32>}, {pipeline_mode = #tpu.pipeline_mode<synchronous>, transform_indices = @transform_2, window_bounds = array<i64: 1, 32>}, {pipeline_mode = #tpu.pipeline_mode<synchronous>, transform_indices = @transform_3, window_bounds = array<i64: 32, 128>}, {pipeline_mode = #tpu.pipeline_mode<synchronous>, transform_indices = @transform_4, window_bounds = array<i64: 1, 128>}, {transform_indices = @transform_5, window_bounds = array<i64: 128, 128>}, {transform_indices = @transform_6, window_bounds = array<i64: 16, 128>}]} {
    %c0 = arith.constant 0 : index
    %c0_0 = arith.constant 0 : index
    %0 = vector.load %arg1[%c0, %c0_0] : memref<128x32xbf16, #tpu.memory_space<vmem>>, vector<128x32xbf16>
    %c0_1 = arith.constant 0 : index
    %c0_2 = arith.constant 0 : index
    %1 = vector.load %arg2[%c0_1, %c0_2] : memref<32x32xbf16, #tpu.memory_space<vmem>>, vector<32x32xbf16>
    %cst = arith.constant dense<0.000000e+00> : vector<128x32xf32>
    %2 = tpu.matmul %0, %1, %cst {dimension_numbers = #tpu.dot_dimension_numbers<[1], [0], [0], [1], [0, 0, 1, 1], [], []>} : vector<128x32xbf16>, vector<32x32xbf16>, vector<128x32xf32> -> vector<128x32xf32>
    %c0_3 = arith.constant 0 : index
    %c0_4 = arith.constant 0 : index
    %3 = vector.load %arg3[%c0_3, %c0_4] : memref<1x32xf32, #tpu.memory_space<vmem>>, vector<1x32xf32>
    %4 = vector.broadcast %3 : vector<1x32xf32> to vector<128x32xf32>
    %5 = arith.addf %2, %4 : vector<128x32xf32>
    %cst_5 = arith.constant 0.000000e+00 : f32
    %6 = vector.broadcast %cst_5 : f32 to vector<128x32xf32>
    %7 = arith.maximumf %5, %6 : vector<128x32xf32>
    %8 = arith.truncf %7 : vector<128x32xf32> to vector<128x32xbf16>
    %c0_6 = arith.constant 0 : index
    %c0_7 = arith.constant 0 : index
    %9 = vector.load %arg4[%c0_6, %c0_7] : memref<32x128xbf16, #tpu.memory_space<vmem>>, vector<32x128xbf16>
    %cst_8 = arith.constant dense<0.000000e+00> : vector<128x128xf32>
    %10 = tpu.matmul %8, %9, %cst_8 {dimension_numbers = #tpu.dot_dimension_numbers<[1], [0], [0], [1], [0, 0, 1, 1], [], []>} : vector<128x32xbf16>, vector<32x128xbf16>, vector<128x128xf32> -> vector<128x128xf32>
    %c0_9 = arith.constant 0 : index
    %c0_10 = arith.constant 0 : index
    %11 = vector.load %arg5[%c0_9, %c0_10] : memref<1x128xf32, #tpu.memory_space<vmem>>, vector<1x128xf32>
    %12 = vector.broadcast %11 : vector<1x128xf32> to vector<128x128xf32>
    %13 = arith.addf %10, %12 : vector<128x128xf32>
    %cst_11 = arith.constant dense<0xFF800000> : vector<128xf32>
    %14 = vector.multi_reduction <maximumf>, %13, %cst_11 [1] : vector<128x128xf32> to vector<128xf32>
    %15 = vector.shape_cast %14 : vector<128xf32> to vector<128x1xf32>
    %16 = vector.broadcast %15 : vector<128x1xf32> to vector<128x128xf32>
    %17 = arith.subf %13, %16 : vector<128x128xf32>
    %18 = math.exp %17 : vector<128x128xf32>
    %cst_12 = arith.constant dense<0.000000e+00> : vector<128xf32>
    %19 = vector.multi_reduction <add>, %18, %cst_12 [1] : vector<128x128xf32> to vector<128xf32>
    %20 = vector.shape_cast %19 : vector<128xf32> to vector<128x1xf32>
    %21 = tpu.reciprocal %20 {approx = true} : vector<128x1xf32> -> vector<128x1xf32>
    %22 = arith.mulf %20, %21 : vector<128x1xf32>
    %cst_13 = arith.constant 2.000000e+00 : f32
    %23 = vector.broadcast %cst_13 : f32 to vector<128x1xf32>
    %24 = arith.subf %23, %22 : vector<128x1xf32>
    %25 = arith.mulf %21, %24 : vector<128x1xf32>
    %26 = vector.broadcast %25 : vector<128x1xf32> to vector<128x128xf32>
    %27 = arith.mulf %18, %26 : vector<128x128xf32>
    %28 = arith.truncf %27 : vector<128x128xf32> to vector<128x128xbf16>
    %c0_14 = arith.constant 0 : index
    %c0_15 = arith.constant 0 : index
    %29 = vector.load %arg6[%c0_14, %c0_15] : memref<128x128xbf16, #tpu.memory_space<vmem>>, vector<128x128xbf16>
    tpu.vector_store %arg6[%c0_14, %c0_15], %28 {strides = array<i32>} : memref<128x128xbf16, #tpu.memory_space<vmem>>, vector<128x128xbf16>,
    %30 = tpu.iota {dimensions = array<i32: 1>} : vector<128x128xi32>
    %31 = tpu.bitcast %27 : vector<128x128xf32> -> vector<128x128xi32>
    %c-128_i32 = arith.constant -128 : i32
    %32 = vector.broadcast %c-128_i32 : i32 to vector<128x128xi32>
    %33 = arith.andi %31, %32 : vector<128x128xi32>
    %c127_i32 = arith.constant 127 : i32
    %34 = vector.broadcast %c127_i32 : i32 to vector<128x128xi32>
    %35 = arith.subi %34, %30 : vector<128x128xi32>
    %36 = arith.ori %33, %35 : vector<128x128xi32>
    %cst_16 = arith.constant dense<-2147483648> : vector<128xi32>
    %37 = vector.multi_reduction <maxsi>, %36, %cst_16 [1] : vector<128x128xi32> to vector<128xi32>
    %38 = vector.shape_cast %37 : vector<128xi32> to vector<128x1xi32>
    %39 = vector.broadcast %38 : vector<128x1xi32> to vector<128x128xi32>
    %40 = arith.cmpi eq, %36, %39 : vector<128x128xi32>
    %c-2147483648_i32 = arith.constant -2147483648 : i32
    %41 = vector.broadcast %c-2147483648_i32 : i32 to vector<128x128xi32>
    %42 = arith.select %40, %41, %36 : vector<128x128xi1>, vector<128x128xi32>
    %cst_17 = arith.constant dense<-2147483648> : vector<128xi32>
    %43 = vector.multi_reduction <maxsi>, %42, %cst_17 [1] : vector<128x128xi32> to vector<128xi32>
    %44 = vector.shape_cast %43 : vector<128xi32> to vector<128x1xi32>
    %c-128_i32_18 = arith.constant -128 : i32
    %45 = vector.broadcast %c-128_i32_18 : i32 to vector<128x1xi32>
    %46 = arith.andi %38, %45 : vector<128x1xi32>
    %47 = tpu.bitcast %46 : vector<128x1xi32> -> vector<128x1xf32>
    %c-128_i32_19 = arith.constant -128 : i32
    %48 = vector.broadcast %c-128_i32_19 : i32 to vector<128x1xi32>
    %49 = arith.andi %44, %48 : vector<128x1xi32>
    %50 = tpu.bitcast %49 : vector<128x1xi32> -> vector<128x1xf32>
    %c127_i32_20 = arith.constant 127 : i32
    %51 = vector.broadcast %c127_i32_20 : i32 to vector<128x1xi32>
    %52 = arith.andi %38, %51 : vector<128x1xi32>
    %c127_i32_21 = arith.constant 127 : i32
    %53 = vector.broadcast %c127_i32_21 : i32 to vector<128x1xi32>
    %54 = arith.subi %53, %52 : vector<128x1xi32>
    %55 = arith.sitofp %54 : vector<128x1xi32> to vector<128x1xf32>
    %c127_i32_22 = arith.constant 127 : i32
    %56 = vector.broadcast %c127_i32_22 : i32 to vector<128x1xi32>
    %57 = arith.andi %44, %56 : vector<128x1xi32>
    %c127_i32_23 = arith.constant 127 : i32
    %58 = vector.broadcast %c127_i32_23 : i32 to vector<128x1xi32>
    %59 = arith.subi %58, %57 : vector<128x1xi32>
    %60 = arith.sitofp %59 : vector<128x1xi32> to vector<128x1xf32>
    %61 = arith.addf %47, %50 : vector<128x1xf32>
    %cst_24 = arith.constant 9.99999993E-9 : f32
    %62 = vector.broadcast %cst_24 : f32 to vector<128x1xf32>
    %63 = arith.addf %61, %62 : vector<128x1xf32>
    %64 = tpu.iota {dimensions = array<i32: 1>} : vector<128x128xi32>
    %cst_25 = arith.constant 0.000000e+00 : f32
    %65 = vector.broadcast %cst_25 : f32 to vector<128x128xf32>
    %c0_i32 = arith.constant 0 : i32
    %66 = vector.broadcast %c0_i32 : i32 to vector<128x128xi32>
    %67 = arith.cmpi eq, %64, %66 : vector<128x128xi32>
    %68 = arith.divf %47, %63 : vector<128x1xf32>
    %69 = vector.shape_cast %68 : vector<128x1xf32> to vector<128x1xf32>
    %70 = vector.broadcast %69 : vector<128x1xf32> to vector<128x128xf32>
    %71 = arith.select %67, %70, %65 : vector<128x128xi1>, vector<128x128xf32>
    %c8_i32 = arith.constant 8 : i32
    %72 = vector.broadcast %c8_i32 : i32 to vector<128x128xi32>
    %73 = arith.cmpi eq, %64, %72 : vector<128x128xi32>
    %74 = vector.shape_cast %55 : vector<128x1xf32> to vector<128x1xf32>
    %75 = vector.broadcast %74 : vector<128x1xf32> to vector<128x128xf32>
    %76 = arith.select %73, %75, %71 : vector<128x128xi1>, vector<128x128xf32>
    %c1_i32 = arith.constant 1 : i32
    %77 = vector.broadcast %c1_i32 : i32 to vector<128x128xi32>
    %78 = arith.cmpi eq, %64, %77 : vector<128x128xi32>
    %79 = arith.divf %50, %63 : vector<128x1xf32>
    %80 = vector.shape_cast %79 : vector<128x1xf32> to vector<128x1xf32>
    %81 = vector.broadcast %80 : vector<128x1xf32> to vector<128x128xf32>
    %82 = arith.select %78, %81, %76 : vector<128x128xi1>, vector<128x128xf32>
    %c9_i32 = arith.constant 9 : i32
    %83 = vector.broadcast %c9_i32 : i32 to vector<128x128xi32>
    %84 = arith.cmpi eq, %64, %83 : vector<128x128xi32>
    %85 = vector.shape_cast %60 : vector<128x1xf32> to vector<128x1xf32>
    %86 = vector.broadcast %85 : vector<128x1xf32> to vector<128x128xf32>
    %87 = arith.select %84, %86, %82 : vector<128x128xi1>, vector<128x128xf32>
    %88 = tpu.transpose %87, [1, 0] : vector<128x128xf32> -> vector<128x128xf32>
    %89 = vector.extract_strided_slice %88 {offsets = [0, 0], sizes = [16, 128], strides = [1, 1]} : vector<128x128xf32> to vector<16x128xf32>
    %c0_26 = arith.constant 0 : index
    %c0_27 = arith.constant 0 : index
    %90 = vector.load %arg7[%c0_26, %c0_27] : memref<16x128xf32, #tpu.memory_space<vmem>>, vector<16x128xf32>
    tpu.vector_store %arg7[%c0_26, %c0_27], %89 {strides = array<i32>} : memref<16x128xf32, #tpu.memory_space<vmem>>, vector<16x128xf32>,
    return
  }
  func.func @transform_0(%arg0: i32) -> (i32, i32) {
    %c0_i32 = arith.constant 0 : i32
    %c0_i32_0 = arith.constant 0 : i32
    return %arg0, %c0_i32 : i32, i32
  }
  func.func @transform_1(%arg0: i32) -> (i32, i32) {
    %c0_i32 = arith.constant 0 : i32
    %c0_i32_0 = arith.constant 0 : i32
    %c0_i32_1 = arith.constant 0 : i32
    return %c0_i32, %c0_i32_0 : i32, i32
  }
  func.func @transform_2(%arg0: i32) -> (i32, i32) {
    %c0_i32 = arith.constant 0 : i32
    %c0_i32_0 = arith.constant 0 : i32
    %c0_i32_1 = arith.constant 0 : i32
    return %c0_i32, %c0_i32_0 : i32, i32
  }
  func.func @transform_3(%arg0: i32) -> (i32, i32) {
    %c0_i32 = arith.constant 0 : i32
    %c0_i32_0 = arith.constant 0 : i32
    %c0_i32_1 = arith.constant 0 : i32
    return %c0_i32, %c0_i32_0 : i32, i32
  }
  func.func @transform_4(%arg0: i32) -> (i32, i32) {
    %c0_i32 = arith.constant 0 : i32
    %c0_i32_0 = arith.constant 0 : i32
    %c0_i32_1 = arith.constant 0 : i32
    return %c0_i32, %c0_i32_0 : i32, i32
  }
  func.func @transform_5(%arg0: i32) -> (i32, i32) {
    %c0_i32 = arith.constant 0 : i32
    %c0_i32_0 = arith.constant 0 : i32
    return %arg0, %c0_i32 : i32, i32
  }
  func.func @transform_6(%arg0: i32) -> (i32, i32) {
    %c0_i32 = arith.constant 0 : i32
    %c0_i32_0 = arith.constant 0 : i32
    return %c0_i32, %arg0 : i32, i32
  }
}

module attributes {stable_mosaic.version = 11 : i64} {
  func.func @_router_kernel(%arg0: i32, %arg1: memref<128x32xbf16, #tpu.memory_space<vmem>>, %arg2: memref<32x32xbf16, #tpu.memory_space<vmem>>, %arg3: memref<1x32xf32, #tpu.memory_space<vmem>>, %arg4: memref<32x128xbf16, #tpu.memory_space<vmem>>, %arg5: memref<1x128xf32, #tpu.memory_space<vmem>>, %arg6: memref<128x128xbf16, #tpu.memory_space<vmem>>, %arg7: memref<16x128xf32, #tpu.memory_space<vmem>>) attributes {dimension_semantics = [#tpu.dimension_semantics<parallel>], iteration_bounds = array<i64: 1>, scalar_prefetch = 0 : i64, scratch_operands = 0 : i64, tpu.core_type = #tpu.core_type<tc>, window_params = [{transform_indices = @transform_0, window_bounds = array<i64: 128, 32>}, {pipeline_mode = #tpu.pipeline_mode<synchronous>, transform_indices = @transform_1, window_bounds = array<i64: 32, 32>}, {pipeline_mode = #tpu.pipeline_mode<synchronous>, transform_indices = @transform_2, window_bounds = array<i64: 1, 32>}, {pipeline_mode = #tpu.pipeline_mode<synchronous>, transform_indices = @transform_3, window_bounds = array<i64: 32, 128>}, {pipeline_mode = #tpu.pipeline_mode<synchronous>, transform_indices = @transform_4, window_bounds = array<i64: 1, 128>}, {transform_indices = @transform_5, window_bounds = array<i64: 128, 128>}, {transform_indices = @transform_6, window_bounds = array<i64: 16, 128>}]} {
    %c0 = arith.constant 0 : index
    %c0_0 = arith.constant 0 : index
    %0 = vector.load %arg1[%c0, %c0_0] : memref<128x32xbf16, #tpu.memory_space<vmem>>, vector<128x32xbf16>
    %c0_1 = arith.constant 0 : index
    %c0_2 = arith.constant 0 : index
    %1 = vector.load %arg2[%c0_1, %c0_2] : memref<32x32xbf16, #tpu.memory_space<vmem>>, vector<32x32xbf16>
    %cst = arith.constant dense<0.000000e+00> : vector<128x32xf32>
    %2 = tpu.matmul %0, %1, %cst {dimension_numbers = #tpu.dot_dimension_numbers<[1], [0], [0], [1], [0, 0, 1, 1], [], []>} : vector<128x32xbf16>, vector<32x32xbf16>, vector<128x32xf32> -> vector<128x32xf32>
    %c0_3 = arith.constant 0 : index
    %c0_4 = arith.constant 0 : index
    %3 = vector.load %arg3[%c0_3, %c0_4] : memref<1x32xf32, #tpu.memory_space<vmem>>, vector<1x32xf32>
    %4 = vector.broadcast %3 : vector<1x32xf32> to vector<128x32xf32>
    %5 = arith.addf %2, %4 : vector<128x32xf32>
    %cst_5 = arith.constant 0.000000e+00 : f32
    %6 = vector.broadcast %cst_5 : f32 to vector<128x32xf32>
    %7 = arith.maximumf %5, %6 : vector<128x32xf32>
    %8 = arith.truncf %7 : vector<128x32xf32> to vector<128x32xbf16>
    %c0_6 = arith.constant 0 : index
    %c0_7 = arith.constant 0 : index
    %9 = vector.load %arg4[%c0_6, %c0_7] : memref<32x128xbf16, #tpu.memory_space<vmem>>, vector<32x128xbf16>
    %cst_8 = arith.constant dense<0.000000e+00> : vector<128x128xf32>
    %10 = tpu.matmul %8, %9, %cst_8 {dimension_numbers = #tpu.dot_dimension_numbers<[1], [0], [0], [1], [0, 0, 1, 1], [], []>} : vector<128x32xbf16>, vector<32x128xbf16>, vector<128x128xf32> -> vector<128x128xf32>
    %c0_9 = arith.constant 0 : index
    %c0_10 = arith.constant 0 : index
    %11 = vector.load %arg5[%c0_9, %c0_10] : memref<1x128xf32, #tpu.memory_space<vmem>>, vector<1x128xf32>
    %12 = vector.broadcast %11 : vector<1x128xf32> to vector<128x128xf32>
    %13 = arith.addf %10, %12 : vector<128x128xf32>
    %cst_11 = arith.constant dense<0xFF800000> : vector<128xf32>
    %14 = vector.multi_reduction <maximumf>, %13, %cst_11 [1] : vector<128x128xf32> to vector<128xf32>
    %15 = vector.shape_cast %14 : vector<128xf32> to vector<128x1xf32>
    %16 = vector.broadcast %15 : vector<128x1xf32> to vector<128x128xf32>
    %17 = arith.subf %13, %16 : vector<128x128xf32>
    %18 = math.exp %17 : vector<128x128xf32>
    %cst_12 = arith.constant dense<0.000000e+00> : vector<128xf32>
    %19 = vector.multi_reduction <add>, %18, %cst_12 [1] : vector<128x128xf32> to vector<128xf32>
    %20 = vector.shape_cast %19 : vector<128xf32> to vector<128x1xf32>
    %21 = tpu.reciprocal %20 {approx = true} : vector<128x1xf32> -> vector<128x1xf32>
    %22 = arith.mulf %20, %21 : vector<128x1xf32>
    %cst_13 = arith.constant 2.000000e+00 : f32
    %23 = vector.broadcast %cst_13 : f32 to vector<128x1xf32>
    %24 = arith.subf %23, %22 : vector<128x1xf32>
    %25 = arith.mulf %21, %24 : vector<128x1xf32>
    %26 = vector.broadcast %25 : vector<128x1xf32> to vector<128x128xf32>
    %27 = arith.mulf %18, %26 : vector<128x128xf32>
    %28 = arith.truncf %27 : vector<128x128xf32> to vector<128x128xbf16>
    %c0_14 = arith.constant 0 : index
    %c0_15 = arith.constant 0 : index
    %29 = vector.load %arg6[%c0_14, %c0_15] : memref<128x128xbf16, #tpu.memory_space<vmem>>, vector<128x128xbf16>
    tpu.vector_store %arg6[%c0_14, %c0_15], %28 {strides = array<i32>} : memref<128x128xbf16, #tpu.memory_space<vmem>>, vector<128x128xbf16>,
    %30 = tpu.iota {dimensions = array<i32: 1>} : vector<128x128xi32>
    %31 = tpu.bitcast %27 : vector<128x128xf32> -> vector<128x128xi32>
    %c-128_i32 = arith.constant -128 : i32
    %32 = vector.broadcast %c-128_i32 : i32 to vector<128x128xi32>
    %33 = arith.andi %31, %32 : vector<128x128xi32>
    %c127_i32 = arith.constant 127 : i32
    %34 = vector.broadcast %c127_i32 : i32 to vector<128x128xi32>
    %35 = arith.subi %34, %30 : vector<128x128xi32>
    %36 = arith.ori %33, %35 : vector<128x128xi32>
    %cst_16 = arith.constant dense<-2147483648> : vector<128xi32>
    %37 = vector.multi_reduction <maxsi>, %36, %cst_16 [1] : vector<128x128xi32> to vector<128xi32>
    %38 = vector.shape_cast %37 : vector<128xi32> to vector<128x1xi32>
    %39 = vector.broadcast %38 : vector<128x1xi32> to vector<128x128xi32>
    %40 = arith.cmpi eq, %36, %39 : vector<128x128xi32>
    %c-2147483648_i32 = arith.constant -2147483648 : i32
    %41 = vector.broadcast %c-2147483648_i32 : i32 to vector<128x128xi32>
    %42 = arith.select %40, %41, %36 : vector<128x128xi1>, vector<128x128xi32>
    %cst_17 = arith.constant dense<-2147483648> : vector<128xi32>
    %43 = vector.multi_reduction <maxsi>, %42, %cst_17 [1] : vector<128x128xi32> to vector<128xi32>
    %44 = vector.shape_cast %43 : vector<128xi32> to vector<128x1xi32>
    %c-128_i32_18 = arith.constant -128 : i32
    %45 = vector.broadcast %c-128_i32_18 : i32 to vector<128x1xi32>
    %46 = arith.andi %38, %45 : vector<128x1xi32>
    %47 = tpu.bitcast %46 : vector<128x1xi32> -> vector<128x1xf32>
    %c-128_i32_19 = arith.constant -128 : i32
    %48 = vector.broadcast %c-128_i32_19 : i32 to vector<128x1xi32>
    %49 = arith.andi %44, %48 : vector<128x1xi32>
    %50 = tpu.bitcast %49 : vector<128x1xi32> -> vector<128x1xf32>
    %c127_i32_20 = arith.constant 127 : i32
    %51 = vector.broadcast %c127_i32_20 : i32 to vector<128x1xi32>
    %52 = arith.andi %38, %51 : vector<128x1xi32>
    %c127_i32_21 = arith.constant 127 : i32
    %53 = vector.broadcast %c127_i32_21 : i32 to vector<128x1xi32>
    %54 = arith.subi %53, %52 : vector<128x1xi32>
    %55 = arith.sitofp %54 : vector<128x1xi32> to vector<128x1xf32>
    %c127_i32_22 = arith.constant 127 : i32
    %56 = vector.broadcast %c127_i32_22 : i32 to vector<128x1xi32>
    %57 = arith.andi %44, %56 : vector<128x1xi32>
    %c127_i32_23 = arith.constant 127 : i32
    %58 = vector.broadcast %c127_i32_23 : i32 to vector<128x1xi32>
    %59 = arith.subi %58, %57 : vector<128x1xi32>
    %60 = arith.sitofp %59 : vector<128x1xi32> to vector<128x1xf32>
    %61 = arith.addf %47, %50 : vector<128x1xf32>
    %cst_24 = arith.constant 9.99999993E-9 : f32
    %62 = vector.broadcast %cst_24 : f32 to vector<128x1xf32>
    %63 = arith.addf %61, %62 : vector<128x1xf32>
    %64 = tpu.iota {dimensions = array<i32: 1>} : vector<128x128xi32>
    %cst_25 = arith.constant 0.000000e+00 : f32
    %65 = vector.broadcast %cst_25 : f32 to vector<128x128xf32>
    %c0_i32 = arith.constant 0 : i32
    %66 = vector.broadcast %c0_i32 : i32 to vector<128x128xi32>
    %67 = arith.cmpi eq, %64, %66 : vector<128x128xi32>
    %68 = arith.divf %47, %63 : vector<128x1xf32>
    %69 = vector.shape_cast %68 : vector<128x1xf32> to vector<128x1xf32>
    %70 = vector.broadcast %69 : vector<128x1xf32> to vector<128x128xf32>
    %71 = arith.select %67, %70, %65 : vector<128x128xi1>, vector<128x128xf32>
    %c8_i32 = arith.constant 8 : i32
    %72 = vector.broadcast %c8_i32 : i32 to vector<128x128xi32>
    %73 = arith.cmpi eq, %64, %72 : vector<128x128xi32>
    %74 = vector.shape_cast %55 : vector<128x1xf32> to vector<128x1xf32>
    %75 = vector.broadcast %74 : vector<128x1xf32> to vector<128x128xf32>
    %76 = arith.select %73, %75, %71 : vector<128x128xi1>, vector<128x128xf32>
    %c1_i32 = arith.constant 1 : i32
    %77 = vector.broadcast %c1_i32 : i32 to vector<128x128xi32>
    %78 = arith.cmpi eq, %64, %77 : vector<128x128xi32>
    %79 = arith.divf %50, %63 : vector<128x1xf32>
    %80 = vector.shape_cast %79 : vector<128x1xf32> to vector<128x1xf32>
    %81 = vector.broadcast %80 : vector<128x1xf32> to vector<128x128xf32>
    %82 = arith.select %78, %81, %76 : vector<128x128xi1>, vector<128x128xf32>
    %c9_i32 = arith.constant 9 : i32
    %83 = vector.broadcast %c9_i32 : i32 to vector<128x128xi32>
    %84 = arith.cmpi eq, %64, %83 : vector<128x128xi32>
    %85 = vector.shape_cast %60 : vector<128x1xf32> to vector<128x1xf32>
    %86 = vector.broadcast %85 : vector<128x1xf32> to vector<128x128xf32>
    %87 = arith.select %84, %86, %82 : vector<128x128xi1>, vector<128x128xf32>
    %88 = tpu.transpose %87, [1, 0] : vector<128x128xf32> -> vector<128x128xf32>
    %89 = vector.extract_strided_slice %88 {offsets = [0, 0], sizes = [16, 128], strides = [1, 1]} : vector<128x128xf32> to vector<16x128xf32>
    %c0_26 = arith.constant 0 : index
    %c0_27 = arith.constant 0 : index
    %90 = vector.load %arg7[%c0_26, %c0_27] : memref<16x128xf32, #tpu.memory_space<vmem>>, vector<16x128xf32>
    tpu.vector_store %arg7[%c0_26, %c0_27], %89 {strides = array<i32>} : memref<16x128xf32, #tpu.memory_space<vmem>>, vector<16x128xf32>,
    return
  }
  func.func @transform_0(%arg0: i32) -> (i32, i32) {
    %c0_i32 = arith.constant 0 : i32
    %c0_i32_0 = arith.constant 0 : i32
    return %arg0, %c0_i32 : i32, i32
  }
  func.func @transform_1(%arg0: i32) -> (i32, i32) {
    %c0_i32 = arith.constant 0 : i32
    %c0_i32_0 = arith.constant 0 : i32
    %c0_i32_1 = arith.constant 0 : i32
    return %c0_i32, %c0_i32_0 : i32, i32
  }
  func.func @transform_2(%arg0: i32) -> (i32, i32) {
    %c0_i32 = arith.constant 0 : i32
    %c0_i32_0 = arith.constant 0 : i32
    %c0_i32_1 = arith.constant 0 : i32
    return %c0_i32, %c0_i32_0 : i32, i32
  }
  func.func @transform_3(%arg0: i32) -> (i32, i32) {
    %c0_i32 = arith.constant 0 : i32
    %c0_i32_0 = arith.constant 0 : i32
    %c0_i32_1 = arith.constant 0 : i32
    return %c0_i32, %c0_i32_0 : i32, i32
  }
  func.func @transform_4(%arg0: i32) -> (i32, i32) {
    %c0_i32 = arith.constant 0 : i32
    %c0_i32_0 = arith.constant 0 : i32
    %c0_i32_1 = arith.constant 0 : i32
    return %c0_i32, %c0_i32_0 : i32, i32
  }
  func.func @transform_5(%arg0: i32) -> (i32, i32) {
    %c0_i32 = arith.constant 0 : i32
    %c0_i32_0 = arith.constant 0 : i32
    return %arg0, %c0_i32 : i32, i32
  }
  func.func @transform_6(%arg0: i32) -> (i32, i32) {
    %c0_i32 = arith.constant 0 : i32
    %c0_i32_0 = arith.constant 0 : i32
    return %c0_i32, %arg0 : i32, i32
  }
}

</mosaic_0001>

<bundles_post_ra>
// kernel: tpu_custom_call.1
= control target key start
LH: loop header
LB: loop body
LE: loop exit
PB: predicated region body
PF: predicated region fallthrough
CT: control target
= control target key end

     0   :  { %12 = vsyncpa [#allocation3], 0  ;;  %vm104_vm0 = vcmask 261120   ;;  %s3201_s0 = inlined_call_operand.vmem [shape: bf16[128,32], index: 0, kind: input, shape index: {}]   ;;  %s3202_s1 = inlined_call_operand.vmem [shape: bf16[32,32], index: 1, kind: input, shape index: {}]   ;;  %s3203_s2 = inlined_call_operand.vmem [shape: f32[1,32], index: 2, kind: input, shape index: {}]   ;;  %s3204_s3 = inlined_call_operand.vmem [shape: bf16[32,128], index: 3, kind: input, shape index: {}]   ;;  %s3205_s4 = inlined_call_operand.vmem [shape: f32[1,128], index: 4, kind: input, shape index: {}]   ;;  %s3206_s5 = inlined_call_operand.hbm [shape: bf16[128,128], index: 5, kind: output, shape index: {0}]   ;;  %s3207_s6 = inlined_call_operand.hbm [shape: f32[16,128], index: 6, kind: output, shape index: {1}]  }
   0x1   :  { %v1746_v0 = vld [vmem:[%s3202_s1] sm:$0xff]   ;;  %v1747_v1 = vld [vmem:[%s3202_s1 + $0x8] sm:$0xff]   ;;  %v1750_v4 = vld [vmem:[%s3201_s0 + $0x10] sm:$0xff]  }
   0x2   :  { %1700 = vmatprep.subr.bf16.mxu0 %v1746_v0  ;;  %v1748_v2 = vld [vmem:[%s3201_s0] sm:$0xff]   ;;  %v1749_v3 = vld [vmem:[%s3201_s0 + $0x8] sm:$0xff]  }
   0x3   :  { %1701 = vmatpush3.bf16.msra.mxu0 %v1746_v0  ;;  %1704 = vmatprep.mubr.msk.bf16.mxu0 %vm104_vm0, %v1748_v2 }
   0x4   :  { %1702 = vmatprep.subr.bf16.mxu0 %v1747_v1 }
   0x7   :  { %1703 = vmatpush3.bf16.msra.mxu0 %v1747_v1 }
   0xa   :  { %1705 = vmatmul.mubr.msk.bf16.vlgmr.msra.gmra.mrb[0].mxu0 %vm104_vm0, %v1749_v3 }
   0xb   :  { %1708 = vmatprep.mubr.msk.bf16.mxu0 %vm104_vm0, %v1750_v4 }
   0xc   :  { %13 = vsyncpa [#allocation5], 0  ;;  %v1751_v5 = vld [vmem:[%s3201_s0 + $0x18] sm:$0xff]   ;;  %v1752_v6 = vld [vmem:[%s3201_s0 + $0x20] sm:$0xff]  }
   0xd   :  { %v1753_v7 = vld [vmem:[%s3201_s0 + $0x28] sm:$0xff]   ;;  %v1754_v8 = vld [vmem:[%s3201_s0 + $0x30] sm:$0xff]   ;;  %v1755_v9 = vld [vmem:[%s3201_s0 + $0x38] sm:$0xff]  }
   0xe   :  { %v1756_v10 = vld [vmem:[%s3204_s3] sm:$0xff]   ;;  %v1757_v11 = vld [vmem:[%s3204_s3 + $0x8] sm:$0xff]   ;;  %s1902_s3 = smov [#allocation2]  }
   0xf   :  { %1720 = vmatprep.subr.bf16.mxu1 %v1756_v10  ;;  %v1571_v12 = vld [vmem:[%s3203_s2] ss:$0 sm:$0xff] }
  0x10   :  { %1721 = vmatpush3.bf16.msra.mxu1 %v1756_v10 }
  0x11   :  { %1722 = vmatprep.subr.bf16.mxu1 %v1757_v11 }
  0x12   :  { %1709 = vmatmul.mubr.msk.bf16.gmra.mrb[4].mxu0 %vm104_vm0, %v1751_v5  ;;  %v1590_v5 = vld [vmem:[%s3205_s4] ss:$0 sm:$0xff]  ;;  %s1544_s4 = sshll.u32 %s1902_s3, 4  ;;  %s1545_s4 = int_to_ptr.vmem [resolvable:$true] %s1544_s4 }
  0x13   :  { %1712 = vmatprep.mubr.msk.bf16.mxu0 %vm104_vm0, %v1752_v6  ;;  %s1854_s22 = scalar_lea.vmem %s1545_s4, 1024  ;;  %p1859_p1 = scmp.lt.s32.totalorder %s1545_s4, %s1545_s4 }
  0x14   :  { %1723 = vmatpush3.bf16.msra.mxu1 %v1757_v11  ;;  %p1855_p0 = scmp.ne.s32.totalorder %s1545_s4, %s1854_s22  ;;  %p1860_p2 = scmp.lt.s32.totalorder %s1854_s22, %s1854_s22 }
  0x16   :  { %p1861_p3 = por %p1860_p2, %p1859_p1 }
  0x18   :  { %p1862_p4 = pnand %p1861_p3, %p1855_p0 }
  0x1a   :  { %1713 = vmatmul.mubr.msk.bf16.gmra.mrb[8].mxu0 %vm104_vm0, %v1753_v7 }
  0x1b   :  { %1716 = vmatprep.mubr.msk.bf16.mxu0 %vm104_vm0, %v1754_v8 }
  0x22   :  { %1717 = vmatmul.mubr.msk.bf16.gmra.mrb[12].mxu0 %vm104_vm0, %v1755_v9 }
  0xdd   :  { %v1706_v13 = vpop.f32.mrb[0].mxu0 }
  0xde   :  { %v172_v14 = vadd.f32 %v1706_v13, %v1571_v12  ;;  %v163_v15 = vpop.f32.mrb[1].mxu0 }
  0xdf   :  { %v164_v16 = vadd.f32 %v1571_v12, %v163_v15  ;;  %v1707_v17 = vpop.f32.mrb[2].mxu0 }
  0xe0   :  { %v175_v18 = vadd.f32 %v1707_v17, %v1571_v12  ;;  %v166_v19 = vpop.f32.mrb[3].mxu0  ;;  %v228_v21 = vmax.f32 %v172_v14, 0.0 }
  0xe1   :  { %v167_v20 = vadd.f32 %v1571_v12, %v166_v19  ;;  %v226_v23 = vmax.f32 %v164_v16, 0.0 }
  0xe2   :  { %v229_v22 = vmax.f32 %v175_v18, 0.0 }
  0xe3   :  { %v227_v24 = vmax.f32 %v167_v20, 0.0 }
  0xe4   :  { %v243_v25 = vpack.c.bf16 %v229_v22, %v228_v21 }
  0xe5   :  { %v1710_v26 = vpop.f32.mrb[4].mxu0  ;;  %v242_v27 = vpack.c.bf16 %v227_v24, %v226_v23 }
  0xe6   :  { %v188_v28 = vadd.f32 %v1710_v26, %v1571_v12  ;;  %v179_v29 = vpop.f32.mrb[5].mxu0 }
  0xe7   :  { %v180_v30 = vadd.f32 %v1571_v12, %v179_v29  ;;  %v1711_v31 = vpop.f32.mrb[6].mxu0  ;;  %1724 = vmatprep.mubr.msk.bf16.mxu1 %vm104_vm0, %v242_v27 }
  0xe8   :  { %v232_v32 = vmax.f32 %v188_v28, 0.0  ;;  %v191_v33 = vadd.f32 %v1711_v31, %v1571_v12  ;;  %v182_v34 = vpop.f32.mrb[7].mxu0  ;;  %1725 = vmatmul.mubr.msk.bf16.vlgmr.msra.gmra.mrb[0].mxu1 %vm104_vm0, %v243_v25 }
  0xe9   :  { %v230_v35 = vmax.f32 %v180_v30, 0.0  ;;  %v183_v36 = vadd.f32 %v1571_v12, %v182_v34 }
  0xea   :  { %v233_v37 = vmax.f32 %v191_v33, 0.0 }
  0xeb   :  { %v231_v38 = vmax.f32 %v183_v36, 0.0 }
  0xec   :  { %v245_v39 = vpack.c.bf16 %v233_v37, %v232_v32 }
  0xed   :  { %v244_v40 = vpack.c.bf16 %v231_v38, %v230_v35  ;;  %v1714_v41 = vpop.f32.mrb[8].mxu0 }
  0xee   :  { %v204_v42 = vadd.f32 %v1714_v41, %v1571_v12  ;;  %v195_v43 = vpop.f32.mrb[9].mxu0 }
  0xef   :  { %v196_v44 = vadd.f32 %v1571_v12, %v195_v43  ;;  %v1715_v45 = vpop.f32.mrb[10].mxu0  ;;  %1728 = vmatprep.mubr.msk.bf16.mxu1 %vm104_vm0, %v244_v40 }
  0xf0   :  { %v236_v46 = vmax.f32 %v204_v42, 0.0  ;;  %v207_v47 = vadd.f32 %v1715_v45, %v1571_v12  ;;  %v198_v48 = vpop.f32.mrb[11].mxu0  ;;  %1729 = vmatmul.mubr.msk.bf16.gmra.mrb[4].mxu1 %vm104_vm0, %v245_v39 }
  0xf1   :  { %v234_v49 = vmax.f32 %v196_v44, 0.0  ;;  %v199_v50 = vadd.f32 %v1571_v12, %v198_v48 }
  0xf2   :  { %v237_v51 = vmax.f32 %v207_v47, 0.0 }
  0xf3   :  { %v235_v52 = vmax.f32 %v199_v50, 0.0 }
  0xf4   :  { %v247_v53 = vpack.c.bf16 %v237_v51, %v236_v46 }
  0xf5   :  { %v246_v54 = vpack.c.bf16 %v235_v52, %v234_v49  ;;  %v1718_v55 = vpop.f32.mrb[12].mxu0 }
  0xf6   :  { %v220_v56 = vadd.f32 %v1718_v55, %v1571_v12  ;;  %v211_v57 = vpop.f32.mrb[13].mxu0 }
  0xf7   :  { %v212_v58 = vadd.f32 %v1571_v12, %v211_v57  ;;  %v1719_v59 = vpop.f32.mrb[14].mxu0  ;;  %1732 = vmatprep.mubr.msk.bf16.mxu1 %vm104_vm0, %v246_v54 }
  0xf8   :  { %v240_v60 = vmax.f32 %v220_v56, 0.0  ;;  %v223_v61 = vadd.f32 %v1719_v59, %v1571_v12  ;;  %v214_v62 = vpop.f32.mrb[15].mxu0  ;;  %1733 = vmatmul.mubr.msk.bf16.gmra.mrb[8].mxu1 %vm104_vm0, %v247_v53 }
  0xf9   :  { %v238_v63 = vmax.f32 %v212_v58, 0.0  ;;  %v215_v0 = vadd.f32 %v1571_v12, %v214_v62 }
  0xfa   :  { %v241_v1 = vmax.f32 %v223_v61, 0.0 }
  0xfb   :  { %v239_v2 = vmax.f32 %v215_v0, 0.0 }
  0xfc   :  { %v249_v3 = vpack.c.bf16 %v241_v1, %v240_v60 }
  0xfd   :  { %v248_v4 = vpack.c.bf16 %v239_v2, %v238_v63 }
  0xff   :  { %1736 = vmatprep.mubr.msk.bf16.mxu1 %vm104_vm0, %v248_v4 }
 0x100   :  { %1737 = vmatmul.mubr.msk.bf16.gmra.mrb[12].mxu1 %vm104_vm0, %v249_v3 }
 0x1bb   :  { %v1726_v6 = vpop.f32.mrb[0].mxu1 }
 0x1bc   :  { %v340_v7 = vadd.f32 %v1726_v6, %v1590_v5  ;;  %v331_v8 = vpop.f32.mrb[1].mxu1 }
 0x1bd   :  { %v332_v9 = vadd.f32 %v1590_v5, %v331_v8  ;;  %v1727_v10 = vpop.f32.mrb[2].mxu1 }
 0x1be   :  { %398 = vmax.xlane.f32.xlu1 %v340_v7  ;;  %v334_v11 = vpop.f32.mrb[3].mxu1  ;;  %v343_v12 = vadd.f32 %v1727_v10, %v1590_v5 }
 0x1bf   :  { %394 = vmax.xlane.f32.xlu0 %v332_v9  ;;  %v335_v13 = vadd.f32 %v1590_v5, %v334_v11 }
 0x1c2   :  { %400 = vmax.xlane.f32.xlu1 %v343_v12 }
 0x1c3   :  { %v1730_v14 = vpop.f32.mrb[4].mxu1  ;;  %396 = vmax.xlane.f32.xlu0 %v335_v13 }
 0x1c4   :  { %v347_v15 = vpop.f32.mrb[5].mxu1  ;;  %v356_v19 = vadd.f32 %v1730_v14, %v1590_v5 }
 0x1c5   :  { %v348_v16 = vadd.f32 %v1590_v5, %v347_v15  ;;  %v1731_v17 = vpop.f32.mrb[6].mxu1 }
 0x1c6   :  { %v350_v18 = vpop.f32.mrb[7].mxu1  ;;  %v359_v21 = vadd.f32 %v1731_v17, %v1590_v5 }
 0x1c7   :  { %v351_v20 = vadd.f32 %v1590_v5, %v350_v18  ;;  %402 = vmax.xlane.f32.xlu0 %v348_v16 }
 0x1c9   :  { %404 = vmax.xlane.f32.xlu1 %v351_v20 }
 0x1cb   :  { %v1734_v22 = vpop.f32.mrb[8].mxu1  ;;  %406 = vmax.xlane.f32.xlu0 %v356_v19 }
 0x1cc   :  { %v363_v23 = vpop.f32.mrb[9].mxu1  ;;  %v2001_v27 = vadd.f32 %v1734_v22, %v1590_v5 }
 0x1cd   :  { %v364_v24 = vadd.f32 %v1590_v5, %v363_v23  ;;  %v1735_v25 = vpop.f32.mrb[10].mxu1  ;;  %408 = vmax.xlane.f32.xlu1 %v359_v21 }
 0x1ce   :  { %v366_v26 = vpop.f32.mrb[11].mxu1  ;;  %v2005_v29 = vadd.f32 %v1735_v25, %v1590_v5 }
 0x1cf   :  { %v2003_v28 = vadd.f32 %v1590_v5, %v366_v26  ;;  %410 = vmax.xlane.f32.xlu0 %v364_v24 }
 0x1d1   :  { %412 = vmax.xlane.f32.xlu1 %v2003_v28 }
 0x1d3   :  { %v1738_v30 = vpop.f32.mrb[12].mxu1  ;;  %414 = vmax.xlane.f32.xlu0 %v2001_v27 }
 0x1d4   :  { %v379_v31 = vpop.f32.mrb[13].mxu1  ;;  %v2012_v35 = vadd.f32 %v1738_v30, %v1590_v5 }
 0x1d5   :  { %v2009_v32 = vadd.f32 %v1590_v5, %v379_v31  ;;  %v1739_v33 = vpop.f32.mrb[14].mxu1  ;;  %416 = vmax.xlane.f32.xlu1 %v2005_v29 }
 0x1d6   :  { %v382_v34 = vpop.f32.mrb[15].mxu1  ;;  %v2017_v37 = vadd.f32 %v1739_v33, %v1590_v5 }
 0x1d7   :  { %v2014_v36 = vadd.f32 %v1590_v5, %v382_v34  ;;  %418 = vmax.xlane.f32.xlu0 %v2009_v32 }
 0x1d9   :  { %420 = vmax.xlane.f32.xlu1 %v2014_v36 }
 0x1db   :  { %422 = vmax.xlane.f32.xlu0 %v2012_v35 }
 0x1dd   :  { %424 = vmax.xlane.f32.xlu1 %v2017_v37 }
 0x24b   :  { %v399_v38 = vpop.xlane.xlu1 %398 }
 0x24c   :  { %v428_v39 = vsub.f32 %v340_v7, %v399_v38  ;;  %v395_v40 = vpop.xlane.xlu0 %394 }
 0x24d   :  { %v426_v41 = vsub.f32 %v332_v9, %v395_v40 }
 0x24e   :  { %v446_v44 = vmul.f32 1.442695, %v428_v39 }
 0x24f   :  { %v442_v42 = vmul.f32 1.442695, %v426_v41  ;;  %v401_v43 = vpop.xlane.xlu1 %400 }
 0x250   :  { %v429_v45 = vsub.f32 %v343_v12, %v401_v43  ;;  %v397_v46 = vpop.xlane.xlu0 %396  ;;  %v666_v43 = vlaneseq }
 0x251   :  { %1758 = vpow2.f32 %v442_v42  ;;  %v427_v47 = vsub.f32 %v335_v13, %v397_v46 }
 0x252   :  { %1760 = vpow2.f32 %v446_v44  ;;  %v448_v49 = vmul.f32 1.442695, %v429_v45 }
 0x253   :  { %v444_v48 = vmul.f32 1.442695, %v427_v47 }
 0x254   :  { %v403_v50 = vpop.xlane.xlu0 %402 }
 0x255   :  { %1762 = vpow2.f32 %v444_v48  ;;  %v430_v51 = vsub.f32 %v348_v16, %v403_v50 }
 0x256   :  { %v405_v52 = vpop.xlane.xlu1 %404  ;;  %1764 = vpow2.f32 %v448_v49  ;;  %v2077_v49 = vand.u32 127, %v666_v43 }
 0x257   :  { %v450_v53 = vmul.f32 1.442695, %v430_v51  ;;  %v431_v54 = vsub.f32 %v351_v20, %v405_v52 }
 0x258   :  { %v407_v55 = vpop.xlane.xlu0 %406 }
 0x259   :  { %1766 = vpow2.f32 %v450_v53  ;;  %v452_v56 = vmul.f32 1.442695, %v431_v54  ;;  %v432_v57 = vsub.f32 %v356_v19, %v407_v55 }
 0x25a   :  { %v409_v58 = vpop.xlane.xlu1 %408 }
 0x25b   :  { %v2022_v59 = vpop.eup %1758  ;;  %v454_v60 = vmul.f32 1.442695, %v432_v57  ;;  %v433_v61 = vsub.f32 %v359_v21, %v409_v58  ;;  %1768 = vpow2.f32 %v452_v56 }
 0x25c   :  { %474 = vadd.xlane.f32.xlu0 %v2022_v59  ;;  %v411_v62 = vpop.xlane.xlu0 %410  ;;  %v2025_v1 = vpop.eup %1760 }
 0x25d   :  { %1770 = vpow2.f32 %v454_v60  ;;  %v456_v63 = vmul.f32 1.442695, %v433_v61  ;;  %v434_v0 = vsub.f32 %v364_v24, %v411_v62  ;;  %v2081_v60 = vsub.s32 127, %v2077_v49 }
 0x25e   :  { %v413_v2 = vpop.xlane.xlu1 %412 }
 0x25f   :  { %v2027_v3 = vpop.eup %1762  ;;  %v458_v4 = vmul.f32 1.442695, %v434_v0  ;;  %v435_v5 = vsub.f32 %v2003_v28, %v413_v2  ;;  %1772 = vpow2.f32 %v456_v63 }
 0x260   :  { %478 = vadd.xlane.f32.xlu0 %v2025_v1  ;;  %476 = vadd.xlane.f32.xlu1 %v2027_v3  ;;  %v415_v6 = vpop.xlane.xlu0 %414  ;;  %v2033_v9 = vpop.eup %1764 }
 0x261   :  { %1774 = vpow2.f32 %v458_v4  ;;  %v460_v7 = vmul.f32 1.442695, %v435_v5  ;;  %v436_v8 = vsub.f32 %v2001_v27, %v415_v6 }
 0x262   :  { %v417_v10 = vpop.xlane.xlu1 %416 }
 0x263   :  { %v2035_v11 = vpop.eup %1766  ;;  %v462_v12 = vmul.f32 1.442695, %v436_v8  ;;  %v437_v13 = vsub.f32 %v2005_v29, %v417_v10  ;;  %1776 = vpow2.f32 %v460_v7 }
 0x264   :  { %480 = vadd.xlane.f32.xlu1 %v2033_v9  ;;  %482 = vadd.xlane.f32.xlu0 %v2035_v11  ;;  %v419_v14 = vpop.xlane.xlu0 %418 }
 0x265   :  { %1778 = vpow2.f32 %v462_v12  ;;  %v464_v15 = vmul.f32 1.442695, %v437_v13  ;;  %v438_v16 = vsub.f32 %v2009_v32, %v419_v14  ;;  %v2041_v17 = vpop.eup %1768 }
 0x266   :  { %v421_v18 = vpop.xlane.xlu1 %420 }
 0x267   :  { %v2043_v19 = vpop.eup %1770  ;;  %v466_v20 = vmul.f32 1.442695, %v438_v16  ;;  %v439_v21 = vsub.f32 %v2014_v36, %v421_v18  ;;  %1780 = vpow2.f32 %v464_v15 }
 0x268   :  { %484 = vadd.xlane.f32.xlu1 %v2041_v17  ;;  %486 = vadd.xlane.f32.xlu0 %v2043_v19  ;;  %v423_v22 = vpop.xlane.xlu0 %422 }
 0x269   :  { %1782 = vpow2.f32 %v466_v20  ;;  %v468_v23 = vmul.f32 1.442695, %v439_v21  ;;  %v440_v24 = vsub.f32 %v2012_v35, %v423_v22  ;;  %v2049_v25 = vpop.eup %1772 }
 0x26a   :  { %v425_v26 = vpop.xlane.xlu1 %424 }
 0x26b   :  { %v2051_v27 = vpop.eup %1774  ;;  %v470_v28 = vmul.f32 1.442695, %v440_v24  ;;  %v441_v29 = vsub.f32 %v2017_v37, %v425_v26  ;;  %1784 = vpow2.f32 %v468_v23 }
 0x26c   :  { %488 = vadd.xlane.f32.xlu1 %v2049_v25  ;;  %490 = vadd.xlane.f32.xlu0 %v2051_v27 }
 0x26d   :  { %1786 = vpow2.f32 %v470_v28  ;;  %v472_v30 = vmul.f32 1.442695, %v441_v29  ;;  %v2056_v31 = vpop.eup %1776 }
 0x26f   :  { %v2058_v32 = vpop.eup %1778  ;;  %1788 = vpow2.f32 %v472_v30 }
 0x270   :  { %492 = vadd.xlane.f32.xlu1 %v2056_v31  ;;  %494 = vadd.xlane.f32.xlu0 %v2058_v32 }
 0x271   :  { %v2062_v33 = vpop.eup %1780 }
 0x273   :  { %v2064_v34 = vpop.eup %1782 }
 0x274   :  { %496 = vadd.xlane.f32.xlu1 %v2062_v33  ;;  %498 = vadd.xlane.f32.xlu0 %v2064_v34 }
 0x275   :  { %v2068_v35 = vpop.eup %1784 }
 0x277   :  { %v2070_v36 = vpop.eup %1786 }
 0x278   :  { %500 = vadd.xlane.f32.xlu1 %v2068_v35  ;;  %502 = vadd.xlane.f32.xlu0 %v2070_v36 }
 0x279   :  { %v2074_v37 = vpop.eup %1788 }
 0x27c   :  { %504 = vadd.xlane.f32.xlu1 %v2074_v37 }
 0x2e9   :  { %v475_v38 = vpop.xlane.xlu0 %474 }
 0x2ea   :  { %1790 = vrcp.f32 %v475_v38 }
 0x2ed   :  { %v477_v39 = vpop.xlane.xlu1 %476  ;;  %v479_v40 = vpop.xlane.xlu0 %478 }
 0x2ee   :  { %1792 = vrcp.f32 %v477_v39 }
 0x2ef   :  { %1794 = vrcp.f32 %v479_v40 }
 0x2f1   :  { %v481_v41 = vpop.xlane.xlu1 %480  ;;  %v483_v42 = vpop.xlane.xlu0 %482 }
 0x2f2   :  { %1796 = vrcp.f32 %v481_v41 }
 0x2f3   :  { %1798 = vrcp.f32 %v483_v42 }
 0x2f4   :  { %v1791_v44 = vpop.eup %1790 }
 0x2f5   :  { %v522_v45 = vmul.f32 %v1791_v44, %v475_v38  ;;  %v485_v46 = vpop.xlane.xlu1 %484  ;;  %v487_v47 = vpop.xlane.xlu0 %486 }
 0x2f6   :  { %1800 = vrcp.f32 %v485_v46 }
 0x2f7   :  { %v538_v48 = vsub.f32 2.0, %v522_v45  ;;  %1802 = vrcp.f32 %v487_v47 }
 0x2f8   :  { %v1793_v50 = vpop.eup %1792 }
 0x2f9   :  { %v1795_v51 = vpop.eup %1794  ;;  %v554_v52 = vmul.f32 %v1791_v44, %v538_v48  ;;  %v523_v53 = vmul.f32 %v1793_v50, %v477_v39  ;;  %v489_v54 = vpop.xlane.xlu1 %488 }
 0x2fa   :  { %v491_v55 = vpop.xlane.xlu0 %490  ;;  %v524_v56 = vmul.f32 %v1795_v51, %v479_v40  ;;  %1804 = vrcp.f32 %v489_v54 }
 0x2fb   :  { %v570_v57 = vmul.f32 %v2022_v59, %v554_v52  ;;  %v539_v58 = vsub.f32 2.0, %v523_v53  ;;  %1806 = vrcp.f32 %v491_v55 }
 0x2fc   :  { %v1797_v61 = vpop.eup %1796  ;;  %v540_v62 = vsub.f32 2.0, %v524_v56 }
 0x2fd   :  { %v1799_v63 = vpop.eup %1798  ;;  %v684_v0 = vand.u32 4294967168, %v570_v57  ;;  %v555_v2 = vmul.f32 %v1793_v50, %v539_v58  ;;  %v525_v4 = vmul.f32 %v1797_v61, %v481_v41  ;;  %v493_v5 = vpop.xlane.xlu1 %492 }
 0x2fe   :  { %v495_v6 = vpop.xlane.xlu0 %494  ;;  %v556_v7 = vmul.f32 %v1795_v51, %v540_v62  ;;  %v526_v8 = vmul.f32 %v1799_v63, %v483_v42  ;;  %1808 = vrcp.f32 %v493_v5 }
 0x2ff   :  { %v571_v10 = vmul.f32 %v2027_v3, %v555_v2  ;;  %v541_v12 = vsub.f32 2.0, %v525_v4  ;;  %1810 = vrcp.f32 %v495_v6  ;;  %v2085_v59 = vor.u32 %v2081_v60, %v684_v0 }
 0x300   :  { %v1801_v13 = vpop.eup %1800  ;;  %v572_v14 = vmul.f32 %v2025_v1, %v556_v7  ;;  %v542_v15 = vsub.f32 2.0, %v526_v8 }
 0x301   :  { %v1803_v16 = vpop.eup %1802  ;;  %v1636_v18 = vpack.c.bf16 %v571_v10, %v570_v57  ;;  %v685_v20 = vand.u32 4294967168, %v571_v10  ;;  %v557_v21 = vmul.f32 %v1797_v61, %v541_v12  ;;  %v527_v22 = vmul.f32 %v1801_v13, %v485_v46  ;;  %v2088_v23 = vpop.xlane.xlu1 %496 }
 0x302   :  { %v2090_v24 = vpop.xlane.xlu0 %498  ;;  %v686_v26 = vand.u32 4294967168, %v572_v14  ;;  %v558_v3 = vmul.f32 %v1799_v63, %v542_v15  ;;  %v528_v28 = vmul.f32 %v1803_v16, %v487_v47  ;;  %1812 = vrcp.f32 %v2088_v23 }
 0x303   :  { %1637 = vst [vmem:[#allocation2] sm:$0xff] %v1636_v18   ;;  %v573_v29 = vmul.f32 %v2033_v9, %v557_v21  ;;  %v543_v30 = vsub.f32 2.0, %v527_v22  ;;  %1814 = vrcp.f32 %v2090_v24  ;;  %v718_v1 = vshra.s32 %v2085_v59, 16 }
 0x304   :  { %v1805_v38 = vpop.eup %1804  ;;  %v574_v39 = vmul.f32 %v2035_v11, %v558_v3  ;;  %v544_v40 = vsub.f32 2.0, %v528_v28  ;;  %v2098_v41 = vor.u32 %v2081_v60, %v685_v20  ;;  %v2101_v42 = vor.u32 %v2081_v60, %v686_v26 }
 0x305   :  { %v1807_v43 = vpop.eup %1806  ;;  %v1641_v44 = vpack.c.bf16 %v573_v29, %v572_v14  ;;  %v687_v45 = vand.u32 4294967168, %v573_v29  ;;  %v559_v46 = vmul.f32 %v1801_v13, %v543_v30  ;;  %v529_v9 = vmul.f32 %v1805_v38, %v489_v54  ;;  %v501_v47 = vpop.xlane.xlu1 %500 }
 0x306   :  { %v2103_v48 = vpop.xlane.xlu0 %502  ;;  %v688_v50 = vand.u32 4294967168, %v574_v39  ;;  %v560_v51 = vmul.f32 %v1803_v16, %v544_v40  ;;  %v530_v52 = vmul.f32 %v1807_v43, %v491_v55  ;;  %1816 = vrcp.f32 %v501_v47 }
 0x307   :  { %1673 = vst [vmem:[#allocation2 + $0x8] sm:$0xff] %v1641_v44   ;;  %v575_v11 = vmul.f32 %v2041_v17, %v559_v46  ;;  %v545_v53 = vsub.f32 2.0, %v529_v9  ;;  %v2106_v56 = vcvt.s32.f32 %v718_v1  ;;  %1818 = vrcp.f32 %v2103_v48 }
 0x308   :  { %v1809_v57 = vpop.eup %1808  ;;  %v576_v58 = vmul.f32 %v2043_v19, %v560_v51  ;;  %v546_v61 = vsub.f32 2.0, %v530_v52  ;;  %v732_v54 = vshra.s32 %v2098_v41, 16  ;;  %v746_v62 = vshra.s32 %v2101_v42, 16 }
 0x309   :  { %v1811_v63 = vpop.eup %1810  ;;  %v1646_v0 = vpack.c.bf16 %v575_v11, %v574_v39  ;;  %v689_v55 = vand.u32 4294967168, %v575_v11  ;;  %v561_v2 = vmul.f32 %v1805_v38, %v545_v53  ;;  %v531_v4 = vmul.f32 %v1809_v57, %v493_v5  ;;  %721 = vmax.xlane.f32.xlu0 %v2106_v56  ;;  %v2113_v17 = vpop.xlane.xlu1 %504 }
 0x30a   :  { %v690_v7 = vand.u32 4294967168, %v576_v58  ;;  %v562_v8 = vmul.f32 %v1807_v43, %v546_v61  ;;  %v532_v10 = vmul.f32 %v1811_v63, %v495_v6  ;;  %v2115_v12 = vcvt.s32.f32 %v732_v54 }
 0x30b   :  { %1674 = vst [vmem:[#allocation2 + $0x10] sm:$0xff] %v1646_v0   ;;  %v577_v19 = vmul.f32 %v2049_v25, %v561_v2  ;;  %v547_v13 = vsub.f32 2.0, %v531_v4  ;;  %1820 = vrcp.f32 %v2113_v17  ;;  %v2119_v14 = vcvt.s32.f32 %v746_v62 }
 0x30c   :  { %v1813_v15 = vpop.eup %1812  ;;  %v578_v5 = vmul.f32 %v2051_v27, %v562_v8  ;;  %v548_v16 = vsub.f32 2.0, %v532_v10  ;;  %735 = vmax.xlane.f32.xlu1 %v2115_v12  ;;  %v2124_v18 = vor.u32 %v2081_v60, %v687_v45  ;;  %v2127_v6 = vor.u32 %v2081_v60, %v688_v50 }
 0x30d   :  { %v1815_v20 = vpop.eup %1814  ;;  %v1651_v21 = vpack.c.bf16 %v577_v19, %v576_v58  ;;  %v691_v25 = vand.u32 4294967168, %v577_v19  ;;  %v563_v22 = vmul.f32 %v1809_v57, %v547_v13  ;;  %v533_v26 = vmul.f32 %v1813_v15, %v2088_v23  ;;  %749 = vmax.xlane.f32.xlu0 %v2119_v14 }
 0x30e   :  { %v692_v3 = vand.u32 4294967168, %v578_v5  ;;  %v564_v28 = vmul.f32 %v1811_v63, %v548_v16  ;;  %v534_v27 = vmul.f32 %v1815_v20, %v2090_v24  ;;  %v760_v29 = vshra.s32 %v2124_v18, 16 }
 0x30f   :  { %1675 = vst [vmem:[#allocation2 + $0x18] sm:$0xff] %v1651_v21   ;;  %v579_v30 = vmul.f32 %v2056_v31, %v563_v22  ;;  %v549_v1 = vsub.f32 2.0, %v533_v26  ;;  %v774_v38 = vshra.s32 %v2127_v6, 16  ;;  %v2136_v39 = vor.u32 %v2081_v60, %v689_v55 }
 0x310   :  { %v1817_v40 = vpop.eup %1816  ;;  %v580_v23 = vmul.f32 %v2058_v32, %v564_v28  ;;  %v550_v43 = vsub.f32 2.0, %v534_v27  ;;  %v2139_v44 = vcvt.s32.f32 %v760_v29  ;;  %v2142_v45 = vor.u32 %v2081_v60, %v690_v7 }
 0x311   :  { %v1819_v24 = vpop.eup %1818  ;;  %v1656_v46 = vpack.c.bf16 %v579_v30, %v578_v5  ;;  %v693_v9 = vand.u32 4294967168, %v579_v30  ;;  %v565_v50 = vmul.f32 %v1813_v15, %v549_v1  ;;  %v535_v31 = vmul.f32 %v1817_v40, %v501_v47 }
 0x312   :  { %v694_v51 = vand.u32 4294967168, %v580_v23  ;;  %v566_v52 = vmul.f32 %v1815_v20, %v550_v43  ;;  %v536_v11 = vmul.f32 %v1819_v24, %v2103_v48  ;;  %763 = vmax.xlane.f32.xlu1 %v2139_v44  ;;  %v2146_v53 = vcvt.s32.f32 %v774_v38 }
 0x313   :  { %1676 = vst [vmem:[#allocation2 + $0x20] sm:$0xff] %v1656_v46   ;;  %v581_v32 = vmul.f32 %v2062_v33, %v565_v50  ;;  %v551_v57 = vsub.f32 2.0, %v535_v31  ;;  %v788_v58 = vshra.s32 %v2136_v39, 16  ;;  %v802_v61 = vshra.s32 %v2142_v45, 16 }
 0x314   :  { %v582_v54 = vmul.f32 %v2064_v34, %v566_v52  ;;  %v552_v62 = vsub.f32 2.0, %v536_v11  ;;  %777 = vmax.xlane.f32.xlu0 %v2146_v53  ;;  %v2154_v47 = vor.u32 %v2081_v60, %v691_v25  ;;  %v2157_v48 = vor.u32 %v2081_v60, %v692_v3 }
 0x315   :  { %v1821_v63 = vpop.eup %1820  ;;  %v1661_v0 = vpack.c.bf16 %v581_v32, %v580_v23  ;;  %v695_v55 = vand.u32 4294967168, %v581_v32  ;;  %v567_v33 = vmul.f32 %v1817_v40, %v551_v57  ;;  %v2159_v2 = vcvt.s32.f32 %v788_v58 }
 0x316   :  { %v696_v4 = vand.u32 4294967168, %v582_v54  ;;  %v568_v7 = vmul.f32 %v1819_v24, %v552_v62  ;;  %v537_v8 = vmul.f32 %v1821_v63, %v2113_v17  ;;  %v2162_v34 = vcvt.s32.f32 %v802_v61 }
 0x317   :  { %1677 = vst [vmem:[#allocation2 + $0x28] sm:$0xff] %v1661_v0   ;;  %v583_v10 = vmul.f32 %v2068_v35, %v567_v33  ;;  %791 = vmax.xlane.f32.xlu1 %v2159_v2  ;;  %v816_v19 = vshra.s32 %v2154_v47, 16  ;;  %v830_v13 = vshra.s32 %v2157_v48, 16  ;;  %v2169_v15 = vor.u32 %v2081_v60, %v693_v9 }
 0x318   :  { %v584_v5 = vmul.f32 %v2070_v36, %v568_v7  ;;  %v553_v16 = vsub.f32 2.0, %v537_v8  ;;  %805 = vmax.xlane.f32.xlu0 %v2162_v34  ;;  %v2174_v17 = vor.u32 %v2081_v60, %v694_v51  ;;  %v2177_v20 = vor.u32 %v2081_v60, %v695_v55 }
 0x319   :  { %v1666_v35 = vpack.c.bf16 %v583_v10, %v582_v54  ;;  %v697_v21 = vand.u32 4294967168, %v583_v10  ;;  %v2179_v25 = vcvt.s32.f32 %v816_v19  ;;  %v2181_v22 = vcvt.s32.f32 %v830_v13 }
 0x31a   :  { %v698_v26 = vand.u32 4294967168, %v584_v5  ;;  %v569_v3 = vmul.f32 %v1821_v63, %v553_v16  ;;  %v844_v28 = vshra.s32 %v2169_v15, 16  ;;  %v858_v36 = vshra.s32 %v2174_v17, 16 }
 0x31b   :  { %1678 = vst [vmem:[#allocation2 + $0x30] sm:$0xff] %v1666_v35   ;;  %819 = vmax.xlane.f32.xlu1 %v2179_v25  ;;  %v872_v27 = vshra.s32 %v2177_v20, 16  ;;  %v2188_v29 = vor.u32 %v2081_v60, %v696_v4  ;;  %v2191_v30 = vor.u32 %v2081_v60, %v697_v21  ;;  %v731_v58 = vand.u32 65535, %v2098_v41 }
 0x31c   :  { %v585_v1 = vmul.f32 %v2074_v37, %v569_v3  ;;  %833 = vmax.xlane.f32.xlu0 %v2181_v22  ;;  %v2195_v38 = vcvt.s32.f32 %v844_v28  ;;  %v2197_v40 = vcvt.s32.f32 %v858_v36  ;;  %v2200_v23 = vor.u32 %v2081_v60, %v698_v26 }
 0x31d   :  { %v886_v43 = vshra.s32 %v2188_v29, 16  ;;  %v2204_v9 = vcvt.s32.f32 %v872_v27  ;;  %v900_v50 = vshra.s32 %v2191_v30, 16  ;;  %v745_v62 = vand.u32 65535, %v2101_v42 }
 0x31e   :  { %v1671_v24 = vpack.c.bf16 %v585_v1, %v584_v5  ;;  %v699_v46 = vand.u32 4294967168, %v585_v1  ;;  %v914_v31 = vshra.s32 %v2200_v23, 16  ;;  %v733_v55 = vcvt.s32.f32 %v731_v58 }
 0x31f   :  { %847 = vmax.xlane.f32.xlu1 %v2195_v38  ;;  %v2208_v37 = vcvt.s32.f32 %v886_v43  ;;  %v2215_v52 = vcvt.s32.f32 %v900_v50  ;;  %v747_v4 = vcvt.s32.f32 %v745_v62  ;;  %v759_v8 = vand.u32 65535, %v2124_v18 }
 0x320   :  { %1679 = vst [vmem:[#allocation2 + $0x38] sm:$0xff] %v1671_v24   ;;  %861 = vmax.xlane.f32.xlu0 %v2197_v40  ;;  %v2212_v51 = vor.u32 %v2081_v60, %v699_v46  ;;  %v2219_v32 = vcvt.s32.f32 %v914_v31  ;;  %v717_v60 = vand.u32 65535, %v2085_v59  ;;  %v815_v28 = vand.u32 65535, %v2154_v47 }
 0x321   :  { %v761_v13 = vcvt.s32.f32 %v759_v8  ;;  %v829_v27 = vand.u32 65535, %v2157_v48  ;;  %v843_v46 = vand.u32 65535, %v2169_v15  ;;  %v857_v31 = vand.u32 65535, %v2174_v17 }
 0x322   :  { %v928_v11 = vshra.s32 %v2212_v51, 16  ;;  %v719_v54 = vcvt.s32.f32 %v717_v60  ;;  %v817_v24 = vcvt.s32.f32 %v815_v28  ;;  %v899_v8 = vand.u32 65535, %v2191_v30 }
 0x323   :  { %875 = vmax.xlane.f32.xlu1 %v2204_v9  ;;  %v845_v58 = vcvt.s32.f32 %v843_v46 }
 0x324   :  { %889 = vmax.xlane.f32.xlu0 %v2208_v37  ;;  %v2222_v57 = vcvt.s32.f32 %v928_v11 }
 0x327   :  { %903 = vmax.xlane.f32.xlu1 %v2215_v52 }
 0x328   :  { %917 = vmax.xlane.f32.xlu0 %v2219_v32 }
 0x32b   :  { %931 = vmax.xlane.f32.xlu1 %v2222_v57 }
 0x396   :  { %v2228_v61 = vpop.xlane.xlu0 %721 }
 0x397   :  { %vm723_vm1 = vcmp.eq.f32.partialorder %v2106_v56, %v2228_v61  ;;  %v773_v56 = vand.u32 65535, %v2127_v6 }
 0x398   :  { %v724_v63 = vsel %vm723_vm1, %v719_v54, -inf  ;;  %v871_v54 = vand.u32 65535, %v2177_v20 }
 0x399   :  { %725 = vmax.xlane.f32.xlu0 %v724_v63  ;;  %v2233_v0 = vpop.xlane.xlu1 %735  ;;  %v775_v35 = vcvt.s32.f32 %v773_v56  ;;  %v885_v63 = vand.u32 65535, %v2188_v29  ;;  %v913_v56 = vand.u32 65535, %v2200_v23 }
 0x39a   :  { %v2235_v33 = vpop.xlane.xlu0 %749  ;;  %vm737_vm2 = vcmp.eq.f32.partialorder %v2115_v12, %v2233_v0  ;;  %v787_v12 = vand.u32 65535, %v2136_v39 }
 0x39b   :  { %v738_v7 = vsel %vm737_vm2, %v733_v55, -inf  ;;  %vm751_vm3 = vcmp.eq.f32.partialorder %v2119_v14, %v2235_v33  ;;  %v801_v14 = vand.u32 65535, %v2142_v45 }
 0x39c   :  { %739 = vmax.xlane.f32.xlu1 %v738_v7  ;;  %v752_v10 = vsel %vm751_vm3, %v747_v4, -inf  ;;  %v789_v3 = vcvt.s32.f32 %v787_v12  ;;  %v873_v7 = vcvt.s32.f32 %v871_v54 }
 0x39d   :  { %753 = vmax.xlane.f32.xlu0 %v752_v10  ;;  %v803_v36 = vcvt.s32.f32 %v801_v14 }
 0x39f   :  { %v2243_v19 = vpop.xlane.xlu1 %763 }
 0x3a0   :  { %vm765_vm4 = vcmp.eq.f32.partialorder %v2139_v44, %v2243_v19 }
 0x3a1   :  { %v2248_v5 = vpop.xlane.xlu0 %777  ;;  %v766_v16 = vsel %vm765_vm4, %v761_v13, -inf }
 0x3a2   :  { %767 = vmax.xlane.f32.xlu1 %v766_v16  ;;  %vm779_vm5 = vcmp.eq.f32.partialorder %v2146_v53, %v2248_v5  ;;  %v901_v16 = vcvt.s32.f32 %v899_v8 }
 0x3a3   :  { %v780_v21 = vsel %vm779_vm5, %v775_v35, -inf  ;;  %v927_v35 = vand.u32 65535, %v2212_v51 }
 0x3a4   :  { %781 = vmax.xlane.f32.xlu0 %v780_v21  ;;  %v2253_v26 = vpop.xlane.xlu1 %791 }
 0x3a5   :  { %v2256_v44 = vpop.xlane.xlu0 %805  ;;  %vm793_vm6 = vcmp.eq.f32.partialorder %v2159_v2, %v2253_v26  ;;  %v831_v2 = vcvt.s32.f32 %v829_v27  ;;  %v929_v28 = vcvt.s32.f32 %v927_v35  ;;  %v728_v27 = vcvt.f32.s32 %v2228_v61 }
 0x3a6   :  { %v794_v1 = vsel %vm793_vm6, %v789_v3, -inf  ;;  %vm807_vm7 = vcmp.eq.f32.partialorder %v2162_v34, %v2256_v44 }
 0x3a7   :  { %795 = vmax.xlane.f32.xlu1 %v794_v1  ;;  %v808_v53 = vsel %vm807_vm7, %v803_v36, -inf }
 0x3a8   :  { %809 = vmax.xlane.f32.xlu0 %v808_v53  ;;  %v2263_v43 = vpop.xlane.xlu1 %819  ;;  %v729_v53 = vshll.u32 %v728_v27, 16 }
 0x3a9   :  { %v2266_v50 = vpop.xlane.xlu0 %833  ;;  %vm821_vm8 = vcmp.eq.f32.partialorder %v2179_v25, %v2263_v43  ;;  %v859_v25 = vcvt.s32.f32 %v857_v31 }
 0x3aa   :  { %v822_v11 = vsel %vm821_vm8, %v817_v24, -inf  ;;  %vm835_vm9 = vcmp.eq.f32.partialorder %v2181_v22, %v2266_v50  ;;  %v756_v24 = vcvt.f32.s32 %v2235_v33  ;;  %v784_v33 = vcvt.f32.s32 %v2248_v5 }
 0x3ab   :  { %823 = vmax.xlane.f32.xlu1 %v822_v11  ;;  %v836_v34 = vsel %vm835_vm9, %v831_v2, -inf  ;;  %v798_v5 = vcvt.f32.s32 %v2253_v26 }
 0x3ac   :  { %837 = vmax.xlane.f32.xlu0 %v836_v34  ;;  %v2273_v60 = vpop.xlane.xlu1 %847 }
 0x3ad   :  { %v2276_v62 = vpop.xlane.xlu0 %861  ;;  %vm849_vm10 = vcmp.eq.f32.partialorder %v2195_v38, %v2273_v60  ;;  %v887_v38 = vcvt.s32.f32 %v885_v63 }
 0x3ae   :  { %v850_v55 = vsel %vm849_vm10, %v845_v58, -inf  ;;  %vm863_vm11 = vcmp.eq.f32.partialorder %v2197_v40, %v2276_v62  ;;  %v757_v58 = vshll.u32 %v756_v24, 16 }
 0x3af   :  { %851 = vmax.xlane.f32.xlu1 %v850_v55  ;;  %v864_v22 = vsel %vm863_vm11, %v859_v25, -inf }
 0x3b0   :  { %865 = vmax.xlane.f32.xlu0 %v864_v22  ;;  %v2283_v4 = vpop.xlane.xlu1 %875 }
 0x3b1   :  { %v2286_v10 = vpop.xlane.xlu0 %889  ;;  %vm877_vm12 = vcmp.eq.f32.partialorder %v2204_v9, %v2283_v4  ;;  %v915_v9 = vcvt.s32.f32 %v913_v56 }
 0x3b2   :  { %v878_v13 = vsel %vm877_vm12, %v873_v7, -inf  ;;  %vm891_vm13 = vcmp.eq.f32.partialorder %v2208_v37, %v2286_v10 }
 0x3b3   :  { %879 = vmax.xlane.f32.xlu1 %v878_v13  ;;  %v892_v40 = vsel %vm891_vm13, %v887_v38, -inf }
 0x3b4   :  { %893 = vmax.xlane.f32.xlu0 %v892_v40  ;;  %v2293_v12 = vpop.xlane.xlu1 %903  ;;  %v812_v40 = vcvt.f32.s32 %v2256_v44 }
 0x3b5   :  { %v2296_v14 = vpop.xlane.xlu0 %917  ;;  %vm905_vm14 = vcmp.eq.f32.partialorder %v2215_v52, %v2293_v12  ;;  %v742_v52 = vcvt.f32.s32 %v2233_v0 }
 0x3b6   :  { %v906_v21 = vsel %vm905_vm14, %v901_v16, -inf  ;;  %vm919_vm15 = vcmp.eq.f32.partialorder %v2219_v32, %v2296_v14  ;;  %v813_v44 = vshll.u32 %v812_v40, 16 }
 0x3b7   :  { %907 = vmax.xlane.f32.xlu1 %v906_v21  ;;  %v920_v37 = vsel %vm919_vm15, %v915_v9, -inf  ;;  %v743_v31 = vshll.u32 %v742_v52, 16  ;;  %v826_v52 = vcvt.f32.s32 %v2263_v43  ;;  %v840_v43 = vcvt.f32.s32 %v2266_v50 }
 0x3b8   :  { %921 = vmax.xlane.f32.xlu0 %v920_v37  ;;  %v2302_v3 = vpop.xlane.xlu1 %931 }
 0x3b9   :  { %vm933_vm0 = vcmp.eq.f32.partialorder %v2222_v57, %v2302_v3  ;;  %v770_v57 = vcvt.f32.s32 %v2243_v19 }
 0x3ba   :  { %v934_v36 = vsel %vm933_vm0, %v929_v28, -inf }
 0x3bb   :  { %935 = vmax.xlane.f32.xlu1 %v934_v36  ;;  %v771_v7 = vshll.u32 %v770_v57, 16 }
 0x426   :  { %v726_v1 = vpop.xlane.xlu0 %725 }
 0x427   :  { %v727_v32 = vcvt.f32.s32 %v726_v1 }
 0x429   :  { %v2309_v46 = vadd.s32 %v729_v53, %v727_v32  ;;  %v740_v2 = vpop.xlane.xlu1 %739 }
 0x42a   :  { %v741_v11 = vcvt.f32.s32 %v740_v2  ;;  %v754_v34 = vpop.xlane.xlu0 %753 }
 0x42b   :  { %v755_v54 = vcvt.f32.s32 %v754_v34  ;;  %vm941_vm1 = vcmp.eq.s32.totalorder %v2085_v59, %v2309_v46 }
 0x42c   :  { %v2314_v61 = vadd.s32 %v743_v31, %v741_v11  ;;  %v2317_v0 = vsel %vm941_vm1, 2147483648, %v2085_v59  ;;  %v785_v59 = vshll.u32 %v784_v33, 16 }
 0x42d   :  { %v2320_v25 = vadd.s32 %v757_v58, %v755_v54  ;;  %v974_v63 = vshra.s32 %v2317_v0, 16  ;;  %v827_v58 = vshll.u32 %v826_v52, 16 }
 0x42e   :  { %vm942_vm2 = vcmp.eq.s32.totalorder %v2098_v41, %v2314_v61 }
 0x42f   :  { %v768_v55 = vpop.xlane.xlu1 %767  ;;  %v2325_v22 = vcvt.s32.f32 %v974_v63  ;;  %v2328_v19 = vsel %vm942_vm2, 2147483648, %v2098_v41  ;;  %vm943_vm3 = vcmp.eq.s32.totalorder %v2101_v42, %v2320_v25 }
 0x430   :  { %v769_v8 = vcvt.f32.s32 %v768_v55  ;;  %v988_v56 = vshra.s32 %v2328_v19, 16  ;;  %v2336_v13 = vsel %vm943_vm3, 2147483648, %v2101_v42  ;;  %v799_v42 = vshll.u32 %v798_v5, 16 }
 0x431   :  { %v782_v38 = vpop.xlane.xlu0 %781  ;;  %977 = vmax.xlane.f32.xlu0 %v2325_v22  ;;  %v1002_v35 = vshra.s32 %v2336_v13, 16  ;;  %v841_v55 = vshll.u32 %v840_v43, 16 }
 0x432   :  { %v2339_v16 = vadd.s32 %v771_v7, %v769_v8  ;;  %v783_v41 = vcvt.f32.s32 %v782_v38  ;;  %v2342_v9 = vcvt.s32.f32 %v988_v56  ;;  %v854_v7 = vcvt.f32.s32 %v2273_v60 }
 0x433   :  { %v2346_v37 = vcvt.s32.f32 %v1002_v35  ;;  %v868_v8 = vcvt.f32.s32 %v2276_v62  ;;  %v882_v35 = vcvt.f32.s32 %v2283_v4 }
 0x434   :  { %v2344_v21 = vadd.s32 %v785_v59, %v783_v41  ;;  %v796_v26 = vpop.xlane.xlu1 %795  ;;  %991 = vmax.xlane.f32.xlu1 %v2342_v9  ;;  %vm944_vm4 = vcmp.eq.s32.totalorder %v2124_v18, %v2339_v16 }
 0x435   :  { %v797_v28 = vcvt.f32.s32 %v796_v26  ;;  %v810_v36 = vpop.xlane.xlu0 %809  ;;  %1005 = vmax.xlane.f32.xlu0 %v2346_v37  ;;  %v2354_v1 = vsel %vm944_vm4, 2147483648, %v2124_v18  ;;  %v883_v52 = vshll.u32 %v882_v35, 16 }
 0x436   :  { %v811_v27 = vcvt.f32.s32 %v810_v36  ;;  %vm945_vm5 = vcmp.eq.s32.totalorder %v2127_v6, %v2344_v21  ;;  %v1016_v2 = vshra.s32 %v2354_v1, 16 }
 0x437   :  { %v2358_v53 = vadd.s32 %v799_v42, %v797_v28  ;;  %v2364_v34 = vsel %vm945_vm5, 2147483648, %v2127_v6  ;;  %v855_v28 = vshll.u32 %v854_v7, 16 }
 0x438   :  { %v2360_v24 = vadd.s32 %v813_v44, %v811_v27  ;;  %v824_v32 = vpop.xlane.xlu1 %823  ;;  %v2367_v18 = vcvt.s32.f32 %v1016_v2  ;;  %v1030_v54 = vshra.s32 %v2364_v34, 16  ;;  %v896_v44 = vcvt.f32.s32 %v2286_v10 }
 0x439   :  { %v825_v31 = vcvt.f32.s32 %v824_v32  ;;  %v838_v11 = vpop.xlane.xlu0 %837  ;;  %vm946_vm6 = vcmp.eq.s32.totalorder %v2136_v39, %v2358_v53  ;;  %v910_v10 = vcvt.f32.s32 %v2293_v12 }
 0x43a   :  { %v839_v57 = vcvt.f32.s32 %v838_v11  ;;  %vm947_vm7 = vcmp.eq.s32.totalorder %v2142_v45, %v2360_v24  ;;  %1019 = vmax.xlane.f32.xlu1 %v2367_v18  ;;  %v2377_v6 = vcvt.s32.f32 %v1030_v54  ;;  %v2383_v59 = vsel %vm946_vm6, 2147483648, %v2136_v39 }
 0x43b   :  { %v2374_v63 = vadd.s32 %v827_v58, %v825_v31  ;;  %v2386_v5 = vsel %vm947_vm7, 2147483648, %v2142_v45  ;;  %v1044_v56 = vshra.s32 %v2383_v59, 16  ;;  %v869_v45 = vshll.u32 %v868_v8, 16 }
 0x43c   :  { %v852_v33 = vpop.xlane.xlu1 %851  ;;  %1033 = vmax.xlane.f32.xlu0 %v2377_v6  ;;  %v2388_v38 = vadd.s32 %v841_v55, %v839_v57  ;;  %v1058_v40 = vshra.s32 %v2386_v5, 16  ;;  %v924_v11 = vcvt.f32.s32 %v2296_v14  ;;  %v938_v55 = vcvt.f32.s32 %v2302_v3 }
 0x43d   :  { %3230 = vst [vmem:[#allocation8_spill] sm:$0xff] %v2374_v63  ;;  %v866_v50 = vpop.xlane.xlu0 %865  ;;  %v853_v60 = vcvt.f32.s32 %v852_v33  ;;  %vm948_vm8 = vcmp.eq.s32.totalorder %v2154_v47, %v2374_v63  ;;  %v2395_v39 = vcvt.s32.f32 %v1044_v56 }
 0x43e   :  { %v867_v26 = vcvt.f32.s32 %v866_v50  ;;  %v2397_v36 = vcvt.s32.f32 %v1058_v40  ;;  %v2402_v27 = vsel %vm948_vm8, 2147483648, %v2154_v47  ;;  %vm949_vm9 = vcmp.eq.s32.totalorder %v2157_v48, %v2388_v38 }
 0x43f   :  { %1047 = vmax.xlane.f32.xlu1 %v2395_v39  ;;  %v2406_v32 = vadd.s32 %v855_v28, %v853_v60  ;;  %v1072_v31 = vshra.s32 %v2402_v27, 16  ;;  %v2415_v47 = vsel %vm949_vm9, 2147483648, %v2157_v48  ;;  %v897_v50 = vshll.u32 %v896_v44, 16 }
 0x440   :  { %v880_v41 = vpop.xlane.xlu1 %879  ;;  %v2408_v2 = vadd.s32 %v869_v45, %v867_v26  ;;  %1061 = vmax.xlane.f32.xlu0 %v2397_v36  ;;  %v1086_v33 = vshra.s32 %v2415_v47, 16  ;;  %v911_v48 = vshll.u32 %v910_v10, 16  ;;  %v925_v56 = vshll.u32 %v924_v11, 16 }
 0x441   :  { %v894_v62 = vpop.xlane.xlu0 %893  ;;  %v881_v42 = vcvt.f32.s32 %v880_v41  ;;  %v2419_v57 = vcvt.s32.f32 %v1072_v31  ;;  %vm950_vm10 = vcmp.eq.s32.totalorder %v2169_v15, %v2406_v32  ;;  %v939_v60 = vshll.u32 %v938_v55, 16 }
 0x442   :  { %v895_v43 = vcvt.f32.s32 %v894_v62  ;;  %v2424_v12 = vcvt.s32.f32 %v1086_v33  ;;  %vm951_vm11 = vcmp.eq.s32.totalorder %v2174_v17, %v2408_v2  ;;  %v2434_v3 = vsel %vm950_vm10, 2147483648, %v2169_v15 }
 0x443   :  { %v2417_v54 = vadd.s32 %v883_v52, %v881_v42  ;;  %1075 = vmax.xlane.f32.xlu1 %v2419_v57  ;;  %v2437_v41 = vsel %vm951_vm11, 2147483648, %v2174_v17  ;;  %v1100_v28 = vshra.s32 %v2434_v3, 16 }
 0x444   :  { %v908_v4 = vpop.xlane.xlu1 %907  ;;  %v2430_v40 = vadd.s32 %v897_v50, %v895_v43  ;;  %1089 = vmax.xlane.f32.xlu0 %v2424_v12  ;;  %v1114_v45 = vshra.s32 %v2437_v41, 16 }
 0x445   :  { %v922_v58 = vpop.xlane.xlu0 %921  ;;  %v909_v7 = vcvt.f32.s32 %v908_v4  ;;  %vm952_vm12 = vcmp.eq.s32.totalorder %v2177_v20, %v2417_v54  ;;  %v2455_v44 = vcvt.s32.f32 %v1100_v28 }
 0x446   :  { %v923_v14 = vcvt.f32.s32 %v922_v58  ;;  %v2448_v42 = vsel %vm952_vm12, 2147483648, %v2177_v20  ;;  %vm953_vm13 = vcmp.eq.s32.totalorder %v2188_v29, %v2430_v40  ;;  %v2457_v4 = vcvt.s32.f32 %v1114_v45 }
 0x447   :  { %v2441_v26 = vadd.s32 %v911_v48, %v909_v7  ;;  %v1128_v17 = vshra.s32 %v2448_v42, 16  ;;  %v2460_v52 = vsel %vm953_vm13, 2147483648, %v2188_v29  ;;  %1103 = vmax.xlane.f32.xlu1 %v2455_v44  ;;  %v987_v7 = vand.u32 65535, %v2328_v19 }
 0x448   :  { %v936_v8 = vpop.xlane.xlu1 %935  ;;  %v2443_v62 = vadd.s32 %v925_v56, %v923_v14  ;;  %1117 = vmax.xlane.f32.xlu0 %v2457_v4  ;;  %v1142_v31 = vshra.s32 %v2460_v52, 16  ;;  %v1015_v19 = vand.u32 65535, %v2354_v1  ;;  %v1057_v1 = vand.u32 65535, %v2386_v5 }
 0x449   :  { %v937_v35 = vcvt.f32.s32 %v936_v8  ;;  %vm954_vm14 = vcmp.eq.s32.totalorder %v2191_v30, %v2441_v26  ;;  %v2466_v20 = vcvt.s32.f32 %v1128_v17  ;;  %v1001_v8 = vand.u32 65535, %v2336_v13 }
 0x44a   :  { %v2470_v10 = vsel %vm954_vm14, 2147483648, %v2191_v30  ;;  %vm955_vm15 = vcmp.eq.s32.totalorder %v2200_v23, %v2443_v62  ;;  %v2480_v43 = vcvt.s32.f32 %v1142_v31  ;;  %v989_v48 = vcvt.s32.f32 %v987_v7 }
 0x44b   :  { %v2450_v15 = vadd.s32 %v939_v60, %v937_v35  ;;  %v1156_v29 = vshra.s32 %v2470_v10, 16  ;;  %v2476_v11 = vsel %vm955_vm15, 2147483648, %v2200_v23  ;;  %1131 = vmax.xlane.f32.xlu1 %v2466_v20  ;;  %v1003_v35 = vcvt.s32.f32 %v1001_v8 }
 0x44c   :  { %v1170_v58 = vshra.s32 %v2476_v11, 16  ;;  %1145 = vmax.xlane.f32.xlu0 %v2480_v43  ;;  %v973_v60 = vand.u32 65535, %v2317_v0  ;;  %v1059_v7 = vcvt.s32.f32 %v1057_v1  ;;  %v1071_v8 = vand.u32 65535, %v2402_v27 }
 0x44d   :  { %vm956_vm0 = vcmp.eq.s32.totalorder %v2212_v51, %v2450_v15  ;;  %v2488_v30 = vcvt.s32.f32 %v1156_v29  ;;  %v1043_v29 = vand.u32 65535, %v2383_v59 }
 0x44e   :  { %v2484_v33 = vsel %vm956_vm0, 2147483648, %v2212_v51  ;;  %v2490_v50 = vcvt.s32.f32 %v1170_v58  ;;  %v975_v13 = vcvt.s32.f32 %v973_v60 }
 0x44f   :  { %v1184_v23 = vshra.s32 %v2484_v33, 16  ;;  %1159 = vmax.xlane.f32.xlu1 %v2488_v30 }
 0x450   :  { %1173 = vmax.xlane.f32.xlu0 %v2490_v50 }
 0x451   :  { %v2495_v55 = vcvt.s32.f32 %v1184_v23 }
 0x453   :  { %1187 = vmax.xlane.f32.xlu1 %v2495_v55 }
 0x4be   :  { %v2498_v51 = vpop.xlane.xlu0 %977 }
 0x4bf   :  { %vm979_vm3 = vcmp.eq.f32.partialorder %v2325_v22, %v2498_v51  ;;  %v1045_v22 = vcvt.s32.f32 %v1043_v29 }
 0x4c0   :  { %v980_v17 = vsel %vm979_vm3, %v975_v13, -inf  ;;  %vm1455_vm3 = vcmp.eq.s32.totalorder %v2077_v49, 1 }
 0x4c1   :  { %v2502_v14 = vpop.xlane.xlu1 %991 }
 0x4c2   :  { %v2504_v56 = vpop.xlane.xlu0 %1005  ;;  %vm993_vm1 = vcmp.eq.f32.partialorder %v2342_v9, %v2502_v14  ;;  %v1017_v9 = vcvt.s32.f32 %v1015_v19 }
 0x4c3   :  { %v994_v28 = vsel %vm993_vm1, %v989_v48, -inf  ;;  %vm1007_vm2 = vcmp.eq.f32.partialorder %v2346_v37, %v2504_v56  ;;  %vm1389_vm1 = vcmp.eq.s32.totalorder %v2077_v49, 0 }
 0x4c4   :  { %995 = vmax.xlane.f32.xlu1 %v994_v28  ;;  %v1008_v45 = vsel %vm1007_vm2, %v1003_v35, -inf  ;;  %v1073_v35 = vcvt.s32.f32 %v1071_v8  ;;  %v1113_v28 = vand.u32 65535, %v2437_v41  ;;  %vm1438_vm2 = vcmp.eq.s32.totalorder %v2077_v49, 8 }
 0x4c5   :  { %1009 = vmax.xlane.f32.xlu0 %v1008_v45 }
 0x4c6   :  { %v1115_v13 = vcvt.s32.f32 %v1113_v28 }
 0x4c7   :  { %v2514_v31 = vpop.xlane.xlu1 %1019 }
 0x4c8   :  { %vm1021_vm4 = vcmp.eq.f32.partialorder %v2367_v18, %v2514_v31  ;;  %v1029_v18 = vand.u32 65535, %v2364_v34 }
 0x4c9   :  { %981 = vmax.xlane.f32.xlu0 %v980_v17  ;;  %v2518_v0 = vpop.xlane.xlu0 %1033  ;;  %v1022_v37 = vsel %vm1021_vm4, %v1017_v9, -inf  ;;  %v1127_v17 = vand.u32 65535, %v2448_v42  ;;  %vm1488_vm4 = vcmp.eq.s32.totalorder %v2077_v49, 9 }
 0x4ca   :  { %1023 = vmax.xlane.f32.xlu1 %v1022_v37  ;;  %vm1035_vm7 = vcmp.eq.f32.partialorder %v2377_v6, %v2518_v0  ;;  %v1031_v60 = vcvt.s32.f32 %v1029_v18  ;;  %v1183_v18 = vand.u32 65535, %v2484_v33 }
 0x4cb   :  { %v1129_v42 = vcvt.s32.f32 %v1127_v17 }
 0x4cc   :  { %v2522_v58 = vpop.xlane.xlu1 %1047  ;;  %v1036_v27 = vsel %vm1035_vm7, %v1031_v60, -inf  ;;  %v1263_v60 = vand.u32 127, %v2320_v25 }
 0x4cd   :  { %v2524_v23 = vpop.xlane.xlu0 %1061  ;;  %vm1049_vm5 = vcmp.eq.f32.partialorder %v2395_v39, %v2522_v58 }
 0x4ce   :  { %v1050_v48 = vsel %vm1049_vm5, %v1045_v22, -inf  ;;  %vm1063_vm6 = vcmp.eq.f32.partialorder %v2397_v36, %v2524_v23  ;;  %v1099_v36 = vand.u32 65535, %v2434_v3 }
 0x4cf   :  { %1051 = vmax.xlane.f32.xlu1 %v1050_v48  ;;  %v1064_v59 = vsel %vm1063_vm6, %v1059_v7, -inf  ;;  %v1141_v48 = vand.u32 65535, %v2460_v52 }
 0x4d0   :  { %1065 = vmax.xlane.f32.xlu0 %v1064_v59  ;;  %v2534_v5 = vpop.xlane.xlu1 %1075  ;;  %v1101_v19 = vcvt.s32.f32 %v1099_v36  ;;  %v1185_v59 = vcvt.s32.f32 %v1183_v18  ;;  %v1266_v36 = vand.u32 127, %v2358_v53 }
 0x4d1   :  { %vm1077_vm8 = vcmp.eq.f32.partialorder %v2419_v57, %v2534_v5  ;;  %v2538_v39 = vpop.xlane.xlu0 %1089  ;;  %v1085_v57 = vand.u32 65535, %v2415_v47  ;;  %v1155_v47 = vand.u32 65535, %v2470_v10 }
 0x4d2   :  { %v1078_v34 = vsel %vm1077_vm8, %v1073_v35, -inf  ;;  %vm1091_vm11 = vcmp.eq.f32.partialorder %v2424_v12, %v2538_v39  ;;  %v1143_v35 = vcvt.s32.f32 %v1141_v48 }
 0x4d3   :  { %1079 = vmax.xlane.f32.xlu1 %v1078_v34  ;;  %v1087_v29 = vcvt.s32.f32 %v1085_v57  ;;  %v1157_v7 = vcvt.s32.f32 %v1155_v47  ;;  %v3208_v57 = vand.u32 4294967168, %v2314_v61  ;;  %v2600_v47 = vsub.s32 127, %v1266_v36 }
 0x4d4   :  { %1037 = vmax.xlane.f32.xlu0 %v1036_v27  ;;  %v2542_v45 = vpop.xlane.xlu1 %1103  ;;  %v1265_v27 = vand.u32 127, %v2344_v21 }
 0x4d5   :  { %v2544_v6 = vpop.xlane.xlu0 %1117  ;;  %vm1105_vm9 = vcmp.eq.f32.partialorder %v2455_v44, %v2542_v45  ;;  %v1169_v44 = vand.u32 65535, %v2476_v11  ;;  %v1092_v1 = vsel %vm1091_vm11, %v1087_v29, -inf }
 0x4d6   :  { %vm1119_vm10 = vcmp.eq.f32.partialorder %v2457_v4, %v2544_v6  ;;  %v1106_v9 = vsel %vm1105_vm9, %v1101_v19, -inf  ;;  %v2598_v29 = vsub.s32 127, %v1265_v27  ;;  %v1276_v27 = vand.u32 127, %v2450_v15 }
 0x4d7   :  { %v1120_v3 = vsel %vm1119_vm10, %v1115_v13, -inf  ;;  %1107 = vmax.xlane.f32.xlu1 %v1106_v9  ;;  %v1171_v8 = vcvt.s32.f32 %v1169_v44  ;;  %v2590_v13 = vsub.s32 127, %v1263_v60  ;;  %v1269_v44 = vand.u32 127, %v2388_v38 }
 0x4d8   :  { %1121 = vmax.xlane.f32.xlu0 %v1120_v3  ;;  %v2554_v41 = vpop.xlane.xlu1 %1131  ;;  %v1268_v3 = vand.u32 127, %v2374_v63 }
 0x4d9   :  { %v2556_v37 = vpop.xlane.xlu0 %1145  ;;  %vm1133_vm12 = vcmp.eq.f32.partialorder %v2466_v20, %v2554_v41 }
 0x4da   :  { %v1134_v4 = vsel %vm1133_vm12, %v1129_v42, -inf  ;;  %vm1147_vm15 = vcmp.eq.f32.partialorder %v2480_v43, %v2556_v37  ;;  %v1264_v43 = vand.u32 127, %v2339_v16 }
 0x4db   :  { %1135 = vmax.xlane.f32.xlu1 %v1134_v4  ;;  %v1148_v33 = vsel %vm1147_vm15, %v1143_v35, -inf  ;;  %v998_v35 = vcvt.f32.s32 %v2502_v14  ;;  %v1026_v4 = vcvt.f32.s32 %v2514_v31  ;;  %v1040_v14 = vcvt.f32.s32 %v2518_v0 }
 0x4dc   :  { %1093 = vmax.xlane.f32.xlu0 %v1092_v1  ;;  %v2562_v22 = vpop.xlane.xlu1 %1159  ;;  %v2594_v9 = vsub.s32 127, %v1264_v43  ;;  %v2620_v43 = vsub.s32 127, %v1269_v44  ;;  %v1275_v44 = vand.u32 127, %v2443_v62  ;;  %v1096_v0 = vcvt.f32.s32 %v2538_v39 }
 0x4dd   :  { %v2564_v12 = vpop.xlane.xlu0 %1173  ;;  %vm1161_vm13 = vcmp.eq.f32.partialorder %v2488_v30, %v2562_v22  ;;  %v1261_v30 = vand.u32 127, %v2309_v46 }
 0x4de   :  { %vm1175_vm14 = vcmp.eq.f32.partialorder %v2490_v50, %v2564_v12  ;;  %v1162_v20 = vsel %vm1161_vm13, %v1157_v7, -inf  ;;  %v1262_v50 = vand.u32 127, %v2314_v61  ;;  %v1270_v7 = vand.u32 127, %v2406_v32  ;;  %3232 = vst [vmem:[#allocation10_spill] sm:$0xff] %v2620_v43 }
 0x4df   :  { %v1176_v10 = vsel %vm1175_vm14, %v1171_v8, -inf  ;;  %1163 = vmax.xlane.f32.xlu1 %v1162_v20  ;;  %v2581_v34 = vsub.s32 127, %v1261_v30  ;;  %v1271_v8 = vand.u32 127, %v2408_v2  ;;  %v1272_v20 = vand.u32 127, %v2417_v54 }
 0x4e0   :  { %1177 = vmax.xlane.f32.xlu0 %v1176_v10  ;;  %v2574_v11 = vpop.xlane.xlu1 %1187  ;;  %v2586_v28 = vsub.s32 127, %v1262_v50  ;;  %v1273_v10 = vand.u32 127, %v2430_v40  ;;  %v1274_v50 = vand.u32 127, %v2441_v26  ;;  %v2651_v18 = vsub.s32 127, %v1275_v44 }
 0x4e1   :  { %vm1189_vm0 = vcmp.eq.f32.partialorder %v2495_v55, %v2574_v11  ;;  %v1267_v55 = vand.u32 127, %v2360_v24  ;;  %v984_v30 = vcvt.f32.s32 %v2498_v51  ;;  %v1082_v44 = vcvt.f32.s32 %v2534_v5 }
 0x4e2   :  { %v1190_v52 = vsel %vm1189_vm0, %v1185_v59, -inf  ;;  %v2626_v59 = vsub.s32 127, %v1271_v8  ;;  %v2631_v17 = vsub.s32 127, %v1273_v10  ;;  %3238 = vst [vmem:[#allocation16_spill] sm:$0xff] %v2651_v18  ;;  %v999_v10 = vshll.u32 %v998_v35, 16 }
 0x4e3   :  { %1191 = vmax.xlane.f32.xlu1 %v1190_v52  ;;  %v2604_v1 = vsub.s32 127, %v1267_v55  ;;  %v2624_v55 = vsub.s32 127, %v1270_v7  ;;  %v2649_v52 = vsub.s32 127, %v1274_v50  ;;  %v1054_v7 = vcvt.f32.s32 %v2522_v58 }
 0x4e4   :  { %1149 = vmax.xlane.f32.xlu0 %v1148_v33  ;;  %v2615_v33 = vsub.s32 127, %v1268_v3  ;;  %3234 = vst [vmem:[#allocation12_spill] sm:$0xff] %v2626_v59  ;;  %v2629_v3 = vsub.s32 127, %v1272_v20  ;;  %3236 = vst [vmem:[#allocation14_spill] sm:$0xff] %v2631_v17  ;;  %v1012_v20 = vcvt.f32.s32 %v2504_v56  ;;  %v2653_v56 = vsub.s32 127, %v1276_v27 }
 0x4e5   :  { %3233 = vst [vmem:[#allocation11_spill] sm:$0xff] %v2624_v55  ;;  %3237 = vst [vmem:[#allocation15_spill] sm:$0xff] %v2649_v52  ;;  %v1068_v50 = vcvt.f32.s32 %v2524_v23  ;;  %v985_v23 = vshll.u32 %v984_v30, 16  ;;  %v2672_v27 = vshll.u32 %v1040_v14, 16  ;;  %v1055_v35 = vshll.u32 %v1054_v7, 16 }
 0x4e6   :  { %3231 = vst [vmem:[#allocation9_spill] sm:$0xff] %v2615_v33  ;;  %3235 = vst [vmem:[#allocation13_spill] sm:$0xff] %v2629_v3  ;;  %v1013_v19 = vshll.u32 %v1012_v20, 16  ;;  %v3240_v51 = vand.u32 4294967168, %v2320_v25  ;;  %v1110_v7 = vcvt.f32.s32 %v2542_v45  ;;  %v1124_v14 = vcvt.f32.s32 %v2544_v6 }
 0x4e7   :  { %3239 = vst [vmem:[#allocation17_spill] sm:$0xff] %v2653_v56  ;;  %v1069_v5 = vshll.u32 %v1068_v50, 16  ;;  %v1166_v17 = vcvt.f32.s32 %v2562_v22  ;;  %v3241_v6 = vand.u32 4294967168, %v2309_v46  ;;  %v1194_v22 = vcvt.f32.s32 %v2574_v11 }
 0x4e8   :  { %v3245_v3 = vand.u32 4294967168, %v2314_v61  ;;  %v3247_v55 = vand.u32 4294967168, %v2360_v24 }
 0x551   :  { %v996_v8 = vpop.xlane.xlu1 %995 }
 0x552   :  { %v997_v48 = vcvt.f32.s32 %v996_v8  ;;  %v1010_v36 = vpop.xlane.xlu0 %1009 }
 0x553   :  { %v1011_v60 = vcvt.f32.s32 %v1010_v36 }
 0x554   :  { %v2660_v42 = vadd.s32 %v999_v10, %v997_v48  ;;  %v1027_v48 = vshll.u32 %v1026_v4, 16 }
 0x555   :  { %v2665_v8 = vadd.s32 %v1013_v19, %v1011_v60  ;;  %v2678_v60 = vshll.u32 %v1082_v44, 16  ;;  %v1152_v44 = vcvt.f32.s32 %v2556_v37  ;;  %v2703_v37 = vshll.u32 %v1110_v7, 16 }
 0x556   :  { %v3209_v58 = vand.u32 4294967168, %v2660_v42  ;;  %v982_v36 = vpop.xlane.xlu0 %981  ;;  %v3242_v7 = vand.u32 4294967168, %v2339_v16 }
 0x557   :  { %v3212_v20 = vand.u32 4294967168, %v2665_v8  ;;  %v983_v10 = vcvt.f32.s32 %v982_v36  ;;  %v1024_v30 = vpop.xlane.xlu1 %1023  ;;  %v1311_v45 = vand.u32 127, %v2665_v8  ;;  %v3246_v59 = vand.u32 4294967168, %v2665_v8 }
 0x558   :  { %v1358_v19 = vadd.f32 %v3209_v58, %v3208_v57  ;;  %v1025_v31 = vcvt.f32.s32 %v1024_v30  ;;  %v1138_v57 = vcvt.f32.s32 %v2554_v41  ;;  %v2713_v30 = vshll.u32 %v1152_v44, 16 }
 0x559   :  { %v1359_v4 = vadd.f32 %v3212_v20, %v3240_v51  ;;  %v2685_v36 = vadd.s32 %v985_v23, %v983_v10  ;;  %v1310_v51 = vand.u32 127, %v2660_v42  ;;  %v2696_v10 = vshll.u32 %v1096_v0, 16 }
 0x55a   :  { %v1374_v50 = vadd.f32 1e-08, %v1358_v19  ;;  %v2694_v23 = vadd.s32 %v1027_v48, %v1025_v31  ;;  %v1180_v19 = vcvt.f32.s32 %v2564_v12  ;;  %v2708_v31 = vshll.u32 %v1124_v14, 16 }
 0x55b   :  { %v1375_v58 = vadd.f32 1e-08, %v1359_v4  ;;  %v3211_v39 = vand.u32 4294967168, %v2685_v36  ;;  %v2710_v0 = vshll.u32 %v1138_v57, 16  ;;  %v1309_v48 = vand.u32 127, %v2685_v36 }
 0x55c   :  { %1822 = vrcp.f32 %v1374_v50  ;;  %v3215_v4 = vand.u32 4294967168, %v2694_v23  ;;  %v2715_v50 = vshll.u32 %v1166_v17, 16  ;;  %v1052_v11 = vpop.xlane.xlu1 %1051  ;;  %v1312_v57 = vand.u32 127, %v2694_v23 }
 0x55d   :  { %1824 = vrcp.f32 %v1375_v58  ;;  %v1357_v41 = vadd.f32 %v3211_v39, %v3241_v6  ;;  %v2717_v6 = vsub.s32 127, %v1310_v51  ;;  %v2723_v39 = vsub.s32 127, %v1311_v45  ;;  %v1066_v20 = vpop.xlane.xlu0 %1065 }
 0x55e   :  { %v1360_v12 = vadd.f32 %v3215_v4, %v3242_v7  ;;  %v1053_v14 = vcvt.f32.s32 %v1052_v11  ;;  %v2728_v44 = vshll.u32 %v1194_v22, 16  ;;  %v1067_v51 = vcvt.f32.s32 %v1066_v20 }
 0x55f   :  { %v1373_v58 = vadd.f32 1e-08, %v1357_v41  ;;  %v2726_v41 = vshll.u32 %v1180_v19, 16  ;;  %v2730_v56 = vsub.s32 127, %v1309_v48  ;;  %v2741_v22 = vsub.s32 127, %v1312_v57 }
 0x560   :  { %v1376_v17 = vadd.f32 1e-08, %v1360_v12  ;;  %v2732_v18 = vadd.s32 %v1055_v35, %v1053_v14  ;;  %v1080_v48 = vpop.xlane.xlu1 %1079  ;;  %v3243_v19 = vand.u32 4294967168, %v2660_v42  ;;  %v3244_v4 = vand.u32 4294967168, %v2358_v53 }
 0x561   :  { %1826 = vrcp.f32 %v1373_v58  ;;  %v2737_v58 = vadd.s32 %v1069_v5, %v1067_v51  ;;  %v1038_v7 = vpop.xlane.xlu0 %1037  ;;  %v1341_v45 = vcvt.s32.f32 %v2730_v56 }
 0x562   :  { %1828 = vrcp.f32 %v1376_v17  ;;  %v3222_v20 = vand.u32 4294967168, %v2732_v18  ;;  %v1314_v35 = vand.u32 127, %v2732_v18  ;;  %v1081_v17 = vcvt.f32.s32 %v1080_v48 }
 0x563   :  { %v1315_v14 = vand.u32 127, %v2737_v58  ;;  %v1039_v5 = vcvt.f32.s32 %v1038_v7  ;;  %v3248_v42 = vand.u32 4294967168, %v2737_v58 }
 0x564   :  { %v1362_v52 = vadd.f32 %v3222_v20, %v3244_v4  ;;  %v2761_v7 = vsub.s32 127, %v1314_v35  ;;  %v2768_v56 = vadd.s32 %v2678_v60, %v1081_v17 }
 0x565   :  { %v2770_v33 = vsub.s32 127, %v1315_v14  ;;  %v2773_v61 = vadd.s32 %v2672_v27, %v1039_v5  ;;  %v3252_v5 = vand.u32 4294967168, %v2374_v63 }
 0x566   :  { %v1823_v12 = vpop.eup %1822  ;;  %v1378_v43 = vadd.f32 1e-08, %v1362_v52  ;;  %v3223_v4 = vand.u32 4294967168, %v2768_v56  ;;  %v1316_v35 = vand.u32 127, %v2768_v56 }
 0x567   :  { %v1825_v51 = vpop.eup %1824  ;;  %v1457_v57 = vmul.f32 %v1823_v12, %v3243_v19  ;;  %v1393_v11 = vmul.f32 %v1823_v12, %v3245_v3  ;;  %v1363_v19 = vadd.f32 %v3248_v42, %v3247_v55  ;;  %3249 = vst [vmem:[#allocation18_spill] sm:$0xff] %v2770_v33  ;;  %v1233_v60 = vand.u32 4294967168, %v2773_v61  ;;  %v1108_v3 = vpop.xlane.xlu1 %1107 }
 0x568   :  { %v2759_v48 = vmul.f32 %v1825_v51, %v3246_v59  ;;  %1830 = vrcp.f32 %v1378_v43  ;;  %v1313_v52 = vand.u32 127, %v2773_v61  ;;  %v3250_v12 = vcvt.s32.f32 %v2586_v28 }
 0x569   :  { %v1423_v59 = vsel %vm1389_vm1, %v1393_v11, 0.0  ;;  %v1379_v8 = vadd.f32 1e-08, %v1363_v19  ;;  %v3251_v11 = vand.u32 4294967168, %v2685_v36  ;;  %v1364_v43 = vadd.f32 %v3223_v4, %v3252_v5 }
 0x56a   :  { %v1440_v27 = vsel %vm1438_vm2, %v3250_v12, %v1423_v59  ;;  %v3253_v19 = vand.u32 4294967168, %v2344_v21  ;;  %v1122_v59 = vpop.xlane.xlu0 %1121  ;;  %v3254_v36 = vand.u32 4294967168, %v2309_v46  ;;  %v2802_v17 = vsub.s32 127, %v1316_v35 }
 0x56b   :  { %v1827_v55 = vpop.eup %1826  ;;  %1832 = vrcp.f32 %v1379_v8  ;;  %v1473_v8 = vsel %vm1455_vm3, %v1457_v57, %v1440_v27  ;;  %v1380_v20 = vadd.f32 1e-08, %v1364_v43  ;;  %v1109_v5 = vcvt.f32.s32 %v1108_v3  ;;  %v1136_v35 = vpop.xlane.xlu1 %1135 }
 0x56c   :  { %v1456_v14 = vmul.f32 %v1827_v55, %v3251_v11  ;;  %v1361_v28 = vadd.f32 %v1233_v60, %v3253_v19  ;;  %v1391_v12 = vmul.f32 %v1827_v55, %v3254_v36  ;;  %v1829_v11 = vpop.eup %1828  ;;  %v1123_v4 = vcvt.f32.s32 %v1122_v59 }
 0x56d   :  { %v3255_v42 = vand.u32 4294967168, %v2694_v23  ;;  %v2808_v63 = vsub.s32 127, %v1313_v52  ;;  %1834 = vrcp.f32 %v1380_v20  ;;  %v2813_v55 = vadd.s32 %v2703_v37, %v1109_v5 }
 0x56e   :  { %v1377_v19 = vadd.f32 1e-08, %v1361_v28  ;;  %v1422_v46 = vsel %vm1389_vm1, %v1391_v12, 0.0  ;;  %v2816_v57 = vadd.s32 %v2708_v31, %v1123_v4  ;;  %v3256_v3 = vcvt.s32.f32 %v2581_v34  ;;  %v1094_v52 = vpop.xlane.xlu0 %1093 }
 0x56f   :  { %v2806_v33 = vmul.f32 %v1829_v11, %v3255_v42  ;;  %v3257_v43 = vcvt.s32.f32 %v2717_v6  ;;  %v3258_v20 = vand.u32 4294967168, %v2320_v25  ;;  %v1238_v4 = vand.u32 4294967168, %v2813_v55 }
 0x570   :  { %v1439_v23 = vsel %vm1438_vm2, %v3256_v3, %v1422_v46  ;;  %1836 = vrcp.f32 %v1377_v19  ;;  %v1318_v34 = vand.u32 127, %v2813_v55  ;;  %v1239_v42 = vand.u32 4294967168, %v2816_v57 }
 0x571   :  { %v1472_v27 = vsel %vm1455_vm3, %v1456_v14, %v1439_v23  ;;  %v1490_v37 = vsel %vm1488_vm4, %v3257_v43, %v1473_v8  ;;  %v1395_v31 = vmul.f32 %v1825_v51, %v3258_v20  ;;  %v1319_v28 = vand.u32 127, %v2816_v57  ;;  %v1164_v23 = vpop.xlane.xlu1 %1163 }
 0x572   :  { %v1137_v59 = vcvt.f32.s32 %v1136_v35  ;;  %v1095_v36 = vcvt.f32.s32 %v1094_v52  ;;  %v1489_v14 = vsel %vm1488_vm4, %v1341_v45, %v1472_v27  ;;  %v2839_v25 = vsub.s32 127, %v1318_v34  ;;  %v2849_v46 = vpop.eup %1830  ;;  %v1178_v35 = vpop.xlane.xlu0 %1177 }
 0x573   :  { %v1424_v6 = vsel %vm1389_vm1, %v1395_v31, 0.0  ;;  %v3259_v51 = vand.u32 4294967168, %v2406_v32  ;;  %v3260_v5 = vand.u32 4294967168, %v2408_v2  ;;  %1505 = vxpose.xlu0.b32.start [1/16] (narrow) %v1489_v14, 16  ;;  %v3261_v52 = vcvt.s32.f32 %v2590_v13 }
 0x574   :  { %v2852_v45 = vadd.s32 %v2710_v0, %v1137_v59  ;;  %v2855_v3 = vadd.s32 %v2696_v10, %v1095_v36  ;;  %v3262_v43 = vand.u32 4294967168, %v2339_v16  ;;  %v3263_v34 = vand.u32 4294967168, %v2732_v18 }
 0x575   :  { %v1366_v8 = vadd.f32 %v1238_v4, %v3259_v51  ;;  %v1367_v19 = vadd.f32 %v1239_v42, %v3260_v5  ;;  %v1441_v27 = vsel %vm1438_vm2, %v3261_v52, %v1424_v6  ;;  %v2865_v31 = vpop.eup %1832  ;;  %v2873_v36 = vsub.s32 127, %v1319_v28  ;;  %v1192_v52 = vpop.xlane.xlu1 %1191 }
 0x576   :  { %v2863_v20 = vmul.f32 %v1829_v11, %v3262_v43  ;;  %v2870_v0 = vmul.f32 %v2849_v46, %v3263_v34  ;;  %v3264_v13 = vand.u32 4294967168, %v2737_v58  ;;  %v1240_v11 = vand.u32 4294967168, %v2852_v45  ;;  %v1150_v10 = vpop.xlane.xlu0 %1149 }
 0x577   :  { %v1382_v59 = vadd.f32 1e-08, %v1366_v8  ;;  %v1383_v16 = vadd.f32 1e-08, %v1367_v19  ;;  %v1320_v6 = vand.u32 127, %v2852_v45  ;;  %v3226_v18 = vand.u32 4294967168, %v2855_v3  ;;  %v2889_v43 = vpop.eup %1834 }
 0x578   :  { %v2878_v14 = vmul.f32 %v2865_v31, %v3264_v13  ;;  %v1317_v51 = vand.u32 127, %v2855_v3  ;;  %v1165_v5 = vcvt.f32.s32 %v1164_v23  ;;  %1506 = vxpose.xlu0.b32.cont [2/16] (narrow) %v1490_v37, 16  ;;  %v3265_v58 = vand.u32 4294967168, %v2417_v54 }
 0x579   :  { %1838 = vrcp.f32 %v1382_v59  ;;  %v1179_v19 = vcvt.f32.s32 %v1178_v35  ;;  %v3266_v59 = vand.u32 4294967168, %v2388_v38  ;;  %v1193_v13 = vcvt.f32.s32 %v1192_v52 }
 0x57a   :  { %1840 = vrcp.f32 %v1383_v16  ;;  %v1368_v8 = vadd.f32 %v1240_v11, %v3265_v58  ;;  %v2897_v37 = vadd.s32 %v2715_v50, %v1165_v5  ;;  %v2899_v16 = vpop.eup %1836  ;;  %v3267_v28 = vand.u32 4294967168, %v2768_v56 }
 0x57b   :  { %v1365_v23 = vadd.f32 %v3226_v18, %v3266_v59  ;;  %v2906_v58 = vsub.s32 127, %v1320_v6  ;;  %v2909_v34 = vadd.s32 %v2726_v41, %v1179_v19  ;;  %v2914_v50 = vmul.f32 %v2899_v16, %v1233_v60 }
 0x57c   :  { %v2904_v35 = vmul.f32 %v2889_v43, %v3267_v28  ;;  %v1384_v12 = vadd.f32 1e-08, %v1368_v8  ;;  %v2916_v5 = vsub.s32 127, %v1317_v51  ;;  %v3227_v56 = vand.u32 4294967168, %v2897_v37 }
 0x57d   :  { %v1381_v52 = vadd.f32 1e-08, %v1365_v23  ;;  %v1322_v28 = vand.u32 127, %v2897_v37  ;;  %v3228_v6 = vand.u32 4294967168, %v2909_v34  ;;  %v1323_v8 = vand.u32 127, %v2909_v34 }
 0x57e   :  { %1842 = vrcp.f32 %v1384_v12  ;;  %v3268_v41 = vand.u32 4294967168, %v2441_v26  ;;  %v2927_v60 = vadd.s32 %v2728_v44, %v1193_v13  ;;  %v1151_v51 = vcvt.f32.s32 %v1150_v10 }
 0x57f   :  { %1844 = vrcp.f32 %v1381_v52  ;;  %v2929_v19 = vsub.s32 127, %v1322_v28  ;;  %v2931_v59 = vsub.s32 127, %v1323_v8  ;;  %v3269_v12 = vand.u32 4294967168, %v2443_v62 }
 0x580   :  { %v1370_v61 = vadd.f32 %v3227_v56, %v3268_v41  ;;  %v1474_v52 = vsel %vm1455_vm3, %v2759_v48, %v1441_v27  ;;  %v1352_v18 = vcvt.s32.f32 %v2906_v58  ;;  %v3229_v44 = vand.u32 4294967168, %v2927_v60 }
 0x581   :  { %v1371_v23 = vadd.f32 %v3228_v6, %v3269_v12  ;;  %v2943_v10 = vadd.s32 %v2713_v30, %v1151_v51  ;;  %v1349_v13 = vcvt.s32.f32 %v2916_v5  ;;  %v1324_v8 = vand.u32 127, %v2927_v60 }
 0x582   :  { %v1386_v41 = vadd.f32 1e-08, %v1370_v61  ;;  %v3270_v56 = vcvt.s32.f32 %v2723_v39  ;;  %v3271_v27 = vand.u32 4294967168, %v2450_v15 }
 0x583   :  { %v1387_v28 = vadd.f32 1e-08, %v1371_v23  ;;  %v1839_v6 = vpop.eup %1838  ;;  %v1241_v61 = vand.u32 4294967168, %v2943_v10  ;;  %v1321_v23 = vand.u32 127, %v2943_v10 }
 0x584   :  { %v1491_v12 = vsel %vm1488_vm4, %v3270_v56, %v1474_v52  ;;  %1846 = vrcp.f32 %v1386_v41  ;;  %v1372_v30 = vadd.f32 %v3229_v44, %v3271_v27  ;;  %v1841_v51 = vpop.eup %1840  ;;  %v2959_v39 = vmul.f32 %v1839_v6, %v1238_v4 }
 0x585   :  { %1507 = vxpose.xlu0.b32.cont [3/16] (narrow) %v1491_v12, 16  ;;  %v1425_v52 = vsel %vm1389_vm1, %v2863_v20, 0.0  ;;  %v2968_v41 = vmul.f32 %v1841_v51, %v1239_v42  ;;  %1848 = vrcp.f32 %v1387_v28  ;;  %v3272_v27 = vand.u32 4294967168, %v2430_v40 }
 0x586   :  { %v1388_v12 = vadd.f32 1e-08, %v1372_v30 }
 0x587   :  { %v1369_v55 = vadd.f32 %v1241_v61, %v3272_v27 }
 0x588   :  { %1865 = shalt.err (!%p1862_p4)
}
 0x589   :  { %s1866_s25 = scalar_lea.hbm %s3206_s5, 1024 }
 0x58a   :  { %p1867_p5 = scmp.ne.s32.totalorder %s3206_s5, %s1866_s25  ;;  %p1870_p6 = scmp.lt.u32.totalorder %s1866_s25, %s3206_s5 }
 0x58c   :  { %p1872_p7 = pnand %p1870_p6, %p1867_p5 }
 0x58e   :  { %1875 = shalt.err (!%p1872_p7)
}
 0x58f   :  { %s1903_s30 = smov 64   ;;  %s1904_s1 = smov 4   ;;  %v2986_v57 = vsub.s32 127, %v1324_v8  ;;  %v3273_v4 = vcvt.s32.f32 %v2594_v9  ;;  %v3274_v20 = vand.u32 4294967168, %v2344_v21  ;;  %v3275_v30 = vand.u32 4294967168, %v2358_v53  ;;  %v1843_v44 = vpop.eup %1842 }
 0x590   :  { %1550 = dma.vmem_to_hbm [thread:$0]  %s1545_s4, 1024, %s3206_s5, [#allocation3], %s1903_s30, %s1903_s30, %s1904_s1   ;;  %1850 = vrcp.f32 %v1388_v12  ;;  %v1385_v56 = vadd.f32 1e-08, %v1369_v55  ;;  %v3276_v48 = vand.u32 4294967168, %v2360_v24  ;;  %v3277_v21 = vcvt.s32.f32 %v2741_v22  ;;  %v1845_v12 = vpop.eup %1844 }
 0x591   :  { %v1442_v42 = vsel %vm1438_vm2, %v3273_v4, %v1425_v52  ;;  %v1399_v28 = vmul.f32 %v2899_v16, %v3274_v20  ;;  %v1401_v27 = vmul.f32 %v2849_v46, %v3275_v30  ;;  %v3004_v52 = vsub.s32 127, %v1321_v23  ;;  %v3284_v20 = vld [vmem:[#allocation8_spill] sm:$0xff]  ;;  %s1905_s5 = smov [#allocation4]  }
 0x592   :  { %v1475_v8 = vsel %vm1455_vm3, %v2806_v33, %v1442_v42  ;;  %v1403_v9 = vmul.f32 %v2865_v31, %v3276_v48  ;;  %v1467_v24 = vmul.f32 %v1843_v44, %v1240_v11  ;;  %1852 = vrcp.f32 %v1385_v56  ;;  %s1556_s9 = sshll.u32 %s1905_s5, 4  ;;  %s1557_s9 = int_to_ptr.vmem [resolvable:$true] %s1556_s9 }
 0x593   :  { %v1492_v53 = vsel %vm1488_vm4, %v3277_v21, %v1475_v8  ;;  %v1426_v46 = vsel %vm1389_vm1, %v1399_v28, 0.0  ;;  %v1427_v16 = vsel %vm1389_vm1, %v1401_v27, 0.0  ;;  %v3278_v33 = vcvt.s32.f32 %v2598_v29  ;;  %v1847_v21 = vpop.eup %1846  ;;  %s1876_s10 = scalar_lea.vmem %s1557_s9, 256  ;;  %p1881_p9 = scmp.lt.s32.totalorder %s1557_s9, %s1557_s9 }
 0x594   :  { %1508 = vxpose.xlu0.b32.cont [4/16] (narrow) %v1492_v53, 16  ;;  %v3279_v31 = vcvt.s32.f32 %v2600_v47  ;;  %v3280_v23 = vand.u32 4294967168, %v2855_v3  ;;  %v1428_v29 = vsel %vm1389_vm1, %v1403_v9, 0.0  ;;  %v3281_v56 = vcvt.s32.f32 %v2808_v63  ;;  %p1877_p8 = scmp.ne.s32.totalorder %s1557_s9, %s1876_s10  ;;  %p1882_p10 = scmp.lt.s32.totalorder %s1876_s10, %s1876_s10 }
 0x595   :  { %v1443_v22 = vsel %vm1438_vm2, %v3278_v33, %v1426_v46  ;;  %v3282_v4 = vcvt.s32.f32 %v2761_v7  ;;  %v3283_v42 = vcvt.s32.f32 %v2604_v1  ;;  %v3286_v30 = vand.u32 4294967168, %v2388_v38  ;;  %v3289_v46 = vld [vmem:[#allocation18_spill] sm:$0xff] }
 0x596   :  { %v1444_v48 = vsel %vm1438_vm2, %v3279_v31, %v1427_v16  ;;  %v1464_v55 = vmul.f32 %v1845_v12, %v3280_v23  ;;  %v1476_v45 = vsel %vm1455_vm3, %v2914_v50, %v1443_v22  ;;  %v3287_v7 = vand.u32 4294967168, %v2406_v32  ;;  %v1849_v31 = vpop.eup %1848  ;;  %p1883_p11 = por %p1882_p10, %p1881_p9 }
 0x597   :  { %v1477_v11 = vsel %vm1455_vm3, %v2870_v0, %v1444_v48  ;;  %v1493_v47 = vsel %vm1488_vm4, %v3281_v56, %v1476_v45  ;;  %v1445_v50 = vsel %vm1438_vm2, %v3283_v42, %v1428_v29  ;;  %v3285_v0 = vand.u32 4294967168, %v3284_v20  ;;  %v3297_v45 = vld [vmem:[#allocation11_spill] sm:$0xff] }
 0x598   :  { %v1494_v3 = vsel %vm1488_vm4, %v3282_v4, %v1477_v11  ;;  %v1478_v63 = vsel %vm1455_vm3, %v2878_v14, %v1445_v50  ;;  %v1407_v27 = vmul.f32 %v1845_v12, %v3286_v30  ;;  %v1409_v8 = vmul.f32 %v1839_v6, %v3287_v7  ;;  %1509 = vxpose.xlu0.b32.cont [5/16] (narrow) %v1493_v47, 16  ;;  %p1884_p12 = pnand %p1883_p11, %p1877_p8 }
 0x599   :  { %v1405_v28 = vmul.f32 %v2889_v43, %v3285_v0  ;;  %v3288_v9 = vand.u32 4294967168, %v2408_v2  ;;  %v1356_v53 = vcvt.s32.f32 %v2986_v57  ;;  %v3290_v16 = vcvt.s32.f32 %v3289_v46  ;;  %v3293_v2 = vld [vmem:[#allocation9_spill] sm:$0xff] }
 0x59a   :  { %v3291_v38 = vand.u32 4294967168, %v2417_v54  ;;  %v3292_v32 = vand.u32 4294967168, %v2897_v37  ;;  %v1430_v33 = vsel %vm1389_vm1, %v1407_v27, 0.0  ;;  %v1431_v22 = vsel %vm1389_vm1, %v1409_v8, 0.0  ;;  %v3295_v37 = vld [vmem:[#allocation10_spill] sm:$0xff]  ;;  %v1851_v42 = vpop.eup %1850 }
 0x59b   :  { %v1411_v1 = vmul.f32 %v1841_v51, %v3288_v9  ;;  %v1495_v43 = vsel %vm1488_vm4, %v3290_v16, %v1478_v63  ;;  %v1429_v14 = vsel %vm1389_vm1, %v1405_v28, 0.0  ;;  %v3294_v51 = vcvt.s32.f32 %v3293_v2 }
 0x59c   :  { %v1413_v12 = vmul.f32 %v1843_v44, %v3291_v38  ;;  %v1469_v6 = vmul.f32 %v1847_v21, %v3292_v32  ;;  %v1353_v48 = vcvt.s32.f32 %v3004_v52  ;;  %v3296_v44 = vcvt.s32.f32 %v3295_v37  ;;  %1510 = vxpose.xlu0.b32.cont [6/16] (narrow) %v1494_v3, 16  ;;  %v1853_v8 = vpop.eup %1852 }
 0x59d   :  { %v1446_v57 = vsel %vm1438_vm2, %v3294_v51, %v1429_v14  ;;  %v3298_v11 = vcvt.s32.f32 %v3297_v45  ;;  %v3299_v56 = vcvt.s32.f32 %v2802_v17  ;;  %v1432_v4 = vsel %vm1389_vm1, %v1411_v1, 0.0  ;;  %v3316_v51 = vld [vmem:[#allocation17_spill] sm:$0xff] }
 0x59e   :  { %v1479_v54 = vsel %vm1455_vm3, %v2904_v35, %v1446_v57  ;;  %v1447_v23 = vsel %vm1438_vm2, %v3296_v44, %v1430_v33  ;;  %v3300_v50 = vcvt.s32.f32 %v2839_v25  ;;  %v1433_v28 = vsel %vm1389_vm1, %v1413_v12, 0.0 }
 0x59f   :  { %v1448_v29 = vsel %vm1438_vm2, %v3298_v11, %v1431_v22  ;;  %v1496_v47 = vsel %vm1488_vm4, %v3299_v56, %v1479_v54  ;;  %v1480_v52 = vsel %vm1455_vm3, %v1464_v55, %v1447_v23  ;;  %v3301_v55 = vld [vmem:[#allocation12_spill] sm:$0xff]  ;;  %v3303_v3 = vand.u32 4294967168, %v2909_v34  ;;  %v3318_v22 = vld [vmem:[#allocation14_spill] sm:$0xff] }
 0x5a0   :  { %v1481_v35 = vsel %vm1455_vm3, %v2959_v39, %v1448_v29  ;;  %v1497_v17 = vsel %vm1488_vm4, %v1349_v13, %v1480_v52  ;;  %v3302_v0 = vcvt.s32.f32 %v3301_v55  ;;  %v3304_v13 = vld [vmem:[#allocation13_spill] sm:$0xff]  ;;  %v3306_v27 = vand.u32 4294967168, %v2441_v26  ;;  %1511 = vxpose.xlu0.b32.cont [7/16] (narrow) %v1495_v43, 16 }
 0x5a1   :  { %v1498_v20 = vsel %vm1488_vm4, %v3300_v50, %v1481_v35  ;;  %v1470_v63 = vmul.f32 %v1849_v31, %v3303_v3  ;;  %v3305_v25 = vcvt.s32.f32 %v3304_v13  ;;  %v3307_v9 = vcvt.s32.f32 %v2873_v36 }
 0x5a2   :  { %v1449_v39 = vsel %vm1438_vm2, %v3302_v0, %v1432_v4  ;;  %v1417_v7 = vmul.f32 %v1847_v21, %v3306_v27  ;;  %v3308_v46 = vand.u32 4294967168, %v2443_v62  ;;  %v3309_v16 = vand.u32 4294967168, %v2450_v15  ;;  %v3312_v15 = vld [vmem:[#allocation15_spill] sm:$0xff] }
 0x5a3   :  { %v1482_v5 = vsel %vm1455_vm3, %v2968_v41, %v1449_v39  ;;  %v1450_v30 = vsel %vm1438_vm2, %v3305_v25, %v1433_v28  ;;  %v1468_v38 = vmul.f32 %v1853_v8, %v1241_v61  ;;  %v3310_v36 = vand.u32 4294967168, %v2430_v40 }
 0x5a4   :  { %v1499_v1 = vsel %vm1488_vm4, %v3307_v9, %v1482_v5  ;;  %v1483_v34 = vsel %vm1455_vm3, %v1467_v24, %v1450_v30  ;;  %v1419_v41 = vmul.f32 %v1849_v31, %v3308_v46  ;;  %v1421_v14 = vmul.f32 %v1851_v42, %v3309_v16  ;;  %1512 = vxpose.xlu0.b32.cont [8/16] (narrow) %v1496_v47, 16 }
 0x5a5   :  { %v1500_v26 = vsel %vm1488_vm4, %v1352_v18, %v1483_v34  ;;  %v1415_v21 = vmul.f32 %v1853_v8, %v3310_v36  ;;  %v1435_v24 = vsel %vm1389_vm1, %v1417_v7, 0.0  ;;  %v3311_v62 = vand.u32 4294967168, %v2927_v60  ;;  %v3314_v60 = vld [vmem:[#allocation16_spill] sm:$0xff] }
 0x5a6   :  { %v3313_v32 = vcvt.s32.f32 %v3312_v15  ;;  %v1436_v58 = vsel %vm1389_vm1, %v1419_v41, 0.0  ;;  %v1437_v18 = vsel %vm1389_vm1, %v1421_v14, 0.0  ;;  %v3315_v2 = vcvt.s32.f32 %v3314_v60 }
 0x5a7   :  { %v1471_v12 = vmul.f32 %v1851_v42, %v3311_v62  ;;  %v1434_v40 = vsel %vm1389_vm1, %v1415_v21, 0.0  ;;  %v3317_v57 = vcvt.s32.f32 %v3316_v51  ;;  %v3319_v31 = vcvt.s32.f32 %v3318_v22 }
 0x5a8   :  { %v1452_v10 = vsel %vm1438_vm2, %v3313_v32, %v1435_v24  ;;  %v1453_v43 = vsel %vm1438_vm2, %v3315_v2, %v1436_v58  ;;  %v3320_v37 = vcvt.s32.f32 %v2929_v19  ;;  %v3321_v11 = vcvt.s32.f32 %v2931_v59  ;;  %1513 = vxpose.xlu0.b32.cont [9/16] (narrow) %v1497_v17, 16 }
 0x5a9   :  { %v1485_v61 = vsel %vm1455_vm3, %v1469_v6, %v1452_v10  ;;  %v1454_v33 = vsel %vm1438_vm2, %v3317_v57, %v1437_v18  ;;  %v1451_v54 = vsel %vm1438_vm2, %v3319_v31, %v1434_v40  ;;  %v1486_v44 = vsel %vm1455_vm3, %v1470_v63, %v1453_v43 }
 0x5aa   :  { %v1502_v6 = vsel %vm1488_vm4, %v3320_v37, %v1485_v61  ;;  %v1487_v23 = vsel %vm1455_vm3, %v1471_v12, %v1454_v33  ;;  %v1484_v45 = vsel %vm1455_vm3, %v1468_v38, %v1451_v54  ;;  %v1503_v29 = vsel %vm1488_vm4, %v3321_v11, %v1486_v44 }
 0x5ab   :  { %v1504_v19 = vsel %vm1488_vm4, %v1356_v53, %v1487_v23  ;;  %v1501_v56 = vsel %vm1488_vm4, %v1353_v48, %v1484_v45 }
 0x5ac   :  { %1514 = vxpose.xlu0.b32.cont [10/16] (narrow) %v1498_v20, 16 }
 0x5b0   :  { %1515 = vxpose.xlu0.b32.cont [11/16] (narrow) %v1499_v1, 16 }
 0x5b4   :  { %1516 = vxpose.xlu0.b32.cont [12/16] (narrow) %v1500_v26, 16 }
 0x5b8   :  { %1517 = vxpose.xlu0.b32.cont [13/16] (narrow) %v1501_v56, 16 }
 0x5bc   :  { %1518 = vxpose.xlu0.b32.cont [14/16] (narrow) %v1502_v6, 16 }
 0x5c0   :  { %1519 = vxpose.xlu0.b32.cont [15/16] (narrow) %v1503_v29, 16 }
 0x5c4   :  { %1520 = vxpose.xlu0.b32.end [16/16] (narrow) %v1504_v19, 16 }
 0x608   :  { %v1521_v52 = vpop.trf.xlu0 }
 0x609   :  { %1537 = vst [vmem:[#allocation4] sm:$0xff] %v1521_v52 }
 0x60c   :  { %v1522_v59 = vpop.trf.xlu0 }
 0x60d   :  { %1538 = vst [vmem:[#allocation4 + $0x8] sm:$0xff] %v1522_v59 }
 0x60e   :  { %1887 = shalt.err (!%p1884_p12)
}
 0x60f   :  { %s1888_s13 = scalar_lea.hbm %s3207_s6, 256 }
 0x610   :  { %p1889_p13 = scmp.ne.s32.totalorder %s3207_s6, %s1888_s13  ;;  %p1892_p0 = scmp.lt.u32.totalorder %s1888_s13, %s3207_s6 }
 0x612   :  { %p1894_p1 = pnand %p1892_p0, %p1889_p13 }
 0x614   :  { %1897 = shalt.err (!%p1894_p1)
}
 0x615   :  { %s1906_s18 = smov 128   ;;  %s1907_s19 = smov 8  }
 0x616   :  { %1562 = dma.vmem_to_hbm [thread:$0]  %s1557_s9, 256, %s3207_s6, [#allocation5], %s1906_s18, %s1906_s18, %s1907_s19  }
 0x617   :  { %1898 = dma.done.wait [#allocation3], 1024  }
 0x618   :  { %1899 = vsyncadd [#allocation3], 4294966272 }
 0x619   :  { %1900 = dma.done.wait [#allocation5], 256  }
 0x61a   :  { %1901 = vsyncadd [#allocation5], 4294967040 }
 0x61b   :  { %1569 = vsyncpa [#allocation3], 1 }
 0x61c   :  { %1570 = vsyncpa [#allocation5], 1 }

// kernel: tpu_custom_call.1
= control target key start
LH: loop header
LB: loop body
LE: loop exit
PB: predicated region body
PF: predicated region fallthrough
CT: control target
= control target key end

     0   :  { %12 = vsyncpa [#allocation3], 0  ;;  %vm104_vm0 = vcmask 261120   ;;  %s3201_s0 = inlined_call_operand.vmem [shape: bf16[128,32], index: 0, kind: input, shape index: {}]   ;;  %s3202_s1 = inlined_call_operand.vmem [shape: bf16[32,32], index: 1, kind: input, shape index: {}]   ;;  %s3203_s2 = inlined_call_operand.vmem [shape: f32[1,32], index: 2, kind: input, shape index: {}]   ;;  %s3204_s3 = inlined_call_operand.vmem [shape: bf16[32,128], index: 3, kind: input, shape index: {}]   ;;  %s3205_s4 = inlined_call_operand.vmem [shape: f32[1,128], index: 4, kind: input, shape index: {}]   ;;  %s3206_s5 = inlined_call_operand.hbm [shape: bf16[128,128], index: 5, kind: output, shape index: {0}]   ;;  %s3207_s6 = inlined_call_operand.hbm [shape: f32[16,128], index: 6, kind: output, shape index: {1}]  }
   0x1   :  { %v1746_v0 = vld [vmem:[%s3202_s1] sm:$0xff]   ;;  %v1747_v1 = vld [vmem:[%s3202_s1 + $0x8] sm:$0xff]   ;;  %v1750_v4 = vld [vmem:[%s3201_s0 + $0x10] sm:$0xff]  }
   0x2   :  { %1700 = vmatprep.subr.bf16.mxu0 %v1746_v0  ;;  %v1748_v2 = vld [vmem:[%s3201_s0] sm:$0xff]   ;;  %v1749_v3 = vld [vmem:[%s3201_s0 + $0x8] sm:$0xff]  }
   0x3   :  { %1701 = vmatpush3.bf16.msra.mxu0 %v1746_v0  ;;  %1704 = vmatprep.mubr.msk.bf16.mxu0 %vm104_vm0, %v1748_v2 }
   0x4   :  { %1702 = vmatprep.subr.bf16.mxu0 %v1747_v1 }
   0x7   :  { %1703 = vmatpush3.bf16.msra.mxu0 %v1747_v1 }
   0xa   :  { %1705 = vmatmul.mubr.msk.bf16.vlgmr.msra.gmra.mrb[0].mxu0 %vm104_vm0, %v1749_v3 }
   0xb   :  { %1708 = vmatprep.mubr.msk.bf16.mxu0 %vm104_vm0, %v1750_v4 }
   0xc   :  { %13 = vsyncpa [#allocation5], 0  ;;  %v1751_v5 = vld [vmem:[%s3201_s0 + $0x18] sm:$0xff]   ;;  %v1752_v6 = vld [vmem:[%s3201_s0 + $0x20] sm:$0xff]  }
   0xd   :  { %v1753_v7 = vld [vmem:[%s3201_s0 + $0x28] sm:$0xff]   ;;  %v1754_v8 = vld [vmem:[%s3201_s0 + $0x30] sm:$0xff]   ;;  %v1755_v9 = vld [vmem:[%s3201_s0 + $0x38] sm:$0xff]  }
   0xe   :  { %v1756_v10 = vld [vmem:[%s3204_s3] sm:$0xff]   ;;  %v1757_v11 = vld [vmem:[%s3204_s3 + $0x8] sm:$0xff]   ;;  %s1902_s3 = smov [#allocation2]  }
   0xf   :  { %1720 = vmatprep.subr.bf16.mxu1 %v1756_v10  ;;  %v1571_v12 = vld [vmem:[%s3203_s2] ss:$0 sm:$0xff] }
  0x10   :  { %1721 = vmatpush3.bf16.msra.mxu1 %v1756_v10 }
  0x11   :  { %1722 = vmatprep.subr.bf16.mxu1 %v1757_v11 }
  0x12   :  { %1709 = vmatmul.mubr.msk.bf16.gmra.mrb[4].mxu0 %vm104_vm0, %v1751_v5  ;;  %v1590_v5 = vld [vmem:[%s3205_s4] ss:$0 sm:$0xff]  ;;  %s1544_s4 = sshll.u32 %s1902_s3, 4  ;;  %s1545_s4 = int_to_ptr.vmem [resolvable:$true] %s1544_s4 }
  0x13   :  { %1712 = vmatprep.mubr.msk.bf16.mxu0 %vm104_vm0, %v1752_v6  ;;  %s1854_s22 = scalar_lea.vmem %s1545_s4, 1024  ;;  %p1859_p1 = scmp.lt.s32.totalorder %s1545_s4, %s1545_s4 }
  0x14   :  { %1723 = vmatpush3.bf16.msra.mxu1 %v1757_v11  ;;  %p1855_p0 = scmp.ne.s32.totalorder %s1545_s4, %s1854_s22  ;;  %p1860_p2 = scmp.lt.s32.totalorder %s1854_s22, %s1854_s22 }
  0x16   :  { %p1861_p3 = por %p1860_p2, %p1859_p1 }
  0x18   :  { %p1862_p4 = pnand %p1861_p3, %p1855_p0 }
  0x1a   :  { %1713 = vmatmul.mubr.msk.bf16.gmra.mrb[8].mxu0 %vm104_vm0, %v1753_v7 }
  0x1b   :  { %1716 = vmatprep.mubr.msk.bf16.mxu0 %vm104_vm0, %v1754_v8 }
  0x22   :  { %1717 = vmatmul.mubr.msk.bf16.gmra.mrb[12].mxu0 %vm104_vm0, %v1755_v9 }
  0xdd   :  { %v1706_v13 = vpop.f32.mrb[0].mxu0 }
  0xde   :  { %v172_v14 = vadd.f32 %v1706_v13, %v1571_v12  ;;  %v163_v15 = vpop.f32.mrb[1].mxu0 }
  0xdf   :  { %v164_v16 = vadd.f32 %v1571_v12, %v163_v15  ;;  %v1707_v17 = vpop.f32.mrb[2].mxu0 }
  0xe0   :  { %v175_v18 = vadd.f32 %v1707_v17, %v1571_v12  ;;  %v166_v19 = vpop.f32.mrb[3].mxu0  ;;  %v228_v21 = vmax.f32 %v172_v14, 0.0 }
  0xe1   :  { %v167_v20 = vadd.f32 %v1571_v12, %v166_v19  ;;  %v226_v23 = vmax.f32 %v164_v16, 0.0 }
  0xe2   :  { %v229_v22 = vmax.f32 %v175_v18, 0.0 }
  0xe3   :  { %v227_v24 = vmax.f32 %v167_v20, 0.0 }
  0xe4   :  { %v243_v25 = vpack.c.bf16 %v229_v22, %v228_v21 }
  0xe5   :  { %v1710_v26 = vpop.f32.mrb[4].mxu0  ;;  %v242_v27 = vpack.c.bf16 %v227_v24, %v226_v23 }
  0xe6   :  { %v188_v28 = vadd.f32 %v1710_v26, %v1571_v12  ;;  %v179_v29 = vpop.f32.mrb[5].mxu0 }
  0xe7   :  { %v180_v30 = vadd.f32 %v1571_v12, %v179_v29  ;;  %v1711_v31 = vpop.f32.mrb[6].mxu0  ;;  %1724 = vmatprep.mubr.msk.bf16.mxu1 %vm104_vm0, %v242_v27 }
  0xe8   :  { %v232_v32 = vmax.f32 %v188_v28, 0.0  ;;  %v191_v33 = vadd.f32 %v1711_v31, %v1571_v12  ;;  %v182_v34 = vpop.f32.mrb[7].mxu0  ;;  %1725 = vmatmul.mubr.msk.bf16.vlgmr.msra.gmra.mrb[0].mxu1 %vm104_vm0, %v243_v25 }
  0xe9   :  { %v230_v35 = vmax.f32 %v180_v30, 0.0  ;;  %v183_v36 = vadd.f32 %v1571_v12, %v182_v34 }
  0xea   :  { %v233_v37 = vmax.f32 %v191_v33, 0.0 }
  0xeb   :  { %v231_v38 = vmax.f32 %v183_v36, 0.0 }
  0xec   :  { %v245_v39 = vpack.c.bf16 %v233_v37, %v232_v32 }
  0xed   :  { %v244_v40 = vpack.c.bf16 %v231_v38, %v230_v35  ;;  %v1714_v41 = vpop.f32.mrb[8].mxu0 }
  0xee   :  { %v204_v42 = vadd.f32 %v1714_v41, %v1571_v12  ;;  %v195_v43 = vpop.f32.mrb[9].mxu0 }
  0xef   :  { %v196_v44 = vadd.f32 %v1571_v12, %v195_v43  ;;  %v1715_v45 = vpop.f32.mrb[10].mxu0  ;;  %1728 = vmatprep.mubr.msk.bf16.mxu1 %vm104_vm0, %v244_v40 }
  0xf0   :  { %v236_v46 = vmax.f32 %v204_v42, 0.0  ;;  %v207_v47 = vadd.f32 %v1715_v45, %v1571_v12  ;;  %v198_v48 = vpop.f32.mrb[11].mxu0  ;;  %1729 = vmatmul.mubr.msk.bf16.gmra.mrb[4].mxu1 %vm104_vm0, %v245_v39 }
  0xf1   :  { %v234_v49 = vmax.f32 %v196_v44, 0.0  ;;  %v199_v50 = vadd.f32 %v1571_v12, %v198_v48 }
  0xf2   :  { %v237_v51 = vmax.f32 %v207_v47, 0.0 }
  0xf3   :  { %v235_v52 = vmax.f32 %v199_v50, 0.0 }
  0xf4   :  { %v247_v53 = vpack.c.bf16 %v237_v51, %v236_v46 }
  0xf5   :  { %v246_v54 = vpack.c.bf16 %v235_v52, %v234_v49  ;;  %v1718_v55 = vpop.f32.mrb[12].mxu0 }
  0xf6   :  { %v220_v56 = vadd.f32 %v1718_v55, %v1571_v12  ;;  %v211_v57 = vpop.f32.mrb[13].mxu0 }
  0xf7   :  { %v212_v58 = vadd.f32 %v1571_v12, %v211_v57  ;;  %v1719_v59 = vpop.f32.mrb[14].mxu0  ;;  %1732 = vmatprep.mubr.msk.bf16.mxu1 %vm104_vm0, %v246_v54 }
  0xf8   :  { %v240_v60 = vmax.f32 %v220_v56, 0.0  ;;  %v223_v61 = vadd.f32 %v1719_v59, %v1571_v12  ;;  %v214_v62 = vpop.f32.mrb[15].mxu0  ;;  %1733 = vmatmul.mubr.msk.bf16.gmra.mrb[8].mxu1 %vm104_vm0, %v247_v53 }
  0xf9   :  { %v238_v63 = vmax.f32 %v212_v58, 0.0  ;;  %v215_v0 = vadd.f32 %v1571_v12, %v214_v62 }
  0xfa   :  { %v241_v1 = vmax.f32 %v223_v61, 0.0 }
  0xfb   :  { %v239_v2 = vmax.f32 %v215_v0, 0.0 }
  0xfc   :  { %v249_v3 = vpack.c.bf16 %v241_v1, %v240_v60 }
  0xfd   :  { %v248_v4 = vpack.c.bf16 %v239_v2, %v238_v63 }
  0xff   :  { %1736 = vmatprep.mubr.msk.bf16.mxu1 %vm104_vm0, %v248_v4 }
 0x100   :  { %1737 = vmatmul.mubr.msk.bf16.gmra.mrb[12].mxu1 %vm104_vm0, %v249_v3 }
 0x1bb   :  { %v1726_v6 = vpop.f32.mrb[0].mxu1 }
 0x1bc   :  { %v340_v7 = vadd.f32 %v1726_v6, %v1590_v5  ;;  %v331_v8 = vpop.f32.mrb[1].mxu1 }
 0x1bd   :  { %v332_v9 = vadd.f32 %v1590_v5, %v331_v8  ;;  %v1727_v10 = vpop.f32.mrb[2].mxu1 }
 0x1be   :  { %398 = vmax.xlane.f32.xlu1 %v340_v7  ;;  %v334_v11 = vpop.f32.mrb[3].mxu1  ;;  %v343_v12 = vadd.f32 %v1727_v10, %v1590_v5 }
 0x1bf   :  { %394 = vmax.xlane.f32.xlu0 %v332_v9  ;;  %v335_v13 = vadd.f32 %v1590_v5, %v334_v11 }
 0x1c2   :  { %400 = vmax.xlane.f32.xlu1 %v343_v12 }
 0x1c3   :  { %v1730_v14 = vpop.f32.mrb[4].mxu1  ;;  %396 = vmax.xlane.f32.xlu0 %v335_v13 }
 0x1c4   :  { %v347_v15 = vpop.f32.mrb[5].mxu1  ;;  %v356_v19 = vadd.f32 %v1730_v14, %v1590_v5 }
 0x1c5   :  { %v348_v16 = vadd.f32 %v1590_v5, %v347_v15  ;;  %v1731_v17 = vpop.f32.mrb[6].mxu1 }
 0x1c6   :  { %v350_v18 = vpop.f32.mrb[7].mxu1  ;;  %v359_v21 = vadd.f32 %v1731_v17, %v1590_v5 }
 0x1c7   :  { %v351_v20 = vadd.f32 %v1590_v5, %v350_v18  ;;  %402 = vmax.xlane.f32.xlu0 %v348_v16 }
 0x1c9   :  { %404 = vmax.xlane.f32.xlu1 %v351_v20 }
 0x1cb   :  { %v1734_v22 = vpop.f32.mrb[8].mxu1  ;;  %406 = vmax.xlane.f32.xlu0 %v356_v19 }
 0x1cc   :  { %v363_v23 = vpop.f32.mrb[9].mxu1  ;;  %v2001_v27 = vadd.f32 %v1734_v22, %v1590_v5 }
 0x1cd   :  { %v364_v24 = vadd.f32 %v1590_v5, %v363_v23  ;;  %v1735_v25 = vpop.f32.mrb[10].mxu1  ;;  %408 = vmax.xlane.f32.xlu1 %v359_v21 }
 0x1ce   :  { %v366_v26 = vpop.f32.mrb[11].mxu1  ;;  %v2005_v29 = vadd.f32 %v1735_v25, %v1590_v5 }
 0x1cf   :  { %v2003_v28 = vadd.f32 %v1590_v5, %v366_v26  ;;  %410 = vmax.xlane.f32.xlu0 %v364_v24 }
 0x1d1   :  { %412 = vmax.xlane.f32.xlu1 %v2003_v28 }
 0x1d3   :  { %v1738_v30 = vpop.f32.mrb[12].mxu1  ;;  %414 = vmax.xlane.f32.xlu0 %v2001_v27 }
 0x1d4   :  { %v379_v31 = vpop.f32.mrb[13].mxu1  ;;  %v2012_v35 = vadd.f32 %v1738_v30, %v1590_v5 }
 0x1d5   :  { %v2009_v32 = vadd.f32 %v1590_v5, %v379_v31  ;;  %v1739_v33 = vpop.f32.mrb[14].mxu1  ;;  %416 = vmax.xlane.f32.xlu1 %v2005_v29 }
 0x1d6   :  { %v382_v34 = vpop.f32.mrb[15].mxu1  ;;  %v2017_v37 = vadd.f32 %v1739_v33, %v1590_v5 }
 0x1d7   :  { %v2014_v36 = vadd.f32 %v1590_v5, %v382_v34  ;;  %418 = vmax.xlane.f32.xlu0 %v2009_v32 }
 0x1d9   :  { %420 = vmax.xlane.f32.xlu1 %v2014_v36 }
 0x1db   :  { %422 = vmax.xlane.f32.xlu0 %v2012_v35 }
 0x1dd   :  { %424 = vmax.xlane.f32.xlu1 %v2017_v37 }
 0x24b   :  { %v399_v38 = vpop.xlane.xlu1 %398 }
 0x24c   :  { %v428_v39 = vsub.f32 %v340_v7, %v399_v38  ;;  %v395_v40 = vpop.xlane.xlu0 %394 }
 0x24d   :  { %v426_v41 = vsub.f32 %v332_v9, %v395_v40 }
 0x24e   :  { %v446_v44 = vmul.f32 1.442695, %v428_v39 }
 0x24f   :  { %v442_v42 = vmul.f32 1.442695, %v426_v41  ;;  %v401_v43 = vpop.xlane.xlu1 %400 }
 0x250   :  { %v429_v45 = vsub.f32 %v343_v12, %v401_v43  ;;  %v397_v46 = vpop.xlane.xlu0 %396  ;;  %v666_v43 = vlaneseq }
 0x251   :  { %1758 = vpow2.f32 %v442_v42  ;;  %v427_v47 = vsub.f32 %v335_v13, %v397_v46 }
 0x252   :  { %1760 = vpow2.f32 %v446_v44  ;;  %v448_v49 = vmul.f32 1.442695, %v429_v45 }
 0x253   :  { %v444_v48 = vmul.f32 1.442695, %v427_v47 }
 0x254   :  { %v403_v50 = vpop.xlane.xlu0 %402 }
 0x255   :  { %1762 = vpow2.f32 %v444_v48  ;;  %v430_v51 = vsub.f32 %v348_v16, %v403_v50 }
 0x256   :  { %v405_v52 = vpop.xlane.xlu1 %404  ;;  %1764 = vpow2.f32 %v448_v49  ;;  %v2077_v49 = vand.u32 127, %v666_v43 }
 0x257   :  { %v450_v53 = vmul.f32 1.442695, %v430_v51  ;;  %v431_v54 = vsub.f32 %v351_v20, %v405_v52 }
 0x258   :  { %v407_v55 = vpop.xlane.xlu0 %406 }
 0x259   :  { %1766 = vpow2.f32 %v450_v53  ;;  %v452_v56 = vmul.f32 1.442695, %v431_v54  ;;  %v432_v57 = vsub.f32 %v356_v19, %v407_v55 }
 0x25a   :  { %v409_v58 = vpop.xlane.xlu1 %408 }
 0x25b   :  { %v2022_v59 = vpop.eup %1758  ;;  %v454_v60 = vmul.f32 1.442695, %v432_v57  ;;  %v433_v61 = vsub.f32 %v359_v21, %v409_v58  ;;  %1768 = vpow2.f32 %v452_v56 }
 0x25c   :  { %474 = vadd.xlane.f32.xlu0 %v2022_v59  ;;  %v411_v62 = vpop.xlane.xlu0 %410  ;;  %v2025_v1 = vpop.eup %1760 }
 0x25d   :  { %1770 = vpow2.f32 %v454_v60  ;;  %v456_v63 = vmul.f32 1.442695, %v433_v61  ;;  %v434_v0 = vsub.f32 %v364_v24, %v411_v62  ;;  %v2081_v60 = vsub.s32 127, %v2077_v49 }
 0x25e   :  { %v413_v2 = vpop.xlane.xlu1 %412 }
 0x25f   :  { %v2027_v3 = vpop.eup %1762  ;;  %v458_v4 = vmul.f32 1.442695, %v434_v0  ;;  %v435_v5 = vsub.f32 %v2003_v28, %v413_v2  ;;  %1772 = vpow2.f32 %v456_v63 }
 0x260   :  { %478 = vadd.xlane.f32.xlu0 %v2025_v1  ;;  %476 = vadd.xlane.f32.xlu1 %v2027_v3  ;;  %v415_v6 = vpop.xlane.xlu0 %414  ;;  %v2033_v9 = vpop.eup %1764 }
 0x261   :  { %1774 = vpow2.f32 %v458_v4  ;;  %v460_v7 = vmul.f32 1.442695, %v435_v5  ;;  %v436_v8 = vsub.f32 %v2001_v27, %v415_v6 }
 0x262   :  { %v417_v10 = vpop.xlane.xlu1 %416 }
 0x263   :  { %v2035_v11 = vpop.eup %1766  ;;  %v462_v12 = vmul.f32 1.442695, %v436_v8  ;;  %v437_v13 = vsub.f32 %v2005_v29, %v417_v10  ;;  %1776 = vpow2.f32 %v460_v7 }
 0x264   :  { %480 = vadd.xlane.f32.xlu1 %v2033_v9  ;;  %482 = vadd.xlane.f32.xlu0 %v2035_v11  ;;  %v419_v14 = vpop.xlane.xlu0 %418 }
 0x265   :  { %1778 = vpow2.f32 %v462_v12  ;;  %v464_v15 = vmul.f32 1.442695, %v437_v13  ;;  %v438_v16 = vsub.f32 %v2009_v32, %v419_v14  ;;  %v2041_v17 = vpop.eup %1768 }
 0x266   :  { %v421_v18 = vpop.xlane.xlu1 %420 }
 0x267   :  { %v2043_v19 = vpop.eup %1770  ;;  %v466_v20 = vmul.f32 1.442695, %v438_v16  ;;  %v439_v21 = vsub.f32 %v2014_v36, %v421_v18  ;;  %1780 = vpow2.f32 %v464_v15 }
 0x268   :  { %484 = vadd.xlane.f32.xlu1 %v2041_v17  ;;  %486 = vadd.xlane.f32.xlu0 %v2043_v19  ;;  %v423_v22 = vpop.xlane.xlu0 %422 }
 0x269   :  { %1782 = vpow2.f32 %v466_v20  ;;  %v468_v23 = vmul.f32 1.442695, %v439_v21  ;;  %v440_v24 = vsub.f32 %v2012_v35, %v423_v22  ;;  %v2049_v25 = vpop.eup %1772 }
 0x26a   :  { %v425_v26 = vpop.xlane.xlu1 %424 }
 0x26b   :  { %v2051_v27 = vpop.eup %1774  ;;  %v470_v28 = vmul.f32 1.442695, %v440_v24  ;;  %v441_v29 = vsub.f32 %v2017_v37, %v425_v26  ;;  %1784 = vpow2.f32 %v468_v23 }
 0x26c   :  { %488 = vadd.xlane.f32.xlu1 %v2049_v25  ;;  %490 = vadd.xlane.f32.xlu0 %v2051_v27 }
 0x26d   :  { %1786 = vpow2.f32 %v470_v28  ;;  %v472_v30 = vmul.f32 1.442695, %v441_v29  ;;  %v2056_v31 = vpop.eup %1776 }
 0x26f   :  { %v2058_v32 = vpop.eup %1778  ;;  %1788 = vpow2.f32 %v472_v30 }
 0x270   :  { %492 = vadd.xlane.f32.xlu1 %v2056_v31  ;;  %494 = vadd.xlane.f32.xlu0 %v2058_v32 }
 0x271   :  { %v2062_v33 = vpop.eup %1780 }
 0x273   :  { %v2064_v34 = vpop.eup %1782 }
 0x274   :  { %496 = vadd.xlane.f32.xlu1 %v2062_v33  ;;  %498 = vadd.xlane.f32.xlu0 %v2064_v34 }
 0x275   :  { %v2068_v35 = vpop.eup %1784 }
 0x277   :  { %v2070_v36 = vpop.eup %1786 }
 0x278   :  { %500 = vadd.xlane.f32.xlu1 %v2068_v35  ;;  %502 = vadd.xlane.f32.xlu0 %v2070_v36 }
 0x279   :  { %v2074_v37 = vpop.eup %1788 }
 0x27c   :  { %504 = vadd.xlane.f32.xlu1 %v2074_v37 }
 0x2e9   :  { %v475_v38 = vpop.xlane.xlu0 %474 }
 0x2ea   :  { %1790 = vrcp.f32 %v475_v38 }
 0x2ed   :  { %v477_v39 = vpop.xlane.xlu1 %476  ;;  %v479_v40 = vpop.xlane.xlu0 %478 }
 0x2ee   :  { %1792 = vrcp.f32 %v477_v39 }
 0x2ef   :  { %1794 = vrcp.f32 %v479_v40 }
 0x2f1   :  { %v481_v41 = vpop.xlane.xlu1 %480  ;;  %v483_v42 = vpop.xlane.xlu0 %482 }
 0x2f2   :  { %1796 = vrcp.f32 %v481_v41 }
 0x2f3   :  { %1798 = vrcp.f32 %v483_v42 }
 0x2f4   :  { %v1791_v44 = vpop.eup %1790 }
 0x2f5   :  { %v522_v45 = vmul.f32 %v1791_v44, %v475_v38  ;;  %v485_v46 = vpop.xlane.xlu1 %484  ;;  %v487_v47 = vpop.xlane.xlu0 %486 }
 0x2f6   :  { %1800 = vrcp.f32 %v485_v46 }
 0x2f7   :  { %v538_v48 = vsub.f32 2.0, %v522_v45  ;;  %1802 = vrcp.f32 %v487_v47 }
 0x2f8   :  { %v1793_v50 = vpop.eup %1792 }
 0x2f9   :  { %v1795_v51 = vpop.eup %1794  ;;  %v554_v52 = vmul.f32 %v1791_v44, %v538_v48  ;;  %v523_v53 = vmul.f32 %v1793_v50, %v477_v39  ;;  %v489_v54 = vpop.xlane.xlu1 %488 }
 0x2fa   :  { %v491_v55 = vpop.xlane.xlu0 %490  ;;  %v524_v56 = vmul.f32 %v1795_v51, %v479_v40  ;;  %1804 = vrcp.f32 %v489_v54 }
 0x2fb   :  { %v570_v57 = vmul.f32 %v2022_v59, %v554_v52  ;;  %v539_v58 = vsub.f32 2.0, %v523_v53  ;;  %1806 = vrcp.f32 %v491_v55 }
 0x2fc   :  { %v1797_v61 = vpop.eup %1796  ;;  %v540_v62 = vsub.f32 2.0, %v524_v56 }
 0x2fd   :  { %v1799_v63 = vpop.eup %1798  ;;  %v684_v0 = vand.u32 4294967168, %v570_v57  ;;  %v555_v2 = vmul.f32 %v1793_v50, %v539_v58  ;;  %v525_v4 = vmul.f32 %v1797_v61, %v481_v41  ;;  %v493_v5 = vpop.xlane.xlu1 %492 }
 0x2fe   :  { %v495_v6 = vpop.xlane.xlu0 %494  ;;  %v556_v7 = vmul.f32 %v1795_v51, %v540_v62  ;;  %v526_v8 = vmul.f32 %v1799_v63, %v483_v42  ;;  %1808 = vrcp.f32 %v493_v5 }
 0x2ff   :  { %v571_v10 = vmul.f32 %v2027_v3, %v555_v2  ;;  %v541_v12 = vsub.f32 2.0, %v525_v4  ;;  %1810 = vrcp.f32 %v495_v6  ;;  %v2085_v59 = vor.u32 %v2081_v60, %v684_v0 }
 0x300   :  { %v1801_v13 = vpop.eup %1800  ;;  %v572_v14 = vmul.f32 %v2025_v1, %v556_v7  ;;  %v542_v15 = vsub.f32 2.0, %v526_v8 }
 0x301   :  { %v1803_v16 = vpop.eup %1802  ;;  %v1636_v18 = vpack.c.bf16 %v571_v10, %v570_v57  ;;  %v685_v20 = vand.u32 4294967168, %v571_v10  ;;  %v557_v21 = vmul.f32 %v1797_v61, %v541_v12  ;;  %v527_v22 = vmul.f32 %v1801_v13, %v485_v46  ;;  %v2088_v23 = vpop.xlane.xlu1 %496 }
 0x302   :  { %v2090_v24 = vpop.xlane.xlu0 %498  ;;  %v686_v26 = vand.u32 4294967168, %v572_v14  ;;  %v558_v3 = vmul.f32 %v1799_v63, %v542_v15  ;;  %v528_v28 = vmul.f32 %v1803_v16, %v487_v47  ;;  %1812 = vrcp.f32 %v2088_v23 }
 0x303   :  { %1637 = vst [vmem:[#allocation2] sm:$0xff] %v1636_v18   ;;  %v573_v29 = vmul.f32 %v2033_v9, %v557_v21  ;;  %v543_v30 = vsub.f32 2.0, %v527_v22  ;;  %1814 = vrcp.f32 %v2090_v24  ;;  %v718_v1 = vshra.s32 %v2085_v59, 16 }
 0x304   :  { %v1805_v38 = vpop.eup %1804  ;;  %v574_v39 = vmul.f32 %v2035_v11, %v558_v3  ;;  %v544_v40 = vsub.f32 2.0, %v528_v28  ;;  %v2098_v41 = vor.u32 %v2081_v60, %v685_v20  ;;  %v2101_v42 = vor.u32 %v2081_v60, %v686_v26 }
 0x305   :  { %v1807_v43 = vpop.eup %1806  ;;  %v1641_v44 = vpack.c.bf16 %v573_v29, %v572_v14  ;;  %v687_v45 = vand.u32 4294967168, %v573_v29  ;;  %v559_v46 = vmul.f32 %v1801_v13, %v543_v30  ;;  %v529_v9 = vmul.f32 %v1805_v38, %v489_v54  ;;  %v501_v47 = vpop.xlane.xlu1 %500 }
 0x306   :  { %v2103_v48 = vpop.xlane.xlu0 %502  ;;  %v688_v50 = vand.u32 4294967168, %v574_v39  ;;  %v560_v51 = vmul.f32 %v1803_v16, %v544_v40  ;;  %v530_v52 = vmul.f32 %v1807_v43, %v491_v55  ;;  %1816 = vrcp.f32 %v501_v47 }
 0x307   :  { %1673 = vst [vmem:[#allocation2 + $0x8] sm:$0xff] %v1641_v44   ;;  %v575_v11 = vmul.f32 %v2041_v17, %v559_v46  ;;  %v545_v53 = vsub.f32 2.0, %v529_v9  ;;  %v2106_v56 = vcvt.s32.f32 %v718_v1  ;;  %1818 = vrcp.f32 %v2103_v48 }
 0x308   :  { %v1809_v57 = vpop.eup %1808  ;;  %v576_v58 = vmul.f32 %v2043_v19, %v560_v51  ;;  %v546_v61 = vsub.f32 2.0, %v530_v52  ;;  %v732_v54 = vshra.s32 %v2098_v41, 16  ;;  %v746_v62 = vshra.s32 %v2101_v42, 16 }
 0x309   :  { %v1811_v63 = vpop.eup %1810  ;;  %v1646_v0 = vpack.c.bf16 %v575_v11, %v574_v39  ;;  %v689_v55 = vand.u32 4294967168, %v575_v11  ;;  %v561_v2 = vmul.f32 %v1805_v38, %v545_v53  ;;  %v531_v4 = vmul.f32 %v1809_v57, %v493_v5  ;;  %721 = vmax.xlane.f32.xlu0 %v2106_v56  ;;  %v2113_v17 = vpop.xlane.xlu1 %504 }
 0x30a   :  { %v690_v7 = vand.u32 4294967168, %v576_v58  ;;  %v562_v8 = vmul.f32 %v1807_v43, %v546_v61  ;;  %v532_v10 = vmul.f32 %v1811_v63, %v495_v6  ;;  %v2115_v12 = vcvt.s32.f32 %v732_v54 }
 0x30b   :  { %1674 = vst [vmem:[#allocation2 + $0x10] sm:$0xff] %v1646_v0   ;;  %v577_v19 = vmul.f32 %v2049_v25, %v561_v2  ;;  %v547_v13 = vsub.f32 2.0, %v531_v4  ;;  %1820 = vrcp.f32 %v2113_v17  ;;  %v2119_v14 = vcvt.s32.f32 %v746_v62 }
 0x30c   :  { %v1813_v15 = vpop.eup %1812  ;;  %v578_v5 = vmul.f32 %v2051_v27, %v562_v8  ;;  %v548_v16 = vsub.f32 2.0, %v532_v10  ;;  %735 = vmax.xlane.f32.xlu1 %v2115_v12  ;;  %v2124_v18 = vor.u32 %v2081_v60, %v687_v45  ;;  %v2127_v6 = vor.u32 %v2081_v60, %v688_v50 }
 0x30d   :  { %v1815_v20 = vpop.eup %1814  ;;  %v1651_v21 = vpack.c.bf16 %v577_v19, %v576_v58  ;;  %v691_v25 = vand.u32 4294967168, %v577_v19  ;;  %v563_v22 = vmul.f32 %v1809_v57, %v547_v13  ;;  %v533_v26 = vmul.f32 %v1813_v15, %v2088_v23  ;;  %749 = vmax.xlane.f32.xlu0 %v2119_v14 }
 0x30e   :  { %v692_v3 = vand.u32 4294967168, %v578_v5  ;;  %v564_v28 = vmul.f32 %v1811_v63, %v548_v16  ;;  %v534_v27 = vmul.f32 %v1815_v20, %v2090_v24  ;;  %v760_v29 = vshra.s32 %v2124_v18, 16 }
 0x30f   :  { %1675 = vst [vmem:[#allocation2 + $0x18] sm:$0xff] %v1651_v21   ;;  %v579_v30 = vmul.f32 %v2056_v31, %v563_v22  ;;  %v549_v1 = vsub.f32 2.0, %v533_v26  ;;  %v774_v38 = vshra.s32 %v2127_v6, 16  ;;  %v2136_v39 = vor.u32 %v2081_v60, %v689_v55 }
 0x310   :  { %v1817_v40 = vpop.eup %1816  ;;  %v580_v23 = vmul.f32 %v2058_v32, %v564_v28  ;;  %v550_v43 = vsub.f32 2.0, %v534_v27  ;;  %v2139_v44 = vcvt.s32.f32 %v760_v29  ;;  %v2142_v45 = vor.u32 %v2081_v60, %v690_v7 }
 0x311   :  { %v1819_v24 = vpop.eup %1818  ;;  %v1656_v46 = vpack.c.bf16 %v579_v30, %v578_v5  ;;  %v693_v9 = vand.u32 4294967168, %v579_v30  ;;  %v565_v50 = vmul.f32 %v1813_v15, %v549_v1  ;;  %v535_v31 = vmul.f32 %v1817_v40, %v501_v47 }
 0x312   :  { %v694_v51 = vand.u32 4294967168, %v580_v23  ;;  %v566_v52 = vmul.f32 %v1815_v20, %v550_v43  ;;  %v536_v11 = vmul.f32 %v1819_v24, %v2103_v48  ;;  %763 = vmax.xlane.f32.xlu1 %v2139_v44  ;;  %v2146_v53 = vcvt.s32.f32 %v774_v38 }
 0x313   :  { %1676 = vst [vmem:[#allocation2 + $0x20] sm:$0xff] %v1656_v46   ;;  %v581_v32 = vmul.f32 %v2062_v33, %v565_v50  ;;  %v551_v57 = vsub.f32 2.0, %v535_v31  ;;  %v788_v58 = vshra.s32 %v2136_v39, 16  ;;  %v802_v61 = vshra.s32 %v2142_v45, 16 }
 0x314   :  { %v582_v54 = vmul.f32 %v2064_v34, %v566_v52  ;;  %v552_v62 = vsub.f32 2.0, %v536_v11  ;;  %777 = vmax.xlane.f32.xlu0 %v2146_v53  ;;  %v2154_v47 = vor.u32 %v2081_v60, %v691_v25  ;;  %v2157_v48 = vor.u32 %v2081_v60, %v692_v3 }
 0x315   :  { %v1821_v63 = vpop.eup %1820  ;;  %v1661_v0 = vpack.c.bf16 %v581_v32, %v580_v23  ;;  %v695_v55 = vand.u32 4294967168, %v581_v32  ;;  %v567_v33 = vmul.f32 %v1817_v40, %v551_v57  ;;  %v2159_v2 = vcvt.s32.f32 %v788_v58 }
 0x316   :  { %v696_v4 = vand.u32 4294967168, %v582_v54  ;;  %v568_v7 = vmul.f32 %v1819_v24, %v552_v62  ;;  %v537_v8 = vmul.f32 %v1821_v63, %v2113_v17  ;;  %v2162_v34 = vcvt.s32.f32 %v802_v61 }
 0x317   :  { %1677 = vst [vmem:[#allocation2 + $0x28] sm:$0xff] %v1661_v0   ;;  %v583_v10 = vmul.f32 %v2068_v35, %v567_v33  ;;  %791 = vmax.xlane.f32.xlu1 %v2159_v2  ;;  %v816_v19 = vshra.s32 %v2154_v47, 16  ;;  %v830_v13 = vshra.s32 %v2157_v48, 16  ;;  %v2169_v15 = vor.u32 %v2081_v60, %v693_v9 }
 0x318   :  { %v584_v5 = vmul.f32 %v2070_v36, %v568_v7  ;;  %v553_v16 = vsub.f32 2.0, %v537_v8  ;;  %805 = vmax.xlane.f32.xlu0 %v2162_v34  ;;  %v2174_v17 = vor.u32 %v2081_v60, %v694_v51  ;;  %v2177_v20 = vor.u32 %v2081_v60, %v695_v55 }
 0x319   :  { %v1666_v35 = vpack.c.bf16 %v583_v10, %v582_v54  ;;  %v697_v21 = vand.u32 4294967168, %v583_v10  ;;  %v2179_v25 = vcvt.s32.f32 %v816_v19  ;;  %v2181_v22 = vcvt.s32.f32 %v830_v13 }
 0x31a   :  { %v698_v26 = vand.u32 4294967168, %v584_v5  ;;  %v569_v3 = vmul.f32 %v1821_v63, %v553_v16  ;;  %v844_v28 = vshra.s32 %v2169_v15, 16  ;;  %v858_v36 = vshra.s32 %v2174_v17, 16 }
 0x31b   :  { %1678 = vst [vmem:[#allocation2 + $0x30] sm:$0xff] %v1666_v35   ;;  %819 = vmax.xlane.f32.xlu1 %v2179_v25  ;;  %v872_v27 = vshra.s32 %v2177_v20, 16  ;;  %v2188_v29 = vor.u32 %v2081_v60, %v696_v4  ;;  %v2191_v30 = vor.u32 %v2081_v60, %v697_v21  ;;  %v731_v58 = vand.u32 65535, %v2098_v41 }
 0x31c   :  { %v585_v1 = vmul.f32 %v2074_v37, %v569_v3  ;;  %833 = vmax.xlane.f32.xlu0 %v2181_v22  ;;  %v2195_v38 = vcvt.s32.f32 %v844_v28  ;;  %v2197_v40 = vcvt.s32.f32 %v858_v36  ;;  %v2200_v23 = vor.u32 %v2081_v60, %v698_v26 }
 0x31d   :  { %v886_v43 = vshra.s32 %v2188_v29, 16  ;;  %v2204_v9 = vcvt.s32.f32 %v872_v27  ;;  %v900_v50 = vshra.s32 %v2191_v30, 16  ;;  %v745_v62 = vand.u32 65535, %v2101_v42 }
 0x31e   :  { %v1671_v24 = vpack.c.bf16 %v585_v1, %v584_v5  ;;  %v699_v46 = vand.u32 4294967168, %v585_v1  ;;  %v914_v31 = vshra.s32 %v2200_v23, 16  ;;  %v733_v55 = vcvt.s32.f32 %v731_v58 }
 0x31f   :  { %847 = vmax.xlane.f32.xlu1 %v2195_v38  ;;  %v2208_v37 = vcvt.s32.f32 %v886_v43  ;;  %v2215_v52 = vcvt.s32.f32 %v900_v50  ;;  %v747_v4 = vcvt.s32.f32 %v745_v62  ;;  %v759_v8 = vand.u32 65535, %v2124_v18 }
 0x320   :  { %1679 = vst [vmem:[#allocation2 + $0x38] sm:$0xff] %v1671_v24   ;;  %861 = vmax.xlane.f32.xlu0 %v2197_v40  ;;  %v2212_v51 = vor.u32 %v2081_v60, %v699_v46  ;;  %v2219_v32 = vcvt.s32.f32 %v914_v31  ;;  %v717_v60 = vand.u32 65535, %v2085_v59  ;;  %v815_v28 = vand.u32 65535, %v2154_v47 }
 0x321   :  { %v761_v13 = vcvt.s32.f32 %v759_v8  ;;  %v829_v27 = vand.u32 65535, %v2157_v48  ;;  %v843_v46 = vand.u32 65535, %v2169_v15  ;;  %v857_v31 = vand.u32 65535, %v2174_v17 }
 0x322   :  { %v928_v11 = vshra.s32 %v2212_v51, 16  ;;  %v719_v54 = vcvt.s32.f32 %v717_v60  ;;  %v817_v24 = vcvt.s32.f32 %v815_v28  ;;  %v899_v8 = vand.u32 65535, %v2191_v30 }
 0x323   :  { %875 = vmax.xlane.f32.xlu1 %v2204_v9  ;;  %v845_v58 = vcvt.s32.f32 %v843_v46 }
 0x324   :  { %889 = vmax.xlane.f32.xlu0 %v2208_v37  ;;  %v2222_v57 = vcvt.s32.f32 %v928_v11 }
 0x327   :  { %903 = vmax.xlane.f32.xlu1 %v2215_v52 }
 0x328   :  { %917 = vmax.xlane.f32.xlu0 %v2219_v32 }
 0x32b   :  { %931 = vmax.xlane.f32.xlu1 %v2222_v57 }
 0x396   :  { %v2228_v61 = vpop.xlane.xlu0 %721 }
 0x397   :  { %vm723_vm1 = vcmp.eq.f32.partialorder %v2106_v56, %v2228_v61  ;;  %v773_v56 = vand.u32 65535, %v2127_v6 }
 0x398   :  { %v724_v63 = vsel %vm723_vm1, %v719_v54, -inf  ;;  %v871_v54 = vand.u32 65535, %v2177_v20 }
 0x399   :  { %725 = vmax.xlane.f32.xlu0 %v724_v63  ;;  %v2233_v0 = vpop.xlane.xlu1 %735  ;;  %v775_v35 = vcvt.s32.f32 %v773_v56  ;;  %v885_v63 = vand.u32 65535, %v2188_v29  ;;  %v913_v56 = vand.u32 65535, %v2200_v23 }
 0x39a   :  { %v2235_v33 = vpop.xlane.xlu0 %749  ;;  %vm737_vm2 = vcmp.eq.f32.partialorder %v2115_v12, %v2233_v0  ;;  %v787_v12 = vand.u32 65535, %v2136_v39 }
 0x39b   :  { %v738_v7 = vsel %vm737_vm2, %v733_v55, -inf  ;;  %vm751_vm3 = vcmp.eq.f32.partialorder %v2119_v14, %v2235_v33  ;;  %v801_v14 = vand.u32 65535, %v2142_v45 }
 0x39c   :  { %739 = vmax.xlane.f32.xlu1 %v738_v7  ;;  %v752_v10 = vsel %vm751_vm3, %v747_v4, -inf  ;;  %v789_v3 = vcvt.s32.f32 %v787_v12  ;;  %v873_v7 = vcvt.s32.f32 %v871_v54 }
 0x39d   :  { %753 = vmax.xlane.f32.xlu0 %v752_v10  ;;  %v803_v36 = vcvt.s32.f32 %v801_v14 }
 0x39f   :  { %v2243_v19 = vpop.xlane.xlu1 %763 }
 0x3a0   :  { %vm765_vm4 = vcmp.eq.f32.partialorder %v2139_v44, %v2243_v19 }
 0x3a1   :  { %v2248_v5 = vpop.xlane.xlu0 %777  ;;  %v766_v16 = vsel %vm765_vm4, %v761_v13, -inf }
 0x3a2   :  { %767 = vmax.xlane.f32.xlu1 %v766_v16  ;;  %vm779_vm5 = vcmp.eq.f32.partialorder %v2146_v53, %v2248_v5  ;;  %v901_v16 = vcvt.s32.f32 %v899_v8 }
 0x3a3   :  { %v780_v21 = vsel %vm779_vm5, %v775_v35, -inf  ;;  %v927_v35 = vand.u32 65535, %v2212_v51 }
 0x3a4   :  { %781 = vmax.xlane.f32.xlu0 %v780_v21  ;;  %v2253_v26 = vpop.xlane.xlu1 %791 }
 0x3a5   :  { %v2256_v44 = vpop.xlane.xlu0 %805  ;;  %vm793_vm6 = vcmp.eq.f32.partialorder %v2159_v2, %v2253_v26  ;;  %v831_v2 = vcvt.s32.f32 %v829_v27  ;;  %v929_v28 = vcvt.s32.f32 %v927_v35  ;;  %v728_v27 = vcvt.f32.s32 %v2228_v61 }
 0x3a6   :  { %v794_v1 = vsel %vm793_vm6, %v789_v3, -inf  ;;  %vm807_vm7 = vcmp.eq.f32.partialorder %v2162_v34, %v2256_v44 }
 0x3a7   :  { %795 = vmax.xlane.f32.xlu1 %v794_v1  ;;  %v808_v53 = vsel %vm807_vm7, %v803_v36, -inf }
 0x3a8   :  { %809 = vmax.xlane.f32.xlu0 %v808_v53  ;;  %v2263_v43 = vpop.xlane.xlu1 %819  ;;  %v729_v53 = vshll.u32 %v728_v27, 16 }
 0x3a9   :  { %v2266_v50 = vpop.xlane.xlu0 %833  ;;  %vm821_vm8 = vcmp.eq.f32.partialorder %v2179_v25, %v2263_v43  ;;  %v859_v25 = vcvt.s32.f32 %v857_v31 }
 0x3aa   :  { %v822_v11 = vsel %vm821_vm8, %v817_v24, -inf  ;;  %vm835_vm9 = vcmp.eq.f32.partialorder %v2181_v22, %v2266_v50  ;;  %v756_v24 = vcvt.f32.s32 %v2235_v33  ;;  %v784_v33 = vcvt.f32.s32 %v2248_v5 }
 0x3ab   :  { %823 = vmax.xlane.f32.xlu1 %v822_v11  ;;  %v836_v34 = vsel %vm835_vm9, %v831_v2, -inf  ;;  %v798_v5 = vcvt.f32.s32 %v2253_v26 }
 0x3ac   :  { %837 = vmax.xlane.f32.xlu0 %v836_v34  ;;  %v2273_v60 = vpop.xlane.xlu1 %847 }
 0x3ad   :  { %v2276_v62 = vpop.xlane.xlu0 %861  ;;  %vm849_vm10 = vcmp.eq.f32.partialorder %v2195_v38, %v2273_v60  ;;  %v887_v38 = vcvt.s32.f32 %v885_v63 }
 0x3ae   :  { %v850_v55 = vsel %vm849_vm10, %v845_v58, -inf  ;;  %vm863_vm11 = vcmp.eq.f32.partialorder %v2197_v40, %v2276_v62  ;;  %v757_v58 = vshll.u32 %v756_v24, 16 }
 0x3af   :  { %851 = vmax.xlane.f32.xlu1 %v850_v55  ;;  %v864_v22 = vsel %vm863_vm11, %v859_v25, -inf }
 0x3b0   :  { %865 = vmax.xlane.f32.xlu0 %v864_v22  ;;  %v2283_v4 = vpop.xlane.xlu1 %875 }
 0x3b1   :  { %v2286_v10 = vpop.xlane.xlu0 %889  ;;  %vm877_vm12 = vcmp.eq.f32.partialorder %v2204_v9, %v2283_v4  ;;  %v915_v9 = vcvt.s32.f32 %v913_v56 }
 0x3b2   :  { %v878_v13 = vsel %vm877_vm12, %v873_v7, -inf  ;;  %vm891_vm13 = vcmp.eq.f32.partialorder %v2208_v37, %v2286_v10 }
 0x3b3   :  { %879 = vmax.xlane.f32.xlu1 %v878_v13  ;;  %v892_v40 = vsel %vm891_vm13, %v887_v38, -inf }
 0x3b4   :  { %893 = vmax.xlane.f32.xlu0 %v892_v40  ;;  %v2293_v12 = vpop.xlane.xlu1 %903  ;;  %v812_v40 = vcvt.f32.s32 %v2256_v44 }
 0x3b5   :  { %v2296_v14 = vpop.xlane.xlu0 %917  ;;  %vm905_vm14 = vcmp.eq.f32.partialorder %v2215_v52, %v2293_v12  ;;  %v742_v52 = vcvt.f32.s32 %v2233_v0 }
 0x3b6   :  { %v906_v21 = vsel %vm905_vm14, %v901_v16, -inf  ;;  %vm919_vm15 = vcmp.eq.f32.partialorder %v2219_v32, %v2296_v14  ;;  %v813_v44 = vshll.u32 %v812_v40, 16 }
 0x3b7   :  { %907 = vmax.xlane.f32.xlu1 %v906_v21  ;;  %v920_v37 = vsel %vm919_vm15, %v915_v9, -inf  ;;  %v743_v31 = vshll.u32 %v742_v52, 16  ;;  %v826_v52 = vcvt.f32.s32 %v2263_v43  ;;  %v840_v43 = vcvt.f32.s32 %v2266_v50 }
 0x3b8   :  { %921 = vmax.xlane.f32.xlu0 %v920_v37  ;;  %v2302_v3 = vpop.xlane.xlu1 %931 }
 0x3b9   :  { %vm933_vm0 = vcmp.eq.f32.partialorder %v2222_v57, %v2302_v3  ;;  %v770_v57 = vcvt.f32.s32 %v2243_v19 }
 0x3ba   :  { %v934_v36 = vsel %vm933_vm0, %v929_v28, -inf }
 0x3bb   :  { %935 = vmax.xlane.f32.xlu1 %v934_v36  ;;  %v771_v7 = vshll.u32 %v770_v57, 16 }
 0x426   :  { %v726_v1 = vpop.xlane.xlu0 %725 }
 0x427   :  { %v727_v32 = vcvt.f32.s32 %v726_v1 }
 0x429   :  { %v2309_v46 = vadd.s32 %v729_v53, %v727_v32  ;;  %v740_v2 = vpop.xlane.xlu1 %739 }
 0x42a   :  { %v741_v11 = vcvt.f32.s32 %v740_v2  ;;  %v754_v34 = vpop.xlane.xlu0 %753 }
 0x42b   :  { %v755_v54 = vcvt.f32.s32 %v754_v34  ;;  %vm941_vm1 = vcmp.eq.s32.totalorder %v2085_v59, %v2309_v46 }
 0x42c   :  { %v2314_v61 = vadd.s32 %v743_v31, %v741_v11  ;;  %v2317_v0 = vsel %vm941_vm1, 2147483648, %v2085_v59  ;;  %v785_v59 = vshll.u32 %v784_v33, 16 }
 0x42d   :  { %v2320_v25 = vadd.s32 %v757_v58, %v755_v54  ;;  %v974_v63 = vshra.s32 %v2317_v0, 16  ;;  %v827_v58 = vshll.u32 %v826_v52, 16 }
 0x42e   :  { %vm942_vm2 = vcmp.eq.s32.totalorder %v2098_v41, %v2314_v61 }
 0x42f   :  { %v768_v55 = vpop.xlane.xlu1 %767  ;;  %v2325_v22 = vcvt.s32.f32 %v974_v63  ;;  %v2328_v19 = vsel %vm942_vm2, 2147483648, %v2098_v41  ;;  %vm943_vm3 = vcmp.eq.s32.totalorder %v2101_v42, %v2320_v25 }
 0x430   :  { %v769_v8 = vcvt.f32.s32 %v768_v55  ;;  %v988_v56 = vshra.s32 %v2328_v19, 16  ;;  %v2336_v13 = vsel %vm943_vm3, 2147483648, %v2101_v42  ;;  %v799_v42 = vshll.u32 %v798_v5, 16 }
 0x431   :  { %v782_v38 = vpop.xlane.xlu0 %781  ;;  %977 = vmax.xlane.f32.xlu0 %v2325_v22  ;;  %v1002_v35 = vshra.s32 %v2336_v13, 16  ;;  %v841_v55 = vshll.u32 %v840_v43, 16 }
 0x432   :  { %v2339_v16 = vadd.s32 %v771_v7, %v769_v8  ;;  %v783_v41 = vcvt.f32.s32 %v782_v38  ;;  %v2342_v9 = vcvt.s32.f32 %v988_v56  ;;  %v854_v7 = vcvt.f32.s32 %v2273_v60 }
 0x433   :  { %v2346_v37 = vcvt.s32.f32 %v1002_v35  ;;  %v868_v8 = vcvt.f32.s32 %v2276_v62  ;;  %v882_v35 = vcvt.f32.s32 %v2283_v4 }
 0x434   :  { %v2344_v21 = vadd.s32 %v785_v59, %v783_v41  ;;  %v796_v26 = vpop.xlane.xlu1 %795  ;;  %991 = vmax.xlane.f32.xlu1 %v2342_v9  ;;  %vm944_vm4 = vcmp.eq.s32.totalorder %v2124_v18, %v2339_v16 }
 0x435   :  { %v797_v28 = vcvt.f32.s32 %v796_v26  ;;  %v810_v36 = vpop.xlane.xlu0 %809  ;;  %1005 = vmax.xlane.f32.xlu0 %v2346_v37  ;;  %v2354_v1 = vsel %vm944_vm4, 2147483648, %v2124_v18  ;;  %v883_v52 = vshll.u32 %v882_v35, 16 }
 0x436   :  { %v811_v27 = vcvt.f32.s32 %v810_v36  ;;  %vm945_vm5 = vcmp.eq.s32.totalorder %v2127_v6, %v2344_v21  ;;  %v1016_v2 = vshra.s32 %v2354_v1, 16 }
 0x437   :  { %v2358_v53 = vadd.s32 %v799_v42, %v797_v28  ;;  %v2364_v34 = vsel %vm945_vm5, 2147483648, %v2127_v6  ;;  %v855_v28 = vshll.u32 %v854_v7, 16 }
 0x438   :  { %v2360_v24 = vadd.s32 %v813_v44, %v811_v27  ;;  %v824_v32 = vpop.xlane.xlu1 %823  ;;  %v2367_v18 = vcvt.s32.f32 %v1016_v2  ;;  %v1030_v54 = vshra.s32 %v2364_v34, 16  ;;  %v896_v44 = vcvt.f32.s32 %v2286_v10 }
 0x439   :  { %v825_v31 = vcvt.f32.s32 %v824_v32  ;;  %v838_v11 = vpop.xlane.xlu0 %837  ;;  %vm946_vm6 = vcmp.eq.s32.totalorder %v2136_v39, %v2358_v53  ;;  %v910_v10 = vcvt.f32.s32 %v2293_v12 }
 0x43a   :  { %v839_v57 = vcvt.f32.s32 %v838_v11  ;;  %vm947_vm7 = vcmp.eq.s32.totalorder %v2142_v45, %v2360_v24  ;;  %1019 = vmax.xlane.f32.xlu1 %v2367_v18  ;;  %v2377_v6 = vcvt.s32.f32 %v1030_v54  ;;  %v2383_v59 = vsel %vm946_vm6, 2147483648, %v2136_v39 }
 0x43b   :  { %v2374_v63 = vadd.s32 %v827_v58, %v825_v31  ;;  %v2386_v5 = vsel %vm947_vm7, 2147483648, %v2142_v45  ;;  %v1044_v56 = vshra.s32 %v2383_v59, 16  ;;  %v869_v45 = vshll.u32 %v868_v8, 16 }
 0x43c   :  { %v852_v33 = vpop.xlane.xlu1 %851  ;;  %1033 = vmax.xlane.f32.xlu0 %v2377_v6  ;;  %v2388_v38 = vadd.s32 %v841_v55, %v839_v57  ;;  %v1058_v40 = vshra.s32 %v2386_v5, 16  ;;  %v924_v11 = vcvt.f32.s32 %v2296_v14  ;;  %v938_v55 = vcvt.f32.s32 %v2302_v3 }
 0x43d   :  { %3230 = vst [vmem:[#allocation8_spill] sm:$0xff] %v2374_v63  ;;  %v866_v50 = vpop.xlane.xlu0 %865  ;;  %v853_v60 = vcvt.f32.s32 %v852_v33  ;;  %vm948_vm8 = vcmp.eq.s32.totalorder %v2154_v47, %v2374_v63  ;;  %v2395_v39 = vcvt.s32.f32 %v1044_v56 }
 0x43e   :  { %v867_v26 = vcvt.f32.s32 %v866_v50  ;;  %v2397_v36 = vcvt.s32.f32 %v1058_v40  ;;  %v2402_v27 = vsel %vm948_vm8, 2147483648, %v2154_v47  ;;  %vm949_vm9 = vcmp.eq.s32.totalorder %v2157_v48, %v2388_v38 }
 0x43f   :  { %1047 = vmax.xlane.f32.xlu1 %v2395_v39  ;;  %v2406_v32 = vadd.s32 %v855_v28, %v853_v60  ;;  %v1072_v31 = vshra.s32 %v2402_v27, 16  ;;  %v2415_v47 = vsel %vm949_vm9, 2147483648, %v2157_v48  ;;  %v897_v50 = vshll.u32 %v896_v44, 16 }
 0x440   :  { %v880_v41 = vpop.xlane.xlu1 %879  ;;  %v2408_v2 = vadd.s32 %v869_v45, %v867_v26  ;;  %1061 = vmax.xlane.f32.xlu0 %v2397_v36  ;;  %v1086_v33 = vshra.s32 %v2415_v47, 16  ;;  %v911_v48 = vshll.u32 %v910_v10, 16  ;;  %v925_v56 = vshll.u32 %v924_v11, 16 }
 0x441   :  { %v894_v62 = vpop.xlane.xlu0 %893  ;;  %v881_v42 = vcvt.f32.s32 %v880_v41  ;;  %v2419_v57 = vcvt.s32.f32 %v1072_v31  ;;  %vm950_vm10 = vcmp.eq.s32.totalorder %v2169_v15, %v2406_v32  ;;  %v939_v60 = vshll.u32 %v938_v55, 16 }
 0x442   :  { %v895_v43 = vcvt.f32.s32 %v894_v62  ;;  %v2424_v12 = vcvt.s32.f32 %v1086_v33  ;;  %vm951_vm11 = vcmp.eq.s32.totalorder %v2174_v17, %v2408_v2  ;;  %v2434_v3 = vsel %vm950_vm10, 2147483648, %v2169_v15 }
 0x443   :  { %v2417_v54 = vadd.s32 %v883_v52, %v881_v42  ;;  %1075 = vmax.xlane.f32.xlu1 %v2419_v57  ;;  %v2437_v41 = vsel %vm951_vm11, 2147483648, %v2174_v17  ;;  %v1100_v28 = vshra.s32 %v2434_v3, 16 }
 0x444   :  { %v908_v4 = vpop.xlane.xlu1 %907  ;;  %v2430_v40 = vadd.s32 %v897_v50, %v895_v43  ;;  %1089 = vmax.xlane.f32.xlu0 %v2424_v12  ;;  %v1114_v45 = vshra.s32 %v2437_v41, 16 }
 0x445   :  { %v922_v58 = vpop.xlane.xlu0 %921  ;;  %v909_v7 = vcvt.f32.s32 %v908_v4  ;;  %vm952_vm12 = vcmp.eq.s32.totalorder %v2177_v20, %v2417_v54  ;;  %v2455_v44 = vcvt.s32.f32 %v1100_v28 }
 0x446   :  { %v923_v14 = vcvt.f32.s32 %v922_v58  ;;  %v2448_v42 = vsel %vm952_vm12, 2147483648, %v2177_v20  ;;  %vm953_vm13 = vcmp.eq.s32.totalorder %v2188_v29, %v2430_v40  ;;  %v2457_v4 = vcvt.s32.f32 %v1114_v45 }
 0x447   :  { %v2441_v26 = vadd.s32 %v911_v48, %v909_v7  ;;  %v1128_v17 = vshra.s32 %v2448_v42, 16  ;;  %v2460_v52 = vsel %vm953_vm13, 2147483648, %v2188_v29  ;;  %1103 = vmax.xlane.f32.xlu1 %v2455_v44  ;;  %v987_v7 = vand.u32 65535, %v2328_v19 }
 0x448   :  { %v936_v8 = vpop.xlane.xlu1 %935  ;;  %v2443_v62 = vadd.s32 %v925_v56, %v923_v14  ;;  %1117 = vmax.xlane.f32.xlu0 %v2457_v4  ;;  %v1142_v31 = vshra.s32 %v2460_v52, 16  ;;  %v1015_v19 = vand.u32 65535, %v2354_v1  ;;  %v1057_v1 = vand.u32 65535, %v2386_v5 }
 0x449   :  { %v937_v35 = vcvt.f32.s32 %v936_v8  ;;  %vm954_vm14 = vcmp.eq.s32.totalorder %v2191_v30, %v2441_v26  ;;  %v2466_v20 = vcvt.s32.f32 %v1128_v17  ;;  %v1001_v8 = vand.u32 65535, %v2336_v13 }
 0x44a   :  { %v2470_v10 = vsel %vm954_vm14, 2147483648, %v2191_v30  ;;  %vm955_vm15 = vcmp.eq.s32.totalorder %v2200_v23, %v2443_v62  ;;  %v2480_v43 = vcvt.s32.f32 %v1142_v31  ;;  %v989_v48 = vcvt.s32.f32 %v987_v7 }
 0x44b   :  { %v2450_v15 = vadd.s32 %v939_v60, %v937_v35  ;;  %v1156_v29 = vshra.s32 %v2470_v10, 16  ;;  %v2476_v11 = vsel %vm955_vm15, 2147483648, %v2200_v23  ;;  %1131 = vmax.xlane.f32.xlu1 %v2466_v20  ;;  %v1003_v35 = vcvt.s32.f32 %v1001_v8 }
 0x44c   :  { %v1170_v58 = vshra.s32 %v2476_v11, 16  ;;  %1145 = vmax.xlane.f32.xlu0 %v2480_v43  ;;  %v973_v60 = vand.u32 65535, %v2317_v0  ;;  %v1059_v7 = vcvt.s32.f32 %v1057_v1  ;;  %v1071_v8 = vand.u32 65535, %v2402_v27 }
 0x44d   :  { %vm956_vm0 = vcmp.eq.s32.totalorder %v2212_v51, %v2450_v15  ;;  %v2488_v30 = vcvt.s32.f32 %v1156_v29  ;;  %v1043_v29 = vand.u32 65535, %v2383_v59 }
 0x44e   :  { %v2484_v33 = vsel %vm956_vm0, 2147483648, %v2212_v51  ;;  %v2490_v50 = vcvt.s32.f32 %v1170_v58  ;;  %v975_v13 = vcvt.s32.f32 %v973_v60 }
 0x44f   :  { %v1184_v23 = vshra.s32 %v2484_v33, 16  ;;  %1159 = vmax.xlane.f32.xlu1 %v2488_v30 }
 0x450   :  { %1173 = vmax.xlane.f32.xlu0 %v2490_v50 }
 0x451   :  { %v2495_v55 = vcvt.s32.f32 %v1184_v23 }
 0x453   :  { %1187 = vmax.xlane.f32.xlu1 %v2495_v55 }
 0x4be   :  { %v2498_v51 = vpop.xlane.xlu0 %977 }
 0x4bf   :  { %vm979_vm3 = vcmp.eq.f32.partialorder %v2325_v22, %v2498_v51  ;;  %v1045_v22 = vcvt.s32.f32 %v1043_v29 }
 0x4c0   :  { %v980_v17 = vsel %vm979_vm3, %v975_v13, -inf  ;;  %vm1455_vm3 = vcmp.eq.s32.totalorder %v2077_v49, 1 }
 0x4c1   :  { %v2502_v14 = vpop.xlane.xlu1 %991 }
 0x4c2   :  { %v2504_v56 = vpop.xlane.xlu0 %1005  ;;  %vm993_vm1 = vcmp.eq.f32.partialorder %v2342_v9, %v2502_v14  ;;  %v1017_v9 = vcvt.s32.f32 %v1015_v19 }
 0x4c3   :  { %v994_v28 = vsel %vm993_vm1, %v989_v48, -inf  ;;  %vm1007_vm2 = vcmp.eq.f32.partialorder %v2346_v37, %v2504_v56  ;;  %vm1389_vm1 = vcmp.eq.s32.totalorder %v2077_v49, 0 }
 0x4c4   :  { %995 = vmax.xlane.f32.xlu1 %v994_v28  ;;  %v1008_v45 = vsel %vm1007_vm2, %v1003_v35, -inf  ;;  %v1073_v35 = vcvt.s32.f32 %v1071_v8  ;;  %v1113_v28 = vand.u32 65535, %v2437_v41  ;;  %vm1438_vm2 = vcmp.eq.s32.totalorder %v2077_v49, 8 }
 0x4c5   :  { %1009 = vmax.xlane.f32.xlu0 %v1008_v45 }
 0x4c6   :  { %v1115_v13 = vcvt.s32.f32 %v1113_v28 }
 0x4c7   :  { %v2514_v31 = vpop.xlane.xlu1 %1019 }
 0x4c8   :  { %vm1021_vm4 = vcmp.eq.f32.partialorder %v2367_v18, %v2514_v31  ;;  %v1029_v18 = vand.u32 65535, %v2364_v34 }
 0x4c9   :  { %981 = vmax.xlane.f32.xlu0 %v980_v17  ;;  %v2518_v0 = vpop.xlane.xlu0 %1033  ;;  %v1022_v37 = vsel %vm1021_vm4, %v1017_v9, -inf  ;;  %v1127_v17 = vand.u32 65535, %v2448_v42  ;;  %vm1488_vm4 = vcmp.eq.s32.totalorder %v2077_v49, 9 }
 0x4ca   :  { %1023 = vmax.xlane.f32.xlu1 %v1022_v37  ;;  %vm1035_vm7 = vcmp.eq.f32.partialorder %v2377_v6, %v2518_v0  ;;  %v1031_v60 = vcvt.s32.f32 %v1029_v18  ;;  %v1183_v18 = vand.u32 65535, %v2484_v33 }
 0x4cb   :  { %v1129_v42 = vcvt.s32.f32 %v1127_v17 }
 0x4cc   :  { %v2522_v58 = vpop.xlane.xlu1 %1047  ;;  %v1036_v27 = vsel %vm1035_vm7, %v1031_v60, -inf  ;;  %v1263_v60 = vand.u32 127, %v2320_v25 }
 0x4cd   :  { %v2524_v23 = vpop.xlane.xlu0 %1061  ;;  %vm1049_vm5 = vcmp.eq.f32.partialorder %v2395_v39, %v2522_v58 }
 0x4ce   :  { %v1050_v48 = vsel %vm1049_vm5, %v1045_v22, -inf  ;;  %vm1063_vm6 = vcmp.eq.f32.partialorder %v2397_v36, %v2524_v23  ;;  %v1099_v36 = vand.u32 65535, %v2434_v3 }
 0x4cf   :  { %1051 = vmax.xlane.f32.xlu1 %v1050_v48  ;;  %v1064_v59 = vsel %vm1063_vm6, %v1059_v7, -inf  ;;  %v1141_v48 = vand.u32 65535, %v2460_v52 }
 0x4d0   :  { %1065 = vmax.xlane.f32.xlu0 %v1064_v59  ;;  %v2534_v5 = vpop.xlane.xlu1 %1075  ;;  %v1101_v19 = vcvt.s32.f32 %v1099_v36  ;;  %v1185_v59 = vcvt.s32.f32 %v1183_v18  ;;  %v1266_v36 = vand.u32 127, %v2358_v53 }
 0x4d1   :  { %vm1077_vm8 = vcmp.eq.f32.partialorder %v2419_v57, %v2534_v5  ;;  %v2538_v39 = vpop.xlane.xlu0 %1089  ;;  %v1085_v57 = vand.u32 65535, %v2415_v47  ;;  %v1155_v47 = vand.u32 65535, %v2470_v10 }
 0x4d2   :  { %v1078_v34 = vsel %vm1077_vm8, %v1073_v35, -inf  ;;  %vm1091_vm11 = vcmp.eq.f32.partialorder %v2424_v12, %v2538_v39  ;;  %v1143_v35 = vcvt.s32.f32 %v1141_v48 }
 0x4d3   :  { %1079 = vmax.xlane.f32.xlu1 %v1078_v34  ;;  %v1087_v29 = vcvt.s32.f32 %v1085_v57  ;;  %v1157_v7 = vcvt.s32.f32 %v1155_v47  ;;  %v3208_v57 = vand.u32 4294967168, %v2314_v61  ;;  %v2600_v47 = vsub.s32 127, %v1266_v36 }
 0x4d4   :  { %1037 = vmax.xlane.f32.xlu0 %v1036_v27  ;;  %v2542_v45 = vpop.xlane.xlu1 %1103  ;;  %v1265_v27 = vand.u32 127, %v2344_v21 }
 0x4d5   :  { %v2544_v6 = vpop.xlane.xlu0 %1117  ;;  %vm1105_vm9 = vcmp.eq.f32.partialorder %v2455_v44, %v2542_v45  ;;  %v1169_v44 = vand.u32 65535, %v2476_v11  ;;  %v1092_v1 = vsel %vm1091_vm11, %v1087_v29, -inf }
 0x4d6   :  { %vm1119_vm10 = vcmp.eq.f32.partialorder %v2457_v4, %v2544_v6  ;;  %v1106_v9 = vsel %vm1105_vm9, %v1101_v19, -inf  ;;  %v2598_v29 = vsub.s32 127, %v1265_v27  ;;  %v1276_v27 = vand.u32 127, %v2450_v15 }
 0x4d7   :  { %v1120_v3 = vsel %vm1119_vm10, %v1115_v13, -inf  ;;  %1107 = vmax.xlane.f32.xlu1 %v1106_v9  ;;  %v1171_v8 = vcvt.s32.f32 %v1169_v44  ;;  %v2590_v13 = vsub.s32 127, %v1263_v60  ;;  %v1269_v44 = vand.u32 127, %v2388_v38 }
 0x4d8   :  { %1121 = vmax.xlane.f32.xlu0 %v1120_v3  ;;  %v2554_v41 = vpop.xlane.xlu1 %1131  ;;  %v1268_v3 = vand.u32 127, %v2374_v63 }
 0x4d9   :  { %v2556_v37 = vpop.xlane.xlu0 %1145  ;;  %vm1133_vm12 = vcmp.eq.f32.partialorder %v2466_v20, %v2554_v41 }
 0x4da   :  { %v1134_v4 = vsel %vm1133_vm12, %v1129_v42, -inf  ;;  %vm1147_vm15 = vcmp.eq.f32.partialorder %v2480_v43, %v2556_v37  ;;  %v1264_v43 = vand.u32 127, %v2339_v16 }
 0x4db   :  { %1135 = vmax.xlane.f32.xlu1 %v1134_v4  ;;  %v1148_v33 = vsel %vm1147_vm15, %v1143_v35, -inf  ;;  %v998_v35 = vcvt.f32.s32 %v2502_v14  ;;  %v1026_v4 = vcvt.f32.s32 %v2514_v31  ;;  %v1040_v14 = vcvt.f32.s32 %v2518_v0 }
 0x4dc   :  { %1093 = vmax.xlane.f32.xlu0 %v1092_v1  ;;  %v2562_v22 = vpop.xlane.xlu1 %1159  ;;  %v2594_v9 = vsub.s32 127, %v1264_v43  ;;  %v2620_v43 = vsub.s32 127, %v1269_v44  ;;  %v1275_v44 = vand.u32 127, %v2443_v62  ;;  %v1096_v0 = vcvt.f32.s32 %v2538_v39 }
 0x4dd   :  { %v2564_v12 = vpop.xlane.xlu0 %1173  ;;  %vm1161_vm13 = vcmp.eq.f32.partialorder %v2488_v30, %v2562_v22  ;;  %v1261_v30 = vand.u32 127, %v2309_v46 }
 0x4de   :  { %vm1175_vm14 = vcmp.eq.f32.partialorder %v2490_v50, %v2564_v12  ;;  %v1162_v20 = vsel %vm1161_vm13, %v1157_v7, -inf  ;;  %v1262_v50 = vand.u32 127, %v2314_v61  ;;  %v1270_v7 = vand.u32 127, %v2406_v32  ;;  %3232 = vst [vmem:[#allocation10_spill] sm:$0xff] %v2620_v43 }
 0x4df   :  { %v1176_v10 = vsel %vm1175_vm14, %v1171_v8, -inf  ;;  %1163 = vmax.xlane.f32.xlu1 %v1162_v20  ;;  %v2581_v34 = vsub.s32 127, %v1261_v30  ;;  %v1271_v8 = vand.u32 127, %v2408_v2  ;;  %v1272_v20 = vand.u32 127, %v2417_v54 }
 0x4e0   :  { %1177 = vmax.xlane.f32.xlu0 %v1176_v10  ;;  %v2574_v11 = vpop.xlane.xlu1 %1187  ;;  %v2586_v28 = vsub.s32 127, %v1262_v50  ;;  %v1273_v10 = vand.u32 127, %v2430_v40  ;;  %v1274_v50 = vand.u32 127, %v2441_v26  ;;  %v2651_v18 = vsub.s32 127, %v1275_v44 }
 0x4e1   :  { %vm1189_vm0 = vcmp.eq.f32.partialorder %v2495_v55, %v2574_v11  ;;  %v1267_v55 = vand.u32 127, %v2360_v24  ;;  %v984_v30 = vcvt.f32.s32 %v2498_v51  ;;  %v1082_v44 = vcvt.f32.s32 %v2534_v5 }
 0x4e2   :  { %v1190_v52 = vsel %vm1189_vm0, %v1185_v59, -inf  ;;  %v2626_v59 = vsub.s32 127, %v1271_v8  ;;  %v2631_v17 = vsub.s32 127, %v1273_v10  ;;  %3238 = vst [vmem:[#allocation16_spill] sm:$0xff] %v2651_v18  ;;  %v999_v10 = vshll.u32 %v998_v35, 16 }
 0x4e3   :  { %1191 = vmax.xlane.f32.xlu1 %v1190_v52  ;;  %v2604_v1 = vsub.s32 127, %v1267_v55  ;;  %v2624_v55 = vsub.s32 127, %v1270_v7  ;;  %v2649_v52 = vsub.s32 127, %v1274_v50  ;;  %v1054_v7 = vcvt.f32.s32 %v2522_v58 }
 0x4e4   :  { %1149 = vmax.xlane.f32.xlu0 %v1148_v33  ;;  %v2615_v33 = vsub.s32 127, %v1268_v3  ;;  %3234 = vst [vmem:[#allocation12_spill] sm:$0xff] %v2626_v59  ;;  %v2629_v3 = vsub.s32 127, %v1272_v20  ;;  %3236 = vst [vmem:[#allocation14_spill] sm:$0xff] %v2631_v17  ;;  %v1012_v20 = vcvt.f32.s32 %v2504_v56  ;;  %v2653_v56 = vsub.s32 127, %v1276_v27 }
 0x4e5   :  { %3233 = vst [vmem:[#allocation11_spill] sm:$0xff] %v2624_v55  ;;  %3237 = vst [vmem:[#allocation15_spill] sm:$0xff] %v2649_v52  ;;  %v1068_v50 = vcvt.f32.s32 %v2524_v23  ;;  %v985_v23 = vshll.u32 %v984_v30, 16  ;;  %v2672_v27 = vshll.u32 %v1040_v14, 16  ;;  %v1055_v35 = vshll.u32 %v1054_v7, 16 }
 0x4e6   :  { %3231 = vst [vmem:[#allocation9_spill] sm:$0xff] %v2615_v33  ;;  %3235 = vst [vmem:[#allocation13_spill] sm:$0xff] %v2629_v3  ;;  %v1013_v19 = vshll.u32 %v1012_v20, 16  ;;  %v3240_v51 = vand.u32 4294967168, %v2320_v25  ;;  %v1110_v7 = vcvt.f32.s32 %v2542_v45  ;;  %v1124_v14 = vcvt.f32.s32 %v2544_v6 }
 0x4e7   :  { %3239 = vst [vmem:[#allocation17_spill] sm:$0xff] %v2653_v56  ;;  %v1069_v5 = vshll.u32 %v1068_v50, 16  ;;  %v1166_v17 = vcvt.f32.s32 %v2562_v22  ;;  %v3241_v6 = vand.u32 4294967168, %v2309_v46  ;;  %v1194_v22 = vcvt.f32.s32 %v2574_v11 }
 0x4e8   :  { %v3245_v3 = vand.u32 4294967168, %v2314_v61  ;;  %v3247_v55 = vand.u32 4294967168, %v2360_v24 }
 0x551   :  { %v996_v8 = vpop.xlane.xlu1 %995 }
 0x552   :  { %v997_v48 = vcvt.f32.s32 %v996_v8  ;;  %v1010_v36 = vpop.xlane.xlu0 %1009 }
 0x553   :  { %v1011_v60 = vcvt.f32.s32 %v1010_v36 }
 0x554   :  { %v2660_v42 = vadd.s32 %v999_v10, %v997_v48  ;;  %v1027_v48 = vshll.u32 %v1026_v4, 16 }
 0x555   :  { %v2665_v8 = vadd.s32 %v1013_v19, %v1011_v60  ;;  %v2678_v60 = vshll.u32 %v1082_v44, 16  ;;  %v1152_v44 = vcvt.f32.s32 %v2556_v37  ;;  %v2703_v37 = vshll.u32 %v1110_v7, 16 }
 0x556   :  { %v3209_v58 = vand.u32 4294967168, %v2660_v42  ;;  %v982_v36 = vpop.xlane.xlu0 %981  ;;  %v3242_v7 = vand.u32 4294967168, %v2339_v16 }
 0x557   :  { %v3212_v20 = vand.u32 4294967168, %v2665_v8  ;;  %v983_v10 = vcvt.f32.s32 %v982_v36  ;;  %v1024_v30 = vpop.xlane.xlu1 %1023  ;;  %v1311_v45 = vand.u32 127, %v2665_v8  ;;  %v3246_v59 = vand.u32 4294967168, %v2665_v8 }
 0x558   :  { %v1358_v19 = vadd.f32 %v3209_v58, %v3208_v57  ;;  %v1025_v31 = vcvt.f32.s32 %v1024_v30  ;;  %v1138_v57 = vcvt.f32.s32 %v2554_v41  ;;  %v2713_v30 = vshll.u32 %v1152_v44, 16 }
 0x559   :  { %v1359_v4 = vadd.f32 %v3212_v20, %v3240_v51  ;;  %v2685_v36 = vadd.s32 %v985_v23, %v983_v10  ;;  %v1310_v51 = vand.u32 127, %v2660_v42  ;;  %v2696_v10 = vshll.u32 %v1096_v0, 16 }
 0x55a   :  { %v1374_v50 = vadd.f32 1e-08, %v1358_v19  ;;  %v2694_v23 = vadd.s32 %v1027_v48, %v1025_v31  ;;  %v1180_v19 = vcvt.f32.s32 %v2564_v12  ;;  %v2708_v31 = vshll.u32 %v1124_v14, 16 }
 0x55b   :  { %v1375_v58 = vadd.f32 1e-08, %v1359_v4  ;;  %v3211_v39 = vand.u32 4294967168, %v2685_v36  ;;  %v2710_v0 = vshll.u32 %v1138_v57, 16  ;;  %v1309_v48 = vand.u32 127, %v2685_v36 }
 0x55c   :  { %1822 = vrcp.f32 %v1374_v50  ;;  %v3215_v4 = vand.u32 4294967168, %v2694_v23  ;;  %v2715_v50 = vshll.u32 %v1166_v17, 16  ;;  %v1052_v11 = vpop.xlane.xlu1 %1051  ;;  %v1312_v57 = vand.u32 127, %v2694_v23 }
 0x55d   :  { %1824 = vrcp.f32 %v1375_v58  ;;  %v1357_v41 = vadd.f32 %v3211_v39, %v3241_v6  ;;  %v2717_v6 = vsub.s32 127, %v1310_v51  ;;  %v2723_v39 = vsub.s32 127, %v1311_v45  ;;  %v1066_v20 = vpop.xlane.xlu0 %1065 }
 0x55e   :  { %v1360_v12 = vadd.f32 %v3215_v4, %v3242_v7  ;;  %v1053_v14 = vcvt.f32.s32 %v1052_v11  ;;  %v2728_v44 = vshll.u32 %v1194_v22, 16  ;;  %v1067_v51 = vcvt.f32.s32 %v1066_v20 }
 0x55f   :  { %v1373_v58 = vadd.f32 1e-08, %v1357_v41  ;;  %v2726_v41 = vshll.u32 %v1180_v19, 16  ;;  %v2730_v56 = vsub.s32 127, %v1309_v48  ;;  %v2741_v22 = vsub.s32 127, %v1312_v57 }
 0x560   :  { %v1376_v17 = vadd.f32 1e-08, %v1360_v12  ;;  %v2732_v18 = vadd.s32 %v1055_v35, %v1053_v14  ;;  %v1080_v48 = vpop.xlane.xlu1 %1079  ;;  %v3243_v19 = vand.u32 4294967168, %v2660_v42  ;;  %v3244_v4 = vand.u32 4294967168, %v2358_v53 }
 0x561   :  { %1826 = vrcp.f32 %v1373_v58  ;;  %v2737_v58 = vadd.s32 %v1069_v5, %v1067_v51  ;;  %v1038_v7 = vpop.xlane.xlu0 %1037  ;;  %v1341_v45 = vcvt.s32.f32 %v2730_v56 }
 0x562   :  { %1828 = vrcp.f32 %v1376_v17  ;;  %v3222_v20 = vand.u32 4294967168, %v2732_v18  ;;  %v1314_v35 = vand.u32 127, %v2732_v18  ;;  %v1081_v17 = vcvt.f32.s32 %v1080_v48 }
 0x563   :  { %v1315_v14 = vand.u32 127, %v2737_v58  ;;  %v1039_v5 = vcvt.f32.s32 %v1038_v7  ;;  %v3248_v42 = vand.u32 4294967168, %v2737_v58 }
 0x564   :  { %v1362_v52 = vadd.f32 %v3222_v20, %v3244_v4  ;;  %v2761_v7 = vsub.s32 127, %v1314_v35  ;;  %v2768_v56 = vadd.s32 %v2678_v60, %v1081_v17 }
 0x565   :  { %v2770_v33 = vsub.s32 127, %v1315_v14  ;;  %v2773_v61 = vadd.s32 %v2672_v27, %v1039_v5  ;;  %v3252_v5 = vand.u32 4294967168, %v2374_v63 }
 0x566   :  { %v1823_v12 = vpop.eup %1822  ;;  %v1378_v43 = vadd.f32 1e-08, %v1362_v52  ;;  %v3223_v4 = vand.u32 4294967168, %v2768_v56  ;;  %v1316_v35 = vand.u32 127, %v2768_v56 }
 0x567   :  { %v1825_v51 = vpop.eup %1824  ;;  %v1457_v57 = vmul.f32 %v1823_v12, %v3243_v19  ;;  %v1393_v11 = vmul.f32 %v1823_v12, %v3245_v3  ;;  %v1363_v19 = vadd.f32 %v3248_v42, %v3247_v55  ;;  %3249 = vst [vmem:[#allocation18_spill] sm:$0xff] %v2770_v33  ;;  %v1233_v60 = vand.u32 4294967168, %v2773_v61  ;;  %v1108_v3 = vpop.xlane.xlu1 %1107 }
 0x568   :  { %v2759_v48 = vmul.f32 %v1825_v51, %v3246_v59  ;;  %1830 = vrcp.f32 %v1378_v43  ;;  %v1313_v52 = vand.u32 127, %v2773_v61  ;;  %v3250_v12 = vcvt.s32.f32 %v2586_v28 }
 0x569   :  { %v1423_v59 = vsel %vm1389_vm1, %v1393_v11, 0.0  ;;  %v1379_v8 = vadd.f32 1e-08, %v1363_v19  ;;  %v3251_v11 = vand.u32 4294967168, %v2685_v36  ;;  %v1364_v43 = vadd.f32 %v3223_v4, %v3252_v5 }
 0x56a   :  { %v1440_v27 = vsel %vm1438_vm2, %v3250_v12, %v1423_v59  ;;  %v3253_v19 = vand.u32 4294967168, %v2344_v21  ;;  %v1122_v59 = vpop.xlane.xlu0 %1121  ;;  %v3254_v36 = vand.u32 4294967168, %v2309_v46  ;;  %v2802_v17 = vsub.s32 127, %v1316_v35 }
 0x56b   :  { %v1827_v55 = vpop.eup %1826  ;;  %1832 = vrcp.f32 %v1379_v8  ;;  %v1473_v8 = vsel %vm1455_vm3, %v1457_v57, %v1440_v27  ;;  %v1380_v20 = vadd.f32 1e-08, %v1364_v43  ;;  %v1109_v5 = vcvt.f32.s32 %v1108_v3  ;;  %v1136_v35 = vpop.xlane.xlu1 %1135 }
 0x56c   :  { %v1456_v14 = vmul.f32 %v1827_v55, %v3251_v11  ;;  %v1361_v28 = vadd.f32 %v1233_v60, %v3253_v19  ;;  %v1391_v12 = vmul.f32 %v1827_v55, %v3254_v36  ;;  %v1829_v11 = vpop.eup %1828  ;;  %v1123_v4 = vcvt.f32.s32 %v1122_v59 }
 0x56d   :  { %v3255_v42 = vand.u32 4294967168, %v2694_v23  ;;  %v2808_v63 = vsub.s32 127, %v1313_v52  ;;  %1834 = vrcp.f32 %v1380_v20  ;;  %v2813_v55 = vadd.s32 %v2703_v37, %v1109_v5 }
 0x56e   :  { %v1377_v19 = vadd.f32 1e-08, %v1361_v28  ;;  %v1422_v46 = vsel %vm1389_vm1, %v1391_v12, 0.0  ;;  %v2816_v57 = vadd.s32 %v2708_v31, %v1123_v4  ;;  %v3256_v3 = vcvt.s32.f32 %v2581_v34  ;;  %v1094_v52 = vpop.xlane.xlu0 %1093 }
 0x56f   :  { %v2806_v33 = vmul.f32 %v1829_v11, %v3255_v42  ;;  %v3257_v43 = vcvt.s32.f32 %v2717_v6  ;;  %v3258_v20 = vand.u32 4294967168, %v2320_v25  ;;  %v1238_v4 = vand.u32 4294967168, %v2813_v55 }
 0x570   :  { %v1439_v23 = vsel %vm1438_vm2, %v3256_v3, %v1422_v46  ;;  %1836 = vrcp.f32 %v1377_v19  ;;  %v1318_v34 = vand.u32 127, %v2813_v55  ;;  %v1239_v42 = vand.u32 4294967168, %v2816_v57 }
 0x571   :  { %v1472_v27 = vsel %vm1455_vm3, %v1456_v14, %v1439_v23  ;;  %v1490_v37 = vsel %vm1488_vm4, %v3257_v43, %v1473_v8  ;;  %v1395_v31 = vmul.f32 %v1825_v51, %v3258_v20  ;;  %v1319_v28 = vand.u32 127, %v2816_v57  ;;  %v1164_v23 = vpop.xlane.xlu1 %1163 }
 0x572   :  { %v1137_v59 = vcvt.f32.s32 %v1136_v35  ;;  %v1095_v36 = vcvt.f32.s32 %v1094_v52  ;;  %v1489_v14 = vsel %vm1488_vm4, %v1341_v45, %v1472_v27  ;;  %v2839_v25 = vsub.s32 127, %v1318_v34  ;;  %v2849_v46 = vpop.eup %1830  ;;  %v1178_v35 = vpop.xlane.xlu0 %1177 }
 0x573   :  { %v1424_v6 = vsel %vm1389_vm1, %v1395_v31, 0.0  ;;  %v3259_v51 = vand.u32 4294967168, %v2406_v32  ;;  %v3260_v5 = vand.u32 4294967168, %v2408_v2  ;;  %1505 = vxpose.xlu0.b32.start [1/16] (narrow) %v1489_v14, 16  ;;  %v3261_v52 = vcvt.s32.f32 %v2590_v13 }
 0x574   :  { %v2852_v45 = vadd.s32 %v2710_v0, %v1137_v59  ;;  %v2855_v3 = vadd.s32 %v2696_v10, %v1095_v36  ;;  %v3262_v43 = vand.u32 4294967168, %v2339_v16  ;;  %v3263_v34 = vand.u32 4294967168, %v2732_v18 }
 0x575   :  { %v1366_v8 = vadd.f32 %v1238_v4, %v3259_v51  ;;  %v1367_v19 = vadd.f32 %v1239_v42, %v3260_v5  ;;  %v1441_v27 = vsel %vm1438_vm2, %v3261_v52, %v1424_v6  ;;  %v2865_v31 = vpop.eup %1832  ;;  %v2873_v36 = vsub.s32 127, %v1319_v28  ;;  %v1192_v52 = vpop.xlane.xlu1 %1191 }
 0x576   :  { %v2863_v20 = vmul.f32 %v1829_v11, %v3262_v43  ;;  %v2870_v0 = vmul.f32 %v2849_v46, %v3263_v34  ;;  %v3264_v13 = vand.u32 4294967168, %v2737_v58  ;;  %v1240_v11 = vand.u32 4294967168, %v2852_v45  ;;  %v1150_v10 = vpop.xlane.xlu0 %1149 }
 0x577   :  { %v1382_v59 = vadd.f32 1e-08, %v1366_v8  ;;  %v1383_v16 = vadd.f32 1e-08, %v1367_v19  ;;  %v1320_v6 = vand.u32 127, %v2852_v45  ;;  %v3226_v18 = vand.u32 4294967168, %v2855_v3  ;;  %v2889_v43 = vpop.eup %1834 }
 0x578   :  { %v2878_v14 = vmul.f32 %v2865_v31, %v3264_v13  ;;  %v1317_v51 = vand.u32 127, %v2855_v3  ;;  %v1165_v5 = vcvt.f32.s32 %v1164_v23  ;;  %1506 = vxpose.xlu0.b32.cont [2/16] (narrow) %v1490_v37, 16  ;;  %v3265_v58 = vand.u32 4294967168, %v2417_v54 }
 0x579   :  { %1838 = vrcp.f32 %v1382_v59  ;;  %v1179_v19 = vcvt.f32.s32 %v1178_v35  ;;  %v3266_v59 = vand.u32 4294967168, %v2388_v38  ;;  %v1193_v13 = vcvt.f32.s32 %v1192_v52 }
 0x57a   :  { %1840 = vrcp.f32 %v1383_v16  ;;  %v1368_v8 = vadd.f32 %v1240_v11, %v3265_v58  ;;  %v2897_v37 = vadd.s32 %v2715_v50, %v1165_v5  ;;  %v2899_v16 = vpop.eup %1836  ;;  %v3267_v28 = vand.u32 4294967168, %v2768_v56 }
 0x57b   :  { %v1365_v23 = vadd.f32 %v3226_v18, %v3266_v59  ;;  %v2906_v58 = vsub.s32 127, %v1320_v6  ;;  %v2909_v34 = vadd.s32 %v2726_v41, %v1179_v19  ;;  %v2914_v50 = vmul.f32 %v2899_v16, %v1233_v60 }
 0x57c   :  { %v2904_v35 = vmul.f32 %v2889_v43, %v3267_v28  ;;  %v1384_v12 = vadd.f32 1e-08, %v1368_v8  ;;  %v2916_v5 = vsub.s32 127, %v1317_v51  ;;  %v3227_v56 = vand.u32 4294967168, %v2897_v37 }
 0x57d   :  { %v1381_v52 = vadd.f32 1e-08, %v1365_v23  ;;  %v1322_v28 = vand.u32 127, %v2897_v37  ;;  %v3228_v6 = vand.u32 4294967168, %v2909_v34  ;;  %v1323_v8 = vand.u32 127, %v2909_v34 }
 0x57e   :  { %1842 = vrcp.f32 %v1384_v12  ;;  %v3268_v41 = vand.u32 4294967168, %v2441_v26  ;;  %v2927_v60 = vadd.s32 %v2728_v44, %v1193_v13  ;;  %v1151_v51 = vcvt.f32.s32 %v1150_v10 }
 0x57f   :  { %1844 = vrcp.f32 %v1381_v52  ;;  %v2929_v19 = vsub.s32 127, %v1322_v28  ;;  %v2931_v59 = vsub.s32 127, %v1323_v8  ;;  %v3269_v12 = vand.u32 4294967168, %v2443_v62 }
 0x580   :  { %v1370_v61 = vadd.f32 %v3227_v56, %v3268_v41  ;;  %v1474_v52 = vsel %vm1455_vm3, %v2759_v48, %v1441_v27  ;;  %v1352_v18 = vcvt.s32.f32 %v2906_v58  ;;  %v3229_v44 = vand.u32 4294967168, %v2927_v60 }
 0x581   :  { %v1371_v23 = vadd.f32 %v3228_v6, %v3269_v12  ;;  %v2943_v10 = vadd.s32 %v2713_v30, %v1151_v51  ;;  %v1349_v13 = vcvt.s32.f32 %v2916_v5  ;;  %v1324_v8 = vand.u32 127, %v2927_v60 }
 0x582   :  { %v1386_v41 = vadd.f32 1e-08, %v1370_v61  ;;  %v3270_v56 = vcvt.s32.f32 %v2723_v39  ;;  %v3271_v27 = vand.u32 4294967168, %v2450_v15 }
 0x583   :  { %v1387_v28 = vadd.f32 1e-08, %v1371_v23  ;;  %v1839_v6 = vpop.eup %1838  ;;  %v1241_v61 = vand.u32 4294967168, %v2943_v10  ;;  %v1321_v23 = vand.u32 127, %v2943_v10 }
 0x584   :  { %v1491_v12 = vsel %vm1488_vm4, %v3270_v56, %v1474_v52  ;;  %1846 = vrcp.f32 %v1386_v41  ;;  %v1372_v30 = vadd.f32 %v3229_v44, %v3271_v27  ;;  %v1841_v51 = vpop.eup %1840  ;;  %v2959_v39 = vmul.f32 %v1839_v6, %v1238_v4 }
 0x585   :  { %1507 = vxpose.xlu0.b32.cont [3/16] (narrow) %v1491_v12, 16  ;;  %v1425_v52 = vsel %vm1389_vm1, %v2863_v20, 0.0  ;;  %v2968_v41 = vmul.f32 %v1841_v51, %v1239_v42  ;;  %1848 = vrcp.f32 %v1387_v28  ;;  %v3272_v27 = vand.u32 4294967168, %v2430_v40 }
 0x586   :  { %v1388_v12 = vadd.f32 1e-08, %v1372_v30 }
 0x587   :  { %v1369_v55 = vadd.f32 %v1241_v61, %v3272_v27 }
 0x588   :  { %1865 = shalt.err (!%p1862_p4)
}
 0x589   :  { %s1866_s25 = scalar_lea.hbm %s3206_s5, 1024 }
 0x58a   :  { %p1867_p5 = scmp.ne.s32.totalorder %s3206_s5, %s1866_s25  ;;  %p1870_p6 = scmp.lt.u32.totalorder %s1866_s25, %s3206_s5 }
 0x58c   :  { %p1872_p7 = pnand %p1870_p6, %p1867_p5 }
 0x58e   :  { %1875 = shalt.err (!%p1872_p7)
}
 0x58f   :  { %s1903_s30 = smov 64   ;;  %s1904_s1 = smov 4   ;;  %v2986_v57 = vsub.s32 127, %v1324_v8  ;;  %v3273_v4 = vcvt.s32.f32 %v2594_v9  ;;  %v3274_v20 = vand.u32 4294967168, %v2344_v21  ;;  %v3275_v30 = vand.u32 4294967168, %v2358_v53  ;;  %v1843_v44 = vpop.eup %1842 }
 0x590   :  { %1550 = dma.vmem_to_hbm [thread:$0]  %s1545_s4, 1024, %s3206_s5, [#allocation3], %s1903_s30, %s1903_s30, %s1904_s1   ;;  %1850 = vrcp.f32 %v1388_v12  ;;  %v1385_v56 = vadd.f32 1e-08, %v1369_v55  ;;  %v3276_v48 = vand.u32 4294967168, %v2360_v24  ;;  %v3277_v21 = vcvt.s32.f32 %v2741_v22  ;;  %v1845_v12 = vpop.eup %1844 }
 0x591   :  { %v1442_v42 = vsel %vm1438_vm2, %v3273_v4, %v1425_v52  ;;  %v1399_v28 = vmul.f32 %v2899_v16, %v3274_v20  ;;  %v1401_v27 = vmul.f32 %v2849_v46, %v3275_v30  ;;  %v3004_v52 = vsub.s32 127, %v1321_v23  ;;  %v3284_v20 = vld [vmem:[#allocation8_spill] sm:$0xff]  ;;  %s1905_s5 = smov [#allocation4]  }
 0x592   :  { %v1475_v8 = vsel %vm1455_vm3, %v2806_v33, %v1442_v42  ;;  %v1403_v9 = vmul.f32 %v2865_v31, %v3276_v48  ;;  %v1467_v24 = vmul.f32 %v1843_v44, %v1240_v11  ;;  %1852 = vrcp.f32 %v1385_v56  ;;  %s1556_s9 = sshll.u32 %s1905_s5, 4  ;;  %s1557_s9 = int_to_ptr.vmem [resolvable:$true] %s1556_s9 }
 0x593   :  { %v1492_v53 = vsel %vm1488_vm4, %v3277_v21, %v1475_v8  ;;  %v1426_v46 = vsel %vm1389_vm1, %v1399_v28, 0.0  ;;  %v1427_v16 = vsel %vm1389_vm1, %v1401_v27, 0.0  ;;  %v3278_v33 = vcvt.s32.f32 %v2598_v29  ;;  %v1847_v21 = vpop.eup %1846  ;;  %s1876_s10 = scalar_lea.vmem %s1557_s9, 256  ;;  %p1881_p9 = scmp.lt.s32.totalorder %s1557_s9, %s1557_s9 }
 0x594   :  { %1508 = vxpose.xlu0.b32.cont [4/16] (narrow) %v1492_v53, 16  ;;  %v3279_v31 = vcvt.s32.f32 %v2600_v47  ;;  %v3280_v23 = vand.u32 4294967168, %v2855_v3  ;;  %v1428_v29 = vsel %vm1389_vm1, %v1403_v9, 0.0  ;;  %v3281_v56 = vcvt.s32.f32 %v2808_v63  ;;  %p1877_p8 = scmp.ne.s32.totalorder %s1557_s9, %s1876_s10  ;;  %p1882_p10 = scmp.lt.s32.totalorder %s1876_s10, %s1876_s10 }
 0x595   :  { %v1443_v22 = vsel %vm1438_vm2, %v3278_v33, %v1426_v46  ;;  %v3282_v4 = vcvt.s32.f32 %v2761_v7  ;;  %v3283_v42 = vcvt.s32.f32 %v2604_v1  ;;  %v3286_v30 = vand.u32 4294967168, %v2388_v38  ;;  %v3289_v46 = vld [vmem:[#allocation18_spill] sm:$0xff] }
 0x596   :  { %v1444_v48 = vsel %vm1438_vm2, %v3279_v31, %v1427_v16  ;;  %v1464_v55 = vmul.f32 %v1845_v12, %v3280_v23  ;;  %v1476_v45 = vsel %vm1455_vm3, %v2914_v50, %v1443_v22  ;;  %v3287_v7 = vand.u32 4294967168, %v2406_v32  ;;  %v1849_v31 = vpop.eup %1848  ;;  %p1883_p11 = por %p1882_p10, %p1881_p9 }
 0x597   :  { %v1477_v11 = vsel %vm1455_vm3, %v2870_v0, %v1444_v48  ;;  %v1493_v47 = vsel %vm1488_vm4, %v3281_v56, %v1476_v45  ;;  %v1445_v50 = vsel %vm1438_vm2, %v3283_v42, %v1428_v29  ;;  %v3285_v0 = vand.u32 4294967168, %v3284_v20  ;;  %v3297_v45 = vld [vmem:[#allocation11_spill] sm:$0xff] }
 0x598   :  { %v1494_v3 = vsel %vm1488_vm4, %v3282_v4, %v1477_v11  ;;  %v1478_v63 = vsel %vm1455_vm3, %v2878_v14, %v1445_v50  ;;  %v1407_v27 = vmul.f32 %v1845_v12, %v3286_v30  ;;  %v1409_v8 = vmul.f32 %v1839_v6, %v3287_v7  ;;  %1509 = vxpose.xlu0.b32.cont [5/16] (narrow) %v1493_v47, 16  ;;  %p1884_p12 = pnand %p1883_p11, %p1877_p8 }
 0x599   :  { %v1405_v28 = vmul.f32 %v2889_v43, %v3285_v0  ;;  %v3288_v9 = vand.u32 4294967168, %v2408_v2  ;;  %v1356_v53 = vcvt.s32.f32 %v2986_v57  ;;  %v3290_v16 = vcvt.s32.f32 %v3289_v46  ;;  %v3293_v2 = vld [vmem:[#allocation9_spill] sm:$0xff] }
 0x59a   :  { %v3291_v38 = vand.u32 4294967168, %v2417_v54  ;;  %v3292_v32 = vand.u32 4294967168, %v2897_v37  ;;  %v1430_v33 = vsel %vm1389_vm1, %v1407_v27, 0.0  ;;  %v1431_v22 = vsel %vm1389_vm1, %v1409_v8, 0.0  ;;  %v3295_v37 = vld [vmem:[#allocation10_spill] sm:$0xff]  ;;  %v1851_v42 = vpop.eup %1850 }
 0x59b   :  { %v1411_v1 = vmul.f32 %v1841_v51, %v3288_v9  ;;  %v1495_v43 = vsel %vm1488_vm4, %v3290_v16, %v1478_v63  ;;  %v1429_v14 = vsel %vm1389_vm1, %v1405_v28, 0.0  ;;  %v3294_v51 = vcvt.s32.f32 %v3293_v2 }
 0x59c   :  { %v1413_v12 = vmul.f32 %v1843_v44, %v3291_v38  ;;  %v1469_v6 = vmul.f32 %v1847_v21, %v3292_v32  ;;  %v1353_v48 = vcvt.s32.f32 %v3004_v52  ;;  %v3296_v44 = vcvt.s32.f32 %v3295_v37  ;;  %1510 = vxpose.xlu0.b32.cont [6/16] (narrow) %v1494_v3, 16  ;;  %v1853_v8 = vpop.eup %1852 }
 0x59d   :  { %v1446_v57 = vsel %vm1438_vm2, %v3294_v51, %v1429_v14  ;;  %v3298_v11 = vcvt.s32.f32 %v3297_v45  ;;  %v3299_v56 = vcvt.s32.f32 %v2802_v17  ;;  %v1432_v4 = vsel %vm1389_vm1, %v1411_v1, 0.0  ;;  %v3316_v51 = vld [vmem:[#allocation17_spill] sm:$0xff] }
 0x59e   :  { %v1479_v54 = vsel %vm1455_vm3, %v2904_v35, %v1446_v57  ;;  %v1447_v23 = vsel %vm1438_vm2, %v3296_v44, %v1430_v33  ;;  %v3300_v50 = vcvt.s32.f32 %v2839_v25  ;;  %v1433_v28 = vsel %vm1389_vm1, %v1413_v12, 0.0 }
 0x59f   :  { %v1448_v29 = vsel %vm1438_vm2, %v3298_v11, %v1431_v22  ;;  %v1496_v47 = vsel %vm1488_vm4, %v3299_v56, %v1479_v54  ;;  %v1480_v52 = vsel %vm1455_vm3, %v1464_v55, %v1447_v23  ;;  %v3301_v55 = vld [vmem:[#allocation12_spill] sm:$0xff]  ;;  %v3303_v3 = vand.u32 4294967168, %v2909_v34  ;;  %v3318_v22 = vld [vmem:[#allocation14_spill] sm:$0xff] }
 0x5a0   :  { %v1481_v35 = vsel %vm1455_vm3, %v2959_v39, %v1448_v29  ;;  %v1497_v17 = vsel %vm1488_vm4, %v1349_v13, %v1480_v52  ;;  %v3302_v0 = vcvt.s32.f32 %v3301_v55  ;;  %v3304_v13 = vld [vmem:[#allocation13_spill] sm:$0xff]  ;;  %v3306_v27 = vand.u32 4294967168, %v2441_v26  ;;  %1511 = vxpose.xlu0.b32.cont [7/16] (narrow) %v1495_v43, 16 }
 0x5a1   :  { %v1498_v20 = vsel %vm1488_vm4, %v3300_v50, %v1481_v35  ;;  %v1470_v63 = vmul.f32 %v1849_v31, %v3303_v3  ;;  %v3305_v25 = vcvt.s32.f32 %v3304_v13  ;;  %v3307_v9 = vcvt.s32.f32 %v2873_v36 }
 0x5a2   :  { %v1449_v39 = vsel %vm1438_vm2, %v3302_v0, %v1432_v4  ;;  %v1417_v7 = vmul.f32 %v1847_v21, %v3306_v27  ;;  %v3308_v46 = vand.u32 4294967168, %v2443_v62  ;;  %v3309_v16 = vand.u32 4294967168, %v2450_v15  ;;  %v3312_v15 = vld [vmem:[#allocation15_spill] sm:$0xff] }
 0x5a3   :  { %v1482_v5 = vsel %vm1455_vm3, %v2968_v41, %v1449_v39  ;;  %v1450_v30 = vsel %vm1438_vm2, %v3305_v25, %v1433_v28  ;;  %v1468_v38 = vmul.f32 %v1853_v8, %v1241_v61  ;;  %v3310_v36 = vand.u32 4294967168, %v2430_v40 }
 0x5a4   :  { %v1499_v1 = vsel %vm1488_vm4, %v3307_v9, %v1482_v5  ;;  %v1483_v34 = vsel %vm1455_vm3, %v1467_v24, %v1450_v30  ;;  %v1419_v41 = vmul.f32 %v1849_v31, %v3308_v46  ;;  %v1421_v14 = vmul.f32 %v1851_v42, %v3309_v16  ;;  %1512 = vxpose.xlu0.b32.cont [8/16] (narrow) %v1496_v47, 16 }
 0x5a5   :  { %v1500_v26 = vsel %vm1488_vm4, %v1352_v18, %v1483_v34  ;;  %v1415_v21 = vmul.f32 %v1853_v8, %v3310_v36  ;;  %v1435_v24 = vsel %vm1389_vm1, %v1417_v7, 0.0  ;;  %v3311_v62 = vand.u32 4294967168, %v2927_v60  ;;  %v3314_v60 = vld [vmem:[#allocation16_spill] sm:$0xff] }
 0x5a6   :  { %v3313_v32 = vcvt.s32.f32 %v3312_v15  ;;  %v1436_v58 = vsel %vm1389_vm1, %v1419_v41, 0.0  ;;  %v1437_v18 = vsel %vm1389_vm1, %v1421_v14, 0.0  ;;  %v3315_v2 = vcvt.s32.f32 %v3314_v60 }
 0x5a7   :  { %v1471_v12 = vmul.f32 %v1851_v42, %v3311_v62  ;;  %v1434_v40 = vsel %vm1389_vm1, %v1415_v21, 0.0  ;;  %v3317_v57 = vcvt.s32.f32 %v3316_v51  ;;  %v3319_v31 = vcvt.s32.f32 %v3318_v22 }
 0x5a8   :  { %v1452_v10 = vsel %vm1438_vm2, %v3313_v32, %v1435_v24  ;;  %v1453_v43 = vsel %vm1438_vm2, %v3315_v2, %v1436_v58  ;;  %v3320_v37 = vcvt.s32.f32 %v2929_v19  ;;  %v3321_v11 = vcvt.s32.f32 %v2931_v59  ;;  %1513 = vxpose.xlu0.b32.cont [9/16] (narrow) %v1497_v17, 16 }
 0x5a9   :  { %v1485_v61 = vsel %vm1455_vm3, %v1469_v6, %v1452_v10  ;;  %v1454_v33 = vsel %vm1438_vm2, %v3317_v57, %v1437_v18  ;;  %v1451_v54 = vsel %vm1438_vm2, %v3319_v31, %v1434_v40  ;;  %v1486_v44 = vsel %vm1455_vm3, %v1470_v63, %v1453_v43 }
 0x5aa   :  { %v1502_v6 = vsel %vm1488_vm4, %v3320_v37, %v1485_v61  ;;  %v1487_v23 = vsel %vm1455_vm3, %v1471_v12, %v1454_v33  ;;  %v1484_v45 = vsel %vm1455_vm3, %v1468_v38, %v1451_v54  ;;  %v1503_v29 = vsel %vm1488_vm4, %v3321_v11, %v1486_v44 }
 0x5ab   :  { %v1504_v19 = vsel %vm1488_vm4, %v1356_v53, %v1487_v23  ;;  %v1501_v56 = vsel %vm1488_vm4, %v1353_v48, %v1484_v45 }
 0x5ac   :  { %1514 = vxpose.xlu0.b32.cont [10/16] (narrow) %v1498_v20, 16 }
 0x5b0   :  { %1515 = vxpose.xlu0.b32.cont [11/16] (narrow) %v1499_v1, 16 }
 0x5b4   :  { %1516 = vxpose.xlu0.b32.cont [12/16] (narrow) %v1500_v26, 16 }
 0x5b8   :  { %1517 = vxpose.xlu0.b32.cont [13/16] (narrow) %v1501_v56, 16 }
 0x5bc   :  { %1518 = vxpose.xlu0.b32.cont [14/16] (narrow) %v1502_v6, 16 }
 0x5c0   :  { %1519 = vxpose.xlu0.b32.cont [15/16] (narrow) %v1503_v29, 16 }
 0x5c4   :  { %1520 = vxpose.xlu0.b32.end [16/16] (narrow) %v1504_v19, 16 }
 0x608   :  { %v1521_v52 = vpop.trf.xlu0 }
 0x609   :  { %1537 = vst [vmem:[#allocation4] sm:$0xff] %v1521_v52 }
 0x60c   :  { %v1522_v59 = vpop.trf.xlu0 }
 0x60d   :  { %1538 = vst [vmem:[#allocation4 + $0x8] sm:$0xff] %v1522_v59 }
 0x60e   :  { %1887 = shalt.err (!%p1884_p12)
}
 0x60f   :  { %s1888_s13 = scalar_lea.hbm %s3207_s6, 256 }
 0x610   :  { %p1889_p13 = scmp.ne.s32.totalorder %s3207_s6, %s1888_s13  ;;  %p1892_p0 = scmp.lt.u32.totalorder %s1888_s13, %s3207_s6 }
 0x612   :  { %p1894_p1 = pnand %p1892_p0, %p1889_p13 }
 0x614   :  { %1897 = shalt.err (!%p1894_p1)
}
 0x615   :  { %s1906_s18 = smov 128   ;;  %s1907_s19 = smov 8  }
 0x616   :  { %1562 = dma.vmem_to_hbm [thread:$0]  %s1557_s9, 256, %s3207_s6, [#allocation5], %s1906_s18, %s1906_s18, %s1907_s19  }
 0x617   :  { %1898 = dma.done.wait [#allocation3], 1024  }
 0x618   :  { %1899 = vsyncadd [#allocation3], 4294966272 }
 0x619   :  { %1900 = dma.done.wait [#allocation5], 256  }
 0x61a   :  { %1901 = vsyncadd [#allocation5], 4294967040 }
 0x61b   :  { %1569 = vsyncpa [#allocation3], 1 }
 0x61c   :  { %1570 = vsyncpa [#allocation5], 1 }

</bundles_post_ra>
